<compile_context>
chip_gen: v7x
topology: tpu7x:2x2x1
jax: 0.10.0
libtpu: 0.0.40
codegen_flags: <defaults>
</compile_context>

<pallas_src>
import jax
import jax.numpy as jnp
from jax import lax
from jax.experimental import pallas as pl
from jax.experimental.pallas import tpu as pltpu


_GUARD = 128  # zero guard (elements) on each side of the flattened padded volume


# ----------------------------- Pallas kernel --------------------------------
def _make_fused_block_kernel(D, H, W):
    """Builds the fused (conv+IN+act) x2 kernel for a fixed spatial size."""
    Hp, Wp = H + 2, W + 2
    plane = Hp * Wp
    R = D * plane                   # compute-region length: depth planes 1..D, full h/w planes
    base = _GUARD + plane           # guarded flat index where the compute region starts
    inv_count = 1.0 / float(D * H * W)
    # Tap offset in flattened padded coordinates, (kd, kh, kw) row-major — matches
    # torch Conv3d weight.reshape(Cout, Cin, 27).
    offs = [(kd - 1) * plane + (kh - 1) * Wp + (kw - 1)
            for kd in range(3) for kh in range(3) for kw in range(3)]

    def _conv27(src_ref, w_ref):
        # 27 accumulating (Cout, C) @ (C, R) MXU dots, f32 accumulation.
        acc = None
        for t, off in enumerate(offs):
            tap = jnp.dot(w_ref[t], src_ref[:, pl.ds(base + off, R)],
                          preferred_element_type=jnp.float32)
            acc = tap if acc is None else acc + tap
        return acc

    def _norm_act(acc, maskf):
        # InstanceNorm3d (affine=False, biased var over valid voxels, eps=1e-5)
        # + LeakyReLU(0.2), folded into a single multiply per element.
        s = jnp.sum(acc * maskf, axis=-1, keepdims=True)
        mean = s * inv_count
        cent = acc - mean
        var = jnp.sum(cent * cent * maskf, axis=-1, keepdims=True) * inv_count
        scale = lax.rsqrt(var + 1e-5)
        return cent * jnp.where(cent >= 0, scale, 0.2 * scale)

    def kernel(x_ref, mask_ref, w1_ref, w2_ref, o_ref, y_scr):
        # x_ref:    (Cin,  QG)      bf16  guarded flattened padded sample
        # mask_ref: (1,    R)       f32   1.0 at valid voxels, 0.0 on the padding ring
        # w1_ref:   (27, Cout, Cin) bf16
        # w2_ref:   (27, Cout, Cout)bf16
        # o_ref:    (Cout, R)       f32   block output (padded-plane layout)
        # y_scr:    (Cout, QG)      bf16  inter-layer activation (padded layout)
        maskf = mask_ref[...]
        # Zero scratch so guards + padding ring act as conv zero-padding for layer 2.
        y_scr[...] = jnp.zeros(y_scr.shape, y_scr.dtype)

        # ---- layer 1: conv3d -> instance-norm -> leaky-relu ----
        a1 = _conv27(x_ref, w1_ref)                      # (Cout, R) f32
        y1 = _norm_act(a1, maskf) * maskf                # zero the padding ring
        y_scr[:, pl.ds(base, R)] = y1.astype(y_scr.dtype)

        # ---- layer 2: conv3d -> instance-norm -> leaky-relu ----
        a2 = _conv27(y_scr, w2_ref)                      # (Cout, R) f32
        o_ref[...] = _norm_act(a2, maskf)                # ring junk is sliced off outside

    return kernel, R, plane


def _vmem_limit_bytes():
    """Generation-aware VMEM cap (3/4 of physical, <=96MiB), safe fallback."""
    try:
        cap = pltpu.get_tpu_info().vmem_capacity_bytes
        return int(min(cap * 3 // 4, 96 * 1024 * 1024))
    except Exception:
        return 48 * 1024 * 1024


# ------------------------------ JAX wrapper ----------------------------------
def conv3d_block_forward(x, params, inst=True):
    """Pallas implementation of conv3d_block.forward (inst=True, LeakyReLU(0.2)).

    x: (N, Cin, D, H, W) f32; params = (w1, b1, w2, b2) with torch Conv3d layouts.
    """
    if not inst:
        # TODO(synk): BatchNorm3d branch (inst=False) not implemented; bias-drop
        # below would also be invalid without the per-instance mean subtraction.
        raise NotImplementedError("conv3d_block Pallas kernel only supports inst=True")

    w1, b1, w2, b2 = params
    # Conv bias is a per-channel constant; the affine-free InstanceNorm that
    # immediately follows subtracts the per-channel mean, so the bias cancels
    # exactly (variance unchanged) -> dropped.
    del b1, b2

    N, Cin, D, H, W = x.shape
    Cout = w1.shape[0]
    Dp, Hp, Wp = D + 2, H + 2, W + 2
    assert Wp + 1 <= _GUARD, "spatial width too large for the fixed guard"
    Q = Dp * Hp * Wp
    QG = Q + 2 * _GUARD

    kernel, R, plane = _make_fused_block_kernel(D, H, W)

    # bf16 BEFORE padding/reshaping so no f32 temporaries are materialized.
    xb = x.astype(jnp.bfloat16)
    xp = jnp.pad(xb, ((0, 0), (0, 0), (1, 1), (1, 1), (1, 1)))          # (N,Cin,Dp,Hp,Wp)
    xg = jnp.pad(xp.reshape(N, Cin, Q), ((0, 0), (0, 0), (_GUARD, _GUARD)))  # (N,Cin,QG)

    # Validity mask over the compute region (depth is always interior there).
    r = jnp.arange(R, dtype=jnp.int32)
    jp = r % plane
    hp = jp // Wp
    wp = jp % Wp
    mask = (((hp >= 1) & (hp <= H) & (wp >= 1) & (wp <= W))
            .astype(jnp.float32).reshape(1, R))

    # (Cout, Cin, 3,3,3) -> (27, Cout, Cin), tap order kd*9 + kh*3 + kw.
    w1m = jnp.transpose(w1.reshape(Cout, Cin, 27), (2, 0, 1)).astype(jnp.bfloat16)
    w2m = jnp.transpose(w2.reshape(Cout, Cout, 27), (2, 0, 1)).astype(jnp.bfloat16)

    out = pl.pallas_call(
        kernel,
        out_shape=jax.ShapeDtypeStruct((N, Cout, R), jnp.float32),
        grid_spec=pltpu.PrefetchScalarGridSpec(
            num_scalar_prefetch=0,
            grid=(N,),
            in_specs=[
                pl.BlockSpec((None, Cin, QG), lambda n: (n, 0, 0)),
                pl.BlockSpec((1, R), lambda n: (0, 0)),
                pl.BlockSpec((27, Cout, Cin), lambda n: (0, 0, 0)),
                pl.BlockSpec((27, Cout, Cout), lambda n: (0, 0, 0)),
            ],
            out_specs=pl.BlockSpec((None, Cout, R), lambda n: (n, 0, 0)),
            scratch_shapes=[pltpu.VMEM((Cout, QG), jnp.bfloat16)],
        ),
        compiler_params=pltpu.CompilerParams(
            dimension_semantics=("parallel",),
            vmem_limit_bytes=_vmem_limit_bytes()),
    )(xg, mask, w1m, w2m)

    # Padded-plane layout -> NCDHW: drop the h/w padding ring.
    out = out.reshape(N, Cout, D, Hp, Wp)[:, :, :, 1:H + 1, 1:W + 1]
    return out


# ------------------------------ reference ------------------------------------
def _ref_layer(x, w, b):
    y = lax.conv_general_dilated(
        x, w, window_strides=(1, 1, 1), padding=((1, 1), (1, 1), (1, 1)),
        dimension_numbers=("NCDHW", "OIDHW", "NCDHW"))
    y = y + b.reshape(1, -1, 1, 1, 1)
    mean = jnp.mean(y, axis=(2, 3, 4), keepdims=True)
    var = jnp.mean((y - mean) ** 2, axis=(2, 3, 4), keepdims=True)
    yn = (y - mean) * lax.rsqrt(var + 1e-5)
    return jnp.where(yn >= 0, yn, 0.2 * yn)


def conv3d_block_ref(x, params):
    w1, b1, w2, b2 = params
    return _ref_layer(_ref_layer(x, w1, b1), w2, b2)


# --------------------------------- main ---------------------------------------
if __name__ == "__main__":
    key = jax.random.PRNGKey(0)
    N, ch_in, ch_out = 2, 4, 8
    D = H = W = 8

    k_x, k_w1, k_b1, k_w2, k_b2 = jax.random.split(key, 5)
    x = jax.random.normal(k_x, (N, ch_in, D, H, W), dtype=jnp.float32)

    # Deterministic synthetic parameters (shapes match nn.Conv3d in the module).
    w1 = 0.1 * jax.random.normal(k_w1, (ch_out, ch_in, 3, 3, 3), dtype=jnp.float32)
    b1 = 0.1 * jax.random.normal(k_b1, (ch_out,), dtype=jnp.float32)
    w2 = 0.1 * jax.random.normal(k_w2, (ch_out, ch_out, 3, 3, 3), dtype=jnp.float32)
    b2 = 0.1 * jax.random.normal(k_b2, (ch_out,), dtype=jnp.float32)
    params = (w1, b1, w2, b2)

    out = jax.block_until_ready(jax.jit(conv3d_block_forward)(x, params))
    ref = conv3d_block_ref(x, params)   # f32 reference WITH bias

    assert out.shape == (N, ch_out, D, H, W)
    assert bool(jnp.all(jnp.isfinite(out)))
    max_abs = float(jnp.max(jnp.abs(out - ref)))
    rel_l2 = float(jnp.linalg.norm((out - ref).ravel())
                   / (jnp.linalg.norm(ref.ravel()) + 1e-12))
    # bf16 operands with f32 accumulation through two layers; outputs are
    # instance-normalized (O(1)), so both absolute and relative bounds are meaningful.
    assert max_abs < 5e-2, f"max abs err {max_abs}"
    assert rel_l2 < 5e-2, f"rel l2 err {rel_l2}"

    print("KERNEL_OK")
</pallas_src>

<mosaic_0001>
module attributes {stable_mosaic.version = 11 : i64} {
  func.func @kernel(%arg0: i32, %arg1: memref<1x4x1256xbf16, #tpu.memory_space<vmem>>, %arg2: memref<1x800xf32, #tpu.memory_space<vmem>>, %arg3: memref<27x8x4xbf16, #tpu.memory_space<vmem>>, %arg4: memref<27x8x8xbf16, #tpu.memory_space<vmem>>, %arg5: memref<1x8x800xf32, #tpu.memory_space<vmem>>, %arg6: memref<8x1256xbf16, #tpu.memory_space<vmem>>) attributes {dimension_semantics = [#tpu.dimension_semantics<parallel>], iteration_bounds = array<i64: 2>, scalar_prefetch = 0 : i64, scratch_operands = 1 : i64, tpu.core_type = #tpu.core_type<tc>, window_params = [{transform_indices = @transform_0, window_bounds = array<i64: 1, 4, 1256>}, {pipeline_mode = #tpu.pipeline_mode<synchronous>, transform_indices = @transform_1, window_bounds = array<i64: 1, 800>}, {pipeline_mode = #tpu.pipeline_mode<synchronous>, transform_indices = @transform_2, window_bounds = array<i64: 27, 8, 4>}, {pipeline_mode = #tpu.pipeline_mode<synchronous>, transform_indices = @transform_3, window_bounds = array<i64: 27, 8, 8>}, {transform_indices = @transform_4, window_bounds = array<i64: 1, 8, 800>}]} {
    %c0 = arith.constant 0 : index
    %c0_0 = arith.constant 0 : index
    %0 = vector.load %arg2[%c0, %c0_0] : memref<1x800xf32, #tpu.memory_space<vmem>>, vector<1x800xf32>
    %cst = arith.constant 0.000000e+00 : bf16
    %1 = vector.broadcast %cst : bf16 to vector<8x1256xbf16>
    %c0_1 = arith.constant 0 : index
    %c0_2 = arith.constant 0 : index
    %2 = vector.load %arg6[%c0_1, %c0_2] : memref<8x1256xbf16, #tpu.memory_space<vmem>>, vector<8x1256xbf16>
    tpu.vector_store %arg6[%c0_1, %c0_2], %1 {strides = array<i32>} : memref<8x1256xbf16, #tpu.memory_space<vmem>>, vector<8x1256xbf16>,
    %c0_3 = arith.constant 0 : index
    %c0_4 = arith.constant 0 : index
    %c0_5 = arith.constant 0 : index
    %3 = vector.load %arg3[%c0_3, %c0_4, %c0_5] : memref<27x8x4xbf16, #tpu.memory_space<vmem>>, vector<1x8x4xbf16>
    %4 = vector.shape_cast %3 : vector<1x8x4xbf16> to vector<8x4xbf16>
    %c0_6 = arith.constant 0 : index
    %c0_7 = arith.constant 0 : index
    %c117 = arith.constant 117 : index
    %5 = vector.load %arg1[%c0_6, %c0_7, %c117] : memref<1x4x1256xbf16, #tpu.memory_space<vmem>>, vector<1x4x800xbf16>
    %6 = vector.shape_cast %5 : vector<1x4x800xbf16> to vector<4x800xbf16>
    %cst_8 = arith.constant dense<0.000000e+00> : vector<8x800xf32>
    %7 = tpu.matmul %4, %6, %cst_8 {dimension_numbers = #tpu.dot_dimension_numbers<[1], [0], [0], [1], [0, 0, 1, 1], [], []>} : vector<8x4xbf16>, vector<4x800xbf16>, vector<8x800xf32> -> vector<8x800xf32>
    %c1 = arith.constant 1 : index
    %c0_9 = arith.constant 0 : index
    %c0_10 = arith.constant 0 : index
    %8 = vector.load %arg3[%c1, %c0_9, %c0_10] : memref<27x8x4xbf16, #tpu.memory_space<vmem>>, vector<1x8x4xbf16>
    %9 = vector.shape_cast %8 : vector<1x8x4xbf16> to vector<8x4xbf16>
    %c0_11 = arith.constant 0 : index
    %c0_12 = arith.constant 0 : index
    %c118 = arith.constant 118 : index
    %10 = vector.load %arg1[%c0_11, %c0_12, %c118] : memref<1x4x1256xbf16, #tpu.memory_space<vmem>>, vector<1x4x800xbf16>
    %11 = vector.shape_cast %10 : vector<1x4x800xbf16> to vector<4x800xbf16>
    %cst_13 = arith.constant dense<0.000000e+00> : vector<8x800xf32>
    %12 = tpu.matmul %9, %11, %cst_13 {dimension_numbers = #tpu.dot_dimension_numbers<[1], [0], [0], [1], [0, 0, 1, 1], [], []>} : vector<8x4xbf16>, vector<4x800xbf16>, vector<8x800xf32> -> vector<8x800xf32>
    %13 = arith.addf %7, %12 : vector<8x800xf32>
    %c2 = arith.constant 2 : index
    %c0_14 = arith.constant 0 : index
    %c0_15 = arith.constant 0 : index
    %14 = vector.load %arg3[%c2, %c0_14, %c0_15] : memref<27x8x4xbf16, #tpu.memory_space<vmem>>, vector<1x8x4xbf16>
    %15 = vector.shape_cast %14 : vector<1x8x4xbf16> to vector<8x4xbf16>
    %c0_16 = arith.constant 0 : index
    %c0_17 = arith.constant 0 : index
    %c119 = arith.constant 119 : index
    %16 = vector.load %arg1[%c0_16, %c0_17, %c119] : memref<1x4x1256xbf16, #tpu.memory_space<vmem>>, vector<1x4x800xbf16>
    %17 = vector.shape_cast %16 : vector<1x4x800xbf16> to vector<4x800xbf16>
    %cst_18 = arith.constant dense<0.000000e+00> : vector<8x800xf32>
    %18 = tpu.matmul %15, %17, %cst_18 {dimension_numbers = #tpu.dot_dimension_numbers<[1], [0], [0], [1], [0, 0, 1, 1], [], []>} : vector<8x4xbf16>, vector<4x800xbf16>, vector<8x800xf32> -> vector<8x800xf32>
    %19 = arith.addf %13, %18 : vector<8x800xf32>
    %c3 = arith.constant 3 : index
    %c0_19 = arith.constant 0 : index
    %c0_20 = arith.constant 0 : index
    %20 = vector.load %arg3[%c3, %c0_19, %c0_20] : memref<27x8x4xbf16, #tpu.memory_space<vmem>>, vector<1x8x4xbf16>
    %21 = vector.shape_cast %20 : vector<1x8x4xbf16> to vector<8x4xbf16>
    %c0_21 = arith.constant 0 : index
    %c0_22 = arith.constant 0 : index
    %c127 = arith.constant 127 : index
    %22 = vector.load %arg1[%c0_21, %c0_22, %c127] : memref<1x4x1256xbf16, #tpu.memory_space<vmem>>, vector<1x4x800xbf16>
    %23 = vector.shape_cast %22 : vector<1x4x800xbf16> to vector<4x800xbf16>
    %cst_23 = arith.constant dense<0.000000e+00> : vector<8x800xf32>
    %24 = tpu.matmul %21, %23, %cst_23 {dimension_numbers = #tpu.dot_dimension_numbers<[1], [0], [0], [1], [0, 0, 1, 1], [], []>} : vector<8x4xbf16>, vector<4x800xbf16>, vector<8x800xf32> -> vector<8x800xf32>
    %25 = arith.addf %19, %24 : vector<8x800xf32>
    %c4 = arith.constant 4 : index
    %c0_24 = arith.constant 0 : index
    %c0_25 = arith.constant 0 : index
    %26 = vector.load %arg3[%c4, %c0_24, %c0_25] : memref<27x8x4xbf16, #tpu.memory_space<vmem>>, vector<1x8x4xbf16>
    %27 = vector.shape_cast %26 : vector<1x8x4xbf16> to vector<8x4xbf16>
    %c0_26 = arith.constant 0 : index
    %c0_27 = arith.constant 0 : index
    %c128 = arith.constant 128 : index
    %28 = vector.load %arg1[%c0_26, %c0_27, %c128] : memref<1x4x1256xbf16, #tpu.memory_space<vmem>>, vector<1x4x800xbf16>
    %29 = vector.shape_cast %28 : vector<1x4x800xbf16> to vector<4x800xbf16>
    %cst_28 = arith.constant dense<0.000000e+00> : vector<8x800xf32>
    %30 = tpu.matmul %27, %29, %cst_28 {dimension_numbers = #tpu.dot_dimension_numbers<[1], [0], [0], [1], [0, 0, 1, 1], [], []>} : vector<8x4xbf16>, vector<4x800xbf16>, vector<8x800xf32> -> vector<8x800xf32>
    %31 = arith.addf %25, %30 : vector<8x800xf32>
    %c5 = arith.constant 5 : index
    %c0_29 = arith.constant 0 : index
    %c0_30 = arith.constant 0 : index
    %32 = vector.load %arg3[%c5, %c0_29, %c0_30] : memref<27x8x4xbf16, #tpu.memory_space<vmem>>, vector<1x8x4xbf16>
    %33 = vector.shape_cast %32 : vector<1x8x4xbf16> to vector<8x4xbf16>
    %c0_31 = arith.constant 0 : index
    %c0_32 = arith.constant 0 : index
    %c129 = arith.constant 129 : index
    %34 = vector.load %arg1[%c0_31, %c0_32, %c129] : memref<1x4x1256xbf16, #tpu.memory_space<vmem>>, vector<1x4x800xbf16>
    %35 = vector.shape_cast %34 : vector<1x4x800xbf16> to vector<4x800xbf16>
    %cst_33 = arith.constant dense<0.000000e+00> : vector<8x800xf32>
    %36 = tpu.matmul %33, %35, %cst_33 {dimension_numbers = #tpu.dot_dimension_numbers<[1], [0], [0], [1], [0, 0, 1, 1], [], []>} : vector<8x4xbf16>, vector<4x800xbf16>, vector<8x800xf32> -> vector<8x800xf32>
    %37 = arith.addf %31, %36 : vector<8x800xf32>
    %c6 = arith.constant 6 : index
    %c0_34 = arith.constant 0 : index
    %c0_35 = arith.constant 0 : index
    %38 = vector.load %arg3[%c6, %c0_34, %c0_35] : memref<27x8x4xbf16, #tpu.memory_space<vmem>>, vector<1x8x4xbf16>
    %39 = vector.shape_cast %38 : vector<1x8x4xbf16> to vector<8x4xbf16>
    %c0_36 = arith.constant 0 : index
    %c0_37 = arith.constant 0 : index
    %c137 = arith.constant 137 : index
    %40 = vector.load %arg1[%c0_36, %c0_37, %c137] : memref<1x4x1256xbf16, #tpu.memory_space<vmem>>, vector<1x4x800xbf16>
    %41 = vector.shape_cast %40 : vector<1x4x800xbf16> to vector<4x800xbf16>
    %cst_38 = arith.constant dense<0.000000e+00> : vector<8x800xf32>
    %42 = tpu.matmul %39, %41, %cst_38 {dimension_numbers = #tpu.dot_dimension_numbers<[1], [0], [0], [1], [0, 0, 1, 1], [], []>} : vector<8x4xbf16>, vector<4x800xbf16>, vector<8x800xf32> -> vector<8x800xf32>
    %43 = arith.addf %37, %42 : vector<8x800xf32>
    %c7 = arith.constant 7 : index
    %c0_39 = arith.constant 0 : index
    %c0_40 = arith.constant 0 : index
    %44 = vector.load %arg3[%c7, %c0_39, %c0_40] : memref<27x8x4xbf16, #tpu.memory_space<vmem>>, vector<1x8x4xbf16>
    %45 = vector.shape_cast %44 : vector<1x8x4xbf16> to vector<8x4xbf16>
    %c0_41 = arith.constant 0 : index
    %c0_42 = arith.constant 0 : index
    %c138 = arith.constant 138 : index
    %46 = vector.load %arg1[%c0_41, %c0_42, %c138] : memref<1x4x1256xbf16, #tpu.memory_space<vmem>>, vector<1x4x800xbf16>
    %47 = vector.shape_cast %46 : vector<1x4x800xbf16> to vector<4x800xbf16>
    %cst_43 = arith.constant dense<0.000000e+00> : vector<8x800xf32>
    %48 = tpu.matmul %45, %47, %cst_43 {dimension_numbers = #tpu.dot_dimension_numbers<[1], [0], [0], [1], [0, 0, 1, 1], [], []>} : vector<8x4xbf16>, vector<4x800xbf16>, vector<8x800xf32> -> vector<8x800xf32>
    %49 = arith.addf %43, %48 : vector<8x800xf32>
    %c8 = arith.constant 8 : index
    %c0_44 = arith.constant 0 : index
    %c0_45 = arith.constant 0 : index
    %50 = vector.load %arg3[%c8, %c0_44, %c0_45] : memref<27x8x4xbf16, #tpu.memory_space<vmem>>, vector<1x8x4xbf16>
    %51 = vector.shape_cast %50 : vector<1x8x4xbf16> to vector<8x4xbf16>
    %c0_46 = arith.constant 0 : index
    %c0_47 = arith.constant 0 : index
    %c139 = arith.constant 139 : index
    %52 = vector.load %arg1[%c0_46, %c0_47, %c139] : memref<1x4x1256xbf16, #tpu.memory_space<vmem>>, vector<1x4x800xbf16>
    %53 = vector.shape_cast %52 : vector<1x4x800xbf16> to vector<4x800xbf16>
    %cst_48 = arith.constant dense<0.000000e+00> : vector<8x800xf32>
    %54 = tpu.matmul %51, %53, %cst_48 {dimension_numbers = #tpu.dot_dimension_numbers<[1], [0], [0], [1], [0, 0, 1, 1], [], []>} : vector<8x4xbf16>, vector<4x800xbf16>, vector<8x800xf32> -> vector<8x800xf32>
    %55 = arith.addf %49, %54 : vector<8x800xf32>
    %c9 = arith.constant 9 : index
    %c0_49 = arith.constant 0 : index
    %c0_50 = arith.constant 0 : index
    %56 = vector.load %arg3[%c9, %c0_49, %c0_50] : memref<27x8x4xbf16, #tpu.memory_space<vmem>>, vector<1x8x4xbf16>
    %57 = vector.shape_cast %56 : vector<1x8x4xbf16> to vector<8x4xbf16>
    %c0_51 = arith.constant 0 : index
    %c0_52 = arith.constant 0 : index
    %c217 = arith.constant 217 : index
    %58 = vector.load %arg1[%c0_51, %c0_52, %c217] : memref<1x4x1256xbf16, #tpu.memory_space<vmem>>, vector<1x4x800xbf16>
    %59 = vector.shape_cast %58 : vector<1x4x800xbf16> to vector<4x800xbf16>
    %cst_53 = arith.constant dense<0.000000e+00> : vector<8x800xf32>
    %60 = tpu.matmul %57, %59, %cst_53 {dimension_numbers = #tpu.dot_dimension_numbers<[1], [0], [0], [1], [0, 0, 1, 1], [], []>} : vector<8x4xbf16>, vector<4x800xbf16>, vector<8x800xf32> -> vector<8x800xf32>
    %61 = arith.addf %55, %60 : vector<8x800xf32>
    %c10 = arith.constant 10 : index
    %c0_54 = arith.constant 0 : index
    %c0_55 = arith.constant 0 : index
    %62 = vector.load %arg3[%c10, %c0_54, %c0_55] : memref<27x8x4xbf16, #tpu.memory_space<vmem>>, vector<1x8x4xbf16>
    %63 = vector.shape_cast %62 : vector<1x8x4xbf16> to vector<8x4xbf16>
    %c0_56 = arith.constant 0 : index
    %c0_57 = arith.constant 0 : index
    %c218 = arith.constant 218 : index
    %64 = vector.load %arg1[%c0_56, %c0_57, %c218] : memref<1x4x1256xbf16, #tpu.memory_space<vmem>>, vector<1x4x800xbf16>
    %65 = vector.shape_cast %64 : vector<1x4x800xbf16> to vector<4x800xbf16>
    %cst_58 = arith.constant dense<0.000000e+00> : vector<8x800xf32>
    %66 = tpu.matmul %63, %65, %cst_58 {dimension_numbers = #tpu.dot_dimension_numbers<[1], [0], [0], [1], [0, 0, 1, 1], [], []>} : vector<8x4xbf16>, vector<4x800xbf16>, vector<8x800xf32> -> vector<8x800xf32>
    %67 = arith.addf %61, %66 : vector<8x800xf32>
    %c11 = arith.constant 11 : index
    %c0_59 = arith.constant 0 : index
    %c0_60 = arith.constant 0 : index
    %68 = vector.load %arg3[%c11, %c0_59, %c0_60] : memref<27x8x4xbf16, #tpu.memory_space<vmem>>, vector<1x8x4xbf16>
    %69 = vector.shape_cast %68 : vector<1x8x4xbf16> to vector<8x4xbf16>
    %c0_61 = arith.constant 0 : index
    %c0_62 = arith.constant 0 : index
    %c219 = arith.constant 219 : index
    %70 = vector.load %arg1[%c0_61, %c0_62, %c219] : memref<1x4x1256xbf16, #tpu.memory_space<vmem>>, vector<1x4x800xbf16>
    %71 = vector.shape_cast %70 : vector<1x4x800xbf16> to vector<4x800xbf16>
    %cst_63 = arith.constant dense<0.000000e+00> : vector<8x800xf32>
    %72 = tpu.matmul %69, %71, %cst_63 {dimension_numbers = #tpu.dot_dimension_numbers<[1], [0], [0], [1], [0, 0, 1, 1], [], []>} : vector<8x4xbf16>, vector<4x800xbf16>, vector<8x800xf32> -> vector<8x800xf32>
    %73 = arith.addf %67, %72 : vector<8x800xf32>
    %c12 = arith.constant 12 : index
    %c0_64 = arith.constant 0 : index
    %c0_65 = arith.constant 0 : index
    %74 = vector.load %arg3[%c12, %c0_64, %c0_65] : memref<27x8x4xbf16, #tpu.memory_space<vmem>>, vector<1x8x4xbf16>
    %75 = vector.shape_cast %74 : vector<1x8x4xbf16> to vector<8x4xbf16>
    %c0_66 = arith.constant 0 : index
    %c0_67 = arith.constant 0 : index
    %c227 = arith.constant 227 : index
    %76 = vector.load %arg1[%c0_66, %c0_67, %c227] : memref<1x4x1256xbf16, #tpu.memory_space<vmem>>, vector<1x4x800xbf16>
    %77 = vector.shape_cast %76 : vector<1x4x800xbf16> to vector<4x800xbf16>
    %cst_68 = arith.constant dense<0.000000e+00> : vector<8x800xf32>
    %78 = tpu.matmul %75, %77, %cst_68 {dimension_numbers = #tpu.dot_dimension_numbers<[1], [0], [0], [1], [0, 0, 1, 1], [], []>} : vector<8x4xbf16>, vector<4x800xbf16>, vector<8x800xf32> -> vector<8x800xf32>
    %79 = arith.addf %73, %78 : vector<8x800xf32>
    %c13 = arith.constant 13 : index
    %c0_69 = arith.constant 0 : index
    %c0_70 = arith.constant 0 : index
    %80 = vector.load %arg3[%c13, %c0_69, %c0_70] : memref<27x8x4xbf16, #tpu.memory_space<vmem>>, vector<1x8x4xbf16>
    %81 = vector.shape_cast %80 : vector<1x8x4xbf16> to vector<8x4xbf16>
    %c0_71 = arith.constant 0 : index
    %c0_72 = arith.constant 0 : index
    %c228 = arith.constant 228 : index
    %82 = vector.load %arg1[%c0_71, %c0_72, %c228] : memref<1x4x1256xbf16, #tpu.memory_space<vmem>>, vector<1x4x800xbf16>
    %83 = vector.shape_cast %82 : vector<1x4x800xbf16> to vector<4x800xbf16>
    %cst_73 = arith.constant dense<0.000000e+00> : vector<8x800xf32>
    %84 = tpu.matmul %81, %83, %cst_73 {dimension_numbers = #tpu.dot_dimension_numbers<[1], [0], [0], [1], [0, 0, 1, 1], [], []>} : vector<8x4xbf16>, vector<4x800xbf16>, vector<8x800xf32> -> vector<8x800xf32>
    %85 = arith.addf %79, %84 : vector<8x800xf32>
    %c14 = arith.constant 14 : index
    %c0_74 = arith.constant 0 : index
    %c0_75 = arith.constant 0 : index
    %86 = vector.load %arg3[%c14, %c0_74, %c0_75] : memref<27x8x4xbf16, #tpu.memory_space<vmem>>, vector<1x8x4xbf16>
    %87 = vector.shape_cast %86 : vector<1x8x4xbf16> to vector<8x4xbf16>
    %c0_76 = arith.constant 0 : index
    %c0_77 = arith.constant 0 : index
    %c229 = arith.constant 229 : index
    %88 = vector.load %arg1[%c0_76, %c0_77, %c229] : memref<1x4x1256xbf16, #tpu.memory_space<vmem>>, vector<1x4x800xbf16>
    %89 = vector.shape_cast %88 : vector<1x4x800xbf16> to vector<4x800xbf16>
    %cst_78 = arith.constant dense<0.000000e+00> : vector<8x800xf32>
    %90 = tpu.matmul %87, %89, %cst_78 {dimension_numbers = #tpu.dot_dimension_numbers<[1], [0], [0], [1], [0, 0, 1, 1], [], []>} : vector<8x4xbf16>, vector<4x800xbf16>, vector<8x800xf32> -> vector<8x800xf32>
    %91 = arith.addf %85, %90 : vector<8x800xf32>
    %c15 = arith.constant 15 : index
    %c0_79 = arith.constant 0 : index
    %c0_80 = arith.constant 0 : index
    %92 = vector.load %arg3[%c15, %c0_79, %c0_80] : memref<27x8x4xbf16, #tpu.memory_space<vmem>>, vector<1x8x4xbf16>
    %93 = vector.shape_cast %92 : vector<1x8x4xbf16> to vector<8x4xbf16>
    %c0_81 = arith.constant 0 : index
    %c0_82 = arith.constant 0 : index
    %c237 = arith.constant 237 : index
    %94 = vector.load %arg1[%c0_81, %c0_82, %c237] : memref<1x4x1256xbf16, #tpu.memory_space<vmem>>, vector<1x4x800xbf16>
    %95 = vector.shape_cast %94 : vector<1x4x800xbf16> to vector<4x800xbf16>
    %cst_83 = arith.constant dense<0.000000e+00> : vector<8x800xf32>
    %96 = tpu.matmul %93, %95, %cst_83 {dimension_numbers = #tpu.dot_dimension_numbers<[1], [0], [0], [1], [0, 0, 1, 1], [], []>} : vector<8x4xbf16>, vector<4x800xbf16>, vector<8x800xf32> -> vector<8x800xf32>
    %97 = arith.addf %91, %96 : vector<8x800xf32>
    %c16 = arith.constant 16 : index
    %c0_84 = arith.constant 0 : index
    %c0_85 = arith.constant 0 : index
    %98 = vector.load %arg3[%c16, %c0_84, %c0_85] : memref<27x8x4xbf16, #tpu.memory_space<vmem>>, vector<1x8x4xbf16>
    %99 = vector.shape_cast %98 : vector<1x8x4xbf16> to vector<8x4xbf16>
    %c0_86 = arith.constant 0 : index
    %c0_87 = arith.constant 0 : index
    %c238 = arith.constant 238 : index
    %100 = vector.load %arg1[%c0_86, %c0_87, %c238] : memref<1x4x1256xbf16, #tpu.memory_space<vmem>>, vector<1x4x800xbf16>
    %101 = vector.shape_cast %100 : vector<1x4x800xbf16> to vector<4x800xbf16>
    %cst_88 = arith.constant dense<0.000000e+00> : vector<8x800xf32>
    %102 = tpu.matmul %99, %101, %cst_88 {dimension_numbers = #tpu.dot_dimension_numbers<[1], [0], [0], [1], [0, 0, 1, 1], [], []>} : vector<8x4xbf16>, vector<4x800xbf16>, vector<8x800xf32> -> vector<8x800xf32>
    %103 = arith.addf %97, %102 : vector<8x800xf32>
    %c17 = arith.constant 17 : index
    %c0_89 = arith.constant 0 : index
    %c0_90 = arith.constant 0 : index
    %104 = vector.load %arg3[%c17, %c0_89, %c0_90] : memref<27x8x4xbf16, #tpu.memory_space<vmem>>, vector<1x8x4xbf16>
    %105 = vector.shape_cast %104 : vector<1x8x4xbf16> to vector<8x4xbf16>
    %c0_91 = arith.constant 0 : index
    %c0_92 = arith.constant 0 : index
    %c239 = arith.constant 239 : index
    %106 = vector.load %arg1[%c0_91, %c0_92, %c239] : memref<1x4x1256xbf16, #tpu.memory_space<vmem>>, vector<1x4x800xbf16>
    %107 = vector.shape_cast %106 : vector<1x4x800xbf16> to vector<4x800xbf16>
    %cst_93 = arith.constant dense<0.000000e+00> : vector<8x800xf32>
    %108 = tpu.matmul %105, %107, %cst_93 {dimension_numbers = #tpu.dot_dimension_numbers<[1], [0], [0], [1], [0, 0, 1, 1], [], []>} : vector<8x4xbf16>, vector<4x800xbf16>, vector<8x800xf32> -> vector<8x800xf32>
    %109 = arith.addf %103, %108 : vector<8x800xf32>
    %c18 = arith.constant 18 : index
    %c0_94 = arith.constant 0 : index
    %c0_95 = arith.constant 0 : index
    %110 = vector.load %arg3[%c18, %c0_94, %c0_95] : memref<27x8x4xbf16, #tpu.memory_space<vmem>>, vector<1x8x4xbf16>
    %111 = vector.shape_cast %110 : vector<1x8x4xbf16> to vector<8x4xbf16>
    %c0_96 = arith.constant 0 : index
    %c0_97 = arith.constant 0 : index
    %c317 = arith.constant 317 : index
    %112 = vector.load %arg1[%c0_96, %c0_97, %c317] : memref<1x4x1256xbf16, #tpu.memory_space<vmem>>, vector<1x4x800xbf16>
    %113 = vector.shape_cast %112 : vector<1x4x800xbf16> to vector<4x800xbf16>
    %cst_98 = arith.constant dense<0.000000e+00> : vector<8x800xf32>
    %114 = tpu.matmul %111, %113, %cst_98 {dimension_numbers = #tpu.dot_dimension_numbers<[1], [0], [0], [1], [0, 0, 1, 1], [], []>} : vector<8x4xbf16>, vector<4x800xbf16>, vector<8x800xf32> -> vector<8x800xf32>
    %115 = arith.addf %109, %114 : vector<8x800xf32>
    %c19 = arith.constant 19 : index
    %c0_99 = arith.constant 0 : index
    %c0_100 = arith.constant 0 : index
    %116 = vector.load %arg3[%c19, %c0_99, %c0_100] : memref<27x8x4xbf16, #tpu.memory_space<vmem>>, vector<1x8x4xbf16>
    %117 = vector.shape_cast %116 : vector<1x8x4xbf16> to vector<8x4xbf16>
    %c0_101 = arith.constant 0 : index
    %c0_102 = arith.constant 0 : index
    %c318 = arith.constant 318 : index
    %118 = vector.load %arg1[%c0_101, %c0_102, %c318] : memref<1x4x1256xbf16, #tpu.memory_space<vmem>>, vector<1x4x800xbf16>
    %119 = vector.shape_cast %118 : vector<1x4x800xbf16> to vector<4x800xbf16>
    %cst_103 = arith.constant dense<0.000000e+00> : vector<8x800xf32>
    %120 = tpu.matmul %117, %119, %cst_103 {dimension_numbers = #tpu.dot_dimension_numbers<[1], [0], [0], [1], [0, 0, 1, 1], [], []>} : vector<8x4xbf16>, vector<4x800xbf16>, vector<8x800xf32> -> vector<8x800xf32>
    %121 = arith.addf %115, %120 : vector<8x800xf32>
    %c20 = arith.constant 20 : index
    %c0_104 = arith.constant 0 : index
    %c0_105 = arith.constant 0 : index
    %122 = vector.load %arg3[%c20, %c0_104, %c0_105] : memref<27x8x4xbf16, #tpu.memory_space<vmem>>, vector<1x8x4xbf16>
    %123 = vector.shape_cast %122 : vector<1x8x4xbf16> to vector<8x4xbf16>
    %c0_106 = arith.constant 0 : index
    %c0_107 = arith.constant 0 : index
    %c319 = arith.constant 319 : index
    %124 = vector.load %arg1[%c0_106, %c0_107, %c319] : memref<1x4x1256xbf16, #tpu.memory_space<vmem>>, vector<1x4x800xbf16>
    %125 = vector.shape_cast %124 : vector<1x4x800xbf16> to vector<4x800xbf16>
    %cst_108 = arith.constant dense<0.000000e+00> : vector<8x800xf32>
    %126 = tpu.matmul %123, %125, %cst_108 {dimension_numbers = #tpu.dot_dimension_numbers<[1], [0], [0], [1], [0, 0, 1, 1], [], []>} : vector<8x4xbf16>, vector<4x800xbf16>, vector<8x800xf32> -> vector<8x800xf32>
    %127 = arith.addf %121, %126 : vector<8x800xf32>
    %c21 = arith.constant 21 : index
    %c0_109 = arith.constant 0 : index
    %c0_110 = arith.constant 0 : index
    %128 = vector.load %arg3[%c21, %c0_109, %c0_110] : memref<27x8x4xbf16, #tpu.memory_space<vmem>>, vector<1x8x4xbf16>
    %129 = vector.shape_cast %128 : vector<1x8x4xbf16> to vector<8x4xbf16>
    %c0_111 = arith.constant 0 : index
    %c0_112 = arith.constant 0 : index
    %c327 = arith.constant 327 : index
    %130 = vector.load %arg1[%c0_111, %c0_112, %c327] : memref<1x4x1256xbf16, #tpu.memory_space<vmem>>, vector<1x4x800xbf16>
    %131 = vector.shape_cast %130 : vector<1x4x800xbf16> to vector<4x800xbf16>
    %cst_113 = arith.constant dense<0.000000e+00> : vector<8x800xf32>
    %132 = tpu.matmul %129, %131, %cst_113 {dimension_numbers = #tpu.dot_dimension_numbers<[1], [0], [0], [1], [0, 0, 1, 1], [], []>} : vector<8x4xbf16>, vector<4x800xbf16>, vector<8x800xf32> -> vector<8x800xf32>
    %133 = arith.addf %127, %132 : vector<8x800xf32>
    %c22 = arith.constant 22 : index
    %c0_114 = arith.constant 0 : index
    %c0_115 = arith.constant 0 : index
    %134 = vector.load %arg3[%c22, %c0_114, %c0_115] : memref<27x8x4xbf16, #tpu.memory_space<vmem>>, vector<1x8x4xbf16>
    %135 = vector.shape_cast %134 : vector<1x8x4xbf16> to vector<8x4xbf16>
    %c0_116 = arith.constant 0 : index
    %c0_117 = arith.constant 0 : index
    %c328 = arith.constant 328 : index
    %136 = vector.load %arg1[%c0_116, %c0_117, %c328] : memref<1x4x1256xbf16, #tpu.memory_space<vmem>>, vector<1x4x800xbf16>
    %137 = vector.shape_cast %136 : vector<1x4x800xbf16> to vector<4x800xbf16>
    %cst_118 = arith.constant dense<0.000000e+00> : vector<8x800xf32>
    %138 = tpu.matmul %135, %137, %cst_118 {dimension_numbers = #tpu.dot_dimension_numbers<[1], [0], [0], [1], [0, 0, 1, 1], [], []>} : vector<8x4xbf16>, vector<4x800xbf16>, vector<8x800xf32> -> vector<8x800xf32>
    %139 = arith.addf %133, %138 : vector<8x800xf32>
    %c23 = arith.constant 23 : index
    %c0_119 = arith.constant 0 : index
    %c0_120 = arith.constant 0 : index
    %140 = vector.load %arg3[%c23, %c0_119, %c0_120] : memref<27x8x4xbf16, #tpu.memory_space<vmem>>, vector<1x8x4xbf16>
    %141 = vector.shape_cast %140 : vector<1x8x4xbf16> to vector<8x4xbf16>
    %c0_121 = arith.constant 0 : index
    %c0_122 = arith.constant 0 : index
    %c329 = arith.constant 329 : index
    %142 = vector.load %arg1[%c0_121, %c0_122, %c329] : memref<1x4x1256xbf16, #tpu.memory_space<vmem>>, vector<1x4x800xbf16>
    %143 = vector.shape_cast %142 : vector<1x4x800xbf16> to vector<4x800xbf16>
    %cst_123 = arith.constant dense<0.000000e+00> : vector<8x800xf32>
    %144 = tpu.matmul %141, %143, %cst_123 {dimension_numbers = #tpu.dot_dimension_numbers<[1], [0], [0], [1], [0, 0, 1, 1], [], []>} : vector<8x4xbf16>, vector<4x800xbf16>, vector<8x800xf32> -> vector<8x800xf32>
    %145 = arith.addf %139, %144 : vector<8x800xf32>
    %c24 = arith.constant 24 : index
    %c0_124 = arith.constant 0 : index
    %c0_125 = arith.constant 0 : index
    %146 = vector.load %arg3[%c24, %c0_124, %c0_125] : memref<27x8x4xbf16, #tpu.memory_space<vmem>>, vector<1x8x4xbf16>
    %147 = vector.shape_cast %146 : vector<1x8x4xbf16> to vector<8x4xbf16>
    %c0_126 = arith.constant 0 : index
    %c0_127 = arith.constant 0 : index
    %c337 = arith.constant 337 : index
    %148 = vector.load %arg1[%c0_126, %c0_127, %c337] : memref<1x4x1256xbf16, #tpu.memory_space<vmem>>, vector<1x4x800xbf16>
    %149 = vector.shape_cast %148 : vector<1x4x800xbf16> to vector<4x800xbf16>
    %cst_128 = arith.constant dense<0.000000e+00> : vector<8x800xf32>
    %150 = tpu.matmul %147, %149, %cst_128 {dimension_numbers = #tpu.dot_dimension_numbers<[1], [0], [0], [1], [0, 0, 1, 1], [], []>} : vector<8x4xbf16>, vector<4x800xbf16>, vector<8x800xf32> -> vector<8x800xf32>
    %151 = arith.addf %145, %150 : vector<8x800xf32>
    %c25 = arith.constant 25 : index
    %c0_129 = arith.constant 0 : index
    %c0_130 = arith.constant 0 : index
    %152 = vector.load %arg3[%c25, %c0_129, %c0_130] : memref<27x8x4xbf16, #tpu.memory_space<vmem>>, vector<1x8x4xbf16>
    %153 = vector.shape_cast %152 : vector<1x8x4xbf16> to vector<8x4xbf16>
    %c0_131 = arith.constant 0 : index
    %c0_132 = arith.constant 0 : index
    %c338 = arith.constant 338 : index
    %154 = vector.load %arg1[%c0_131, %c0_132, %c338] : memref<1x4x1256xbf16, #tpu.memory_space<vmem>>, vector<1x4x800xbf16>
    %155 = vector.shape_cast %154 : vector<1x4x800xbf16> to vector<4x800xbf16>
    %cst_133 = arith.constant dense<0.000000e+00> : vector<8x800xf32>
    %156 = tpu.matmul %153, %155, %cst_133 {dimension_numbers = #tpu.dot_dimension_numbers<[1], [0], [0], [1], [0, 0, 1, 1], [], []>} : vector<8x4xbf16>, vector<4x800xbf16>, vector<8x800xf32> -> vector<8x800xf32>
    %157 = arith.addf %151, %156 : vector<8x800xf32>
    %c26 = arith.constant 26 : index
    %c0_134 = arith.constant 0 : index
    %c0_135 = arith.constant 0 : index
    %158 = vector.load %arg3[%c26, %c0_134, %c0_135] : memref<27x8x4xbf16, #tpu.memory_space<vmem>>, vector<1x8x4xbf16>
    %159 = vector.shape_cast %158 : vector<1x8x4xbf16> to vector<8x4xbf16>
    %c0_136 = arith.constant 0 : index
    %c0_137 = arith.constant 0 : index
    %c339 = arith.constant 339 : index
    %160 = vector.load %arg1[%c0_136, %c0_137, %c339] : memref<1x4x1256xbf16, #tpu.memory_space<vmem>>, vector<1x4x800xbf16>
    %161 = vector.shape_cast %160 : vector<1x4x800xbf16> to vector<4x800xbf16>
    %cst_138 = arith.constant dense<0.000000e+00> : vector<8x800xf32>
    %162 = tpu.matmul %159, %161, %cst_138 {dimension_numbers = #tpu.dot_dimension_numbers<[1], [0], [0], [1], [0, 0, 1, 1], [], []>} : vector<8x4xbf16>, vector<4x800xbf16>, vector<8x800xf32> -> vector<8x800xf32>
    %163 = arith.addf %157, %162 : vector<8x800xf32>
    %164 = vector.broadcast %0 : vector<1x800xf32> to vector<8x800xf32>
    %165 = arith.mulf %163, %164 : vector<8x800xf32>
    %cst_139 = arith.constant dense<0.000000e+00> : vector<8xf32>
    %166 = vector.multi_reduction <add>, %165, %cst_139 [1] : vector<8x800xf32> to vector<8xf32>
    %167 = vector.shape_cast %166 : vector<8xf32> to vector<8x1xf32>
    %cst_140 = arith.constant 0.001953125 : f32
    %168 = vector.broadcast %cst_140 : f32 to vector<8x1xf32>
    %169 = arith.mulf %167, %168 : vector<8x1xf32>
    %170 = vector.broadcast %169 : vector<8x1xf32> to vector<8x800xf32>
    %171 = arith.subf %163, %170 : vector<8x800xf32>
    %172 = arith.mulf %171, %171 : vector<8x800xf32>
    %173 = vector.broadcast %0 : vector<1x800xf32> to vector<8x800xf32>
    %174 = arith.mulf %172, %173 : vector<8x800xf32>
    %cst_141 = arith.constant dense<0.000000e+00> : vector<8xf32>
    %175 = vector.multi_reduction <add>, %174, %cst_141 [1] : vector<8x800xf32> to vector<8xf32>
    %176 = vector.shape_cast %175 : vector<8xf32> to vector<8x1xf32>
    %cst_142 = arith.constant 0.001953125 : f32
    %177 = vector.broadcast %cst_142 : f32 to vector<8x1xf32>
    %178 = arith.mulf %176, %177 : vector<8x1xf32>
    %cst_143 = arith.constant 9.99999974E-6 : f32
    %179 = vector.broadcast %cst_143 : f32 to vector<8x1xf32>
    %180 = arith.addf %178, %179 : vector<8x1xf32>
    %181 = math.rsqrt %180 : vector<8x1xf32>
    %cst_144 = arith.constant 0.000000e+00 : f32
    %182 = vector.broadcast %cst_144 : f32 to vector<8x800xf32>
    %183 = arith.cmpf oge, %171, %182 : vector<8x800xf32>
    %cst_145 = arith.constant 2.000000e-01 : f32
    %184 = vector.broadcast %cst_145 : f32 to vector<8x1xf32>
    %185 = arith.mulf %184, %181 : vector<8x1xf32>
    %186 = vector.shape_cast %181 : vector<8x1xf32> to vector<8x1xf32>
    %187 = vector.broadcast %186 : vector<8x1xf32> to vector<8x800xf32>
    %188 = vector.shape_cast %185 : vector<8x1xf32> to vector<8x1xf32>
    %189 = vector.broadcast %188 : vector<8x1xf32> to vector<8x800xf32>
    %190 = arith.select %183, %187, %189 : vector<8x800xi1>, vector<8x800xf32>
    %191 = arith.mulf %171, %190 : vector<8x800xf32>
    %192 = vector.broadcast %0 : vector<1x800xf32> to vector<8x800xf32>
    %193 = arith.mulf %191, %192 : vector<8x800xf32>
    %194 = arith.truncf %193 : vector<8x800xf32> to vector<8x800xbf16>
    %c0_146 = arith.constant 0 : index
    %c228_147 = arith.constant 228 : index
    %195 = vector.load %arg6[%c0_146, %c228_147] : memref<8x1256xbf16, #tpu.memory_space<vmem>>, vector<8x800xbf16>
    tpu.vector_store %arg6[%c0_146, %c228_147], %194 {strides = array<i32>} : memref<8x1256xbf16, #tpu.memory_space<vmem>>, vector<8x800xbf16>,
    %c0_148 = arith.constant 0 : index
    %c0_149 = arith.constant 0 : index
    %c0_150 = arith.constant 0 : index
    %196 = vector.load %arg4[%c0_148, %c0_149, %c0_150] : memref<27x8x8xbf16, #tpu.memory_space<vmem>>, vector<1x8x8xbf16>
    %197 = vector.shape_cast %196 : vector<1x8x8xbf16> to vector<8x8xbf16>
    %c0_151 = arith.constant 0 : index
    %c117_152 = arith.constant 117 : index
    %198 = vector.load %arg6[%c0_151, %c117_152] : memref<8x1256xbf16, #tpu.memory_space<vmem>>, vector<8x800xbf16>
    %cst_153 = arith.constant dense<0.000000e+00> : vector<8x800xf32>
    %199 = tpu.matmul %197, %198, %cst_153 {dimension_numbers = #tpu.dot_dimension_numbers<[1], [0], [0], [1], [0, 0, 1, 1], [], []>} : vector<8x8xbf16>, vector<8x800xbf16>, vector<8x800xf32> -> vector<8x800xf32>
    %c1_154 = arith.constant 1 : index
    %c0_155 = arith.constant 0 : index
    %c0_156 = arith.constant 0 : index
    %200 = vector.load %arg4[%c1_154, %c0_155, %c0_156] : memref<27x8x8xbf16, #tpu.memory_space<vmem>>, vector<1x8x8xbf16>
    %201 = vector.shape_cast %200 : vector<1x8x8xbf16> to vector<8x8xbf16>
    %c0_157 = arith.constant 0 : index
    %c118_158 = arith.constant 118 : index
    %202 = vector.load %arg6[%c0_157, %c118_158] : memref<8x1256xbf16, #tpu.memory_space<vmem>>, vector<8x800xbf16>
    %cst_159 = arith.constant dense<0.000000e+00> : vector<8x800xf32>
    %203 = tpu.matmul %201, %202, %cst_159 {dimension_numbers = #tpu.dot_dimension_numbers<[1], [0], [0], [1], [0, 0, 1, 1], [], []>} : vector<8x8xbf16>, vector<8x800xbf16>, vector<8x800xf32> -> vector<8x800xf32>
    %204 = arith.addf %199, %203 : vector<8x800xf32>
    %c2_160 = arith.constant 2 : index
    %c0_161 = arith.constant 0 : index
    %c0_162 = arith.constant 0 : index
    %205 = vector.load %arg4[%c2_160, %c0_161, %c0_162] : memref<27x8x8xbf16, #tpu.memory_space<vmem>>, vector<1x8x8xbf16>
    %206 = vector.shape_cast %205 : vector<1x8x8xbf16> to vector<8x8xbf16>
    %c0_163 = arith.constant 0 : index
    %c119_164 = arith.constant 119 : index
    %207 = vector.load %arg6[%c0_163, %c119_164] : memref<8x1256xbf16, #tpu.memory_space<vmem>>, vector<8x800xbf16>
    %cst_165 = arith.constant dense<0.000000e+00> : vector<8x800xf32>
    %208 = tpu.matmul %206, %207, %cst_165 {dimension_numbers = #tpu.dot_dimension_numbers<[1], [0], [0], [1], [0, 0, 1, 1], [], []>} : vector<8x8xbf16>, vector<8x800xbf16>, vector<8x800xf32> -> vector<8x800xf32>
    %209 = arith.addf %204, %208 : vector<8x800xf32>
    %c3_166 = arith.constant 3 : index
    %c0_167 = arith.constant 0 : index
    %c0_168 = arith.constant 0 : index
    %210 = vector.load %arg4[%c3_166, %c0_167, %c0_168] : memref<27x8x8xbf16, #tpu.memory_space<vmem>>, vector<1x8x8xbf16>
    %211 = vector.shape_cast %210 : vector<1x8x8xbf16> to vector<8x8xbf16>
    %c0_169 = arith.constant 0 : index
    %c127_170 = arith.constant 127 : index
    %212 = vector.load %arg6[%c0_169, %c127_170] : memref<8x1256xbf16, #tpu.memory_space<vmem>>, vector<8x800xbf16>
    %cst_171 = arith.constant dense<0.000000e+00> : vector<8x800xf32>
    %213 = tpu.matmul %211, %212, %cst_171 {dimension_numbers = #tpu.dot_dimension_numbers<[1], [0], [0], [1], [0, 0, 1, 1], [], []>} : vector<8x8xbf16>, vector<8x800xbf16>, vector<8x800xf32> -> vector<8x800xf32>
    %214 = arith.addf %209, %213 : vector<8x800xf32>
    %c4_172 = arith.constant 4 : index
    %c0_173 = arith.constant 0 : index
    %c0_174 = arith.constant 0 : index
    %215 = vector.load %arg4[%c4_172, %c0_173, %c0_174] : memref<27x8x8xbf16, #tpu.memory_space<vmem>>, vector<1x8x8xbf16>
    %216 = vector.shape_cast %215 : vector<1x8x8xbf16> to vector<8x8xbf16>
    %c0_175 = arith.constant 0 : index
    %c128_176 = arith.constant 128 : index
    %217 = vector.load %arg6[%c0_175, %c128_176] : memref<8x1256xbf16, #tpu.memory_space<vmem>>, vector<8x800xbf16>
    %cst_177 = arith.constant dense<0.000000e+00> : vector<8x800xf32>
    %218 = tpu.matmul %216, %217, %cst_177 {dimension_numbers = #tpu.dot_dimension_numbers<[1], [0], [0], [1], [0, 0, 1, 1], [], []>} : vector<8x8xbf16>, vector<8x800xbf16>, vector<8x800xf32> -> vector<8x800xf32>
    %219 = arith.addf %214, %218 : vector<8x800xf32>
    %c5_178 = arith.constant 5 : index
    %c0_179 = arith.constant 0 : index
    %c0_180 = arith.constant 0 : index
    %220 = vector.load %arg4[%c5_178, %c0_179, %c0_180] : memref<27x8x8xbf16, #tpu.memory_space<vmem>>, vector<1x8x8xbf16>
    %221 = vector.shape_cast %220 : vector<1x8x8xbf16> to vector<8x8xbf16>
    %c0_181 = arith.constant 0 : index
    %c129_182 = arith.constant 129 : index
    %222 = vector.load %arg6[%c0_181, %c129_182] : memref<8x1256xbf16, #tpu.memory_space<vmem>>, vector<8x800xbf16>
    %cst_183 = arith.constant dense<0.000000e+00> : vector<8x800xf32>
    %223 = tpu.matmul %221, %222, %cst_183 {dimension_numbers = #tpu.dot_dimension_numbers<[1], [0], [0], [1], [0, 0, 1, 1], [], []>} : vector<8x8xbf16>, vector<8x800xbf16>, vector<8x800xf32> -> vector<8x800xf32>
    %224 = arith.addf %219, %223 : vector<8x800xf32>
    %c6_184 = arith.constant 6 : index
    %c0_185 = arith.constant 0 : index
    %c0_186 = arith.constant 0 : index
    %225 = vector.load %arg4[%c6_184, %c0_185, %c0_186] : memref<27x8x8xbf16, #tpu.memory_space<vmem>>, vector<1x8x8xbf16>
    %226 = vector.shape_cast %225 : vector<1x8x8xbf16> to vector<8x8xbf16>
    %c0_187 = arith.constant 0 : index
    %c137_188 = arith.constant 137 : index
    %227 = vector.load %arg6[%c0_187, %c137_188] : memref<8x1256xbf16, #tpu.memory_space<vmem>>, vector<8x800xbf16>
    %cst_189 = arith.constant dense<0.000000e+00> : vector<8x800xf32>
    %228 = tpu.matmul %226, %227, %cst_189 {dimension_numbers = #tpu.dot_dimension_numbers<[1], [0], [0], [1], [0, 0, 1, 1], [], []>} : vector<8x8xbf16>, vector<8x800xbf16>, vector<8x800xf32> -> vector<8x800xf32>
    %229 = arith.addf %224, %228 : vector<8x800xf32>
    %c7_190 = arith.constant 7 : index
    %c0_191 = arith.constant 0 : index
    %c0_192 = arith.constant 0 : index
    %230 = vector.load %arg4[%c7_190, %c0_191, %c0_192] : memref<27x8x8xbf16, #tpu.memory_space<vmem>>, vector<1x8x8xbf16>
    %231 = vector.shape_cast %230 : vector<1x8x8xbf16> to vector<8x8xbf16>
    %c0_193 = arith.constant 0 : index
    %c138_194 = arith.constant 138 : index
    %232 = vector.load %arg6[%c0_193, %c138_194] : memref<8x1256xbf16, #tpu.memory_space<vmem>>, vector<8x800xbf16>
    %cst_195 = arith.constant dense<0.000000e+00> : vector<8x800xf32>
    %233 = tpu.matmul %231, %232, %cst_195 {dimension_numbers = #tpu.dot_dimension_numbers<[1], [0], [0], [1], [0, 0, 1, 1], [], []>} : vector<8x8xbf16>, vector<8x800xbf16>, vector<8x800xf32> -> vector<8x800xf32>
    %234 = arith.addf %229, %233 : vector<8x800xf32>
    %c8_196 = arith.constant 8 : index
    %c0_197 = arith.constant 0 : index
    %c0_198 = arith.constant 0 : index
    %235 = vector.load %arg4[%c8_196, %c0_197, %c0_198] : memref<27x8x8xbf16, #tpu.memory_space<vmem>>, vector<1x8x8xbf16>
    %236 = vector.shape_cast %235 : vector<1x8x8xbf16> to vector<8x8xbf16>
    %c0_199 = arith.constant 0 : index
    %c139_200 = arith.constant 139 : index
    %237 = vector.load %arg6[%c0_199, %c139_200] : memref<8x1256xbf16, #tpu.memory_space<vmem>>, vector<8x800xbf16>
    %cst_201 = arith.constant dense<0.000000e+00> : vector<8x800xf32>
    %238 = tpu.matmul %236, %237, %cst_201 {dimension_numbers = #tpu.dot_dimension_numbers<[1], [0], [0], [1], [0, 0, 1, 1], [], []>} : vector<8x8xbf16>, vector<8x800xbf16>, vector<8x800xf32> -> vector<8x800xf32>
    %239 = arith.addf %234, %238 : vector<8x800xf32>
    %c9_202 = arith.constant 9 : index
    %c0_203 = arith.constant 0 : index
    %c0_204 = arith.constant 0 : index
    %240 = vector.load %arg4[%c9_202, %c0_203, %c0_204] : memref<27x8x8xbf16, #tpu.memory_space<vmem>>, vector<1x8x8xbf16>
    %241 = vector.shape_cast %240 : vector<1x8x8xbf16> to vector<8x8xbf16>
    %c0_205 = arith.constant 0 : index
    %c217_206 = arith.constant 217 : index
    %242 = vector.load %arg6[%c0_205, %c217_206] : memref<8x1256xbf16, #tpu.memory_space<vmem>>, vector<8x800xbf16>
    %cst_207 = arith.constant dense<0.000000e+00> : vector<8x800xf32>
    %243 = tpu.matmul %241, %242, %cst_207 {dimension_numbers = #tpu.dot_dimension_numbers<[1], [0], [0], [1], [0, 0, 1, 1], [], []>} : vector<8x8xbf16>, vector<8x800xbf16>, vector<8x800xf32> -> vector<8x800xf32>
    %244 = arith.addf %239, %243 : vector<8x800xf32>
    %c10_208 = arith.constant 10 : index
    %c0_209 = arith.constant 0 : index
    %c0_210 = arith.constant 0 : index
    %245 = vector.load %arg4[%c10_208, %c0_209, %c0_210] : memref<27x8x8xbf16, #tpu.memory_space<vmem>>, vector<1x8x8xbf16>
    %246 = vector.shape_cast %245 : vector<1x8x8xbf16> to vector<8x8xbf16>
    %c0_211 = arith.constant 0 : index
    %c218_212 = arith.constant 218 : index
    %247 = vector.load %arg6[%c0_211, %c218_212] : memref<8x1256xbf16, #tpu.memory_space<vmem>>, vector<8x800xbf16>
    %cst_213 = arith.constant dense<0.000000e+00> : vector<8x800xf32>
    %248 = tpu.matmul %246, %247, %cst_213 {dimension_numbers = #tpu.dot_dimension_numbers<[1], [0], [0], [1], [0, 0, 1, 1], [], []>} : vector<8x8xbf16>, vector<8x800xbf16>, vector<8x800xf32> -> vector<8x800xf32>
    %249 = arith.addf %244, %248 : vector<8x800xf32>
    %c11_214 = arith.constant 11 : index
    %c0_215 = arith.constant 0 : index
    %c0_216 = arith.constant 0 : index
    %250 = vector.load %arg4[%c11_214, %c0_215, %c0_216] : memref<27x8x8xbf16, #tpu.memory_space<vmem>>, vector<1x8x8xbf16>
    %251 = vector.shape_cast %250 : vector<1x8x8xbf16> to vector<8x8xbf16>
    %c0_217 = arith.constant 0 : index
    %c219_218 = arith.constant 219 : index
    %252 = vector.load %arg6[%c0_217, %c219_218] : memref<8x1256xbf16, #tpu.memory_space<vmem>>, vector<8x800xbf16>
    %cst_219 = arith.constant dense<0.000000e+00> : vector<8x800xf32>
    %253 = tpu.matmul %251, %252, %cst_219 {dimension_numbers = #tpu.dot_dimension_numbers<[1], [0], [0], [1], [0, 0, 1, 1], [], []>} : vector<8x8xbf16>, vector<8x800xbf16>, vector<8x800xf32> -> vector<8x800xf32>
    %254 = arith.addf %249, %253 : vector<8x800xf32>
    %c12_220 = arith.constant 12 : index
    %c0_221 = arith.constant 0 : index
    %c0_222 = arith.constant 0 : index
    %255 = vector.load %arg4[%c12_220, %c0_221, %c0_222] : memref<27x8x8xbf16, #tpu.memory_space<vmem>>, vector<1x8x8xbf16>
    %256 = vector.shape_cast %255 : vector<1x8x8xbf16> to vector<8x8xbf16>
    %c0_223 = arith.constant 0 : index
    %c227_224 = arith.constant 227 : index
    %257 = vector.load %arg6[%c0_223, %c227_224] : memref<8x1256xbf16, #tpu.memory_space<vmem>>, vector<8x800xbf16>
    %cst_225 = arith.constant dense<0.000000e+00> : vector<8x800xf32>
    %258 = tpu.matmul %256, %257, %cst_225 {dimension_numbers = #tpu.dot_dimension_numbers<[1], [0], [0], [1], [0, 0, 1, 1], [], []>} : vector<8x8xbf16>, vector<8x800xbf16>, vector<8x800xf32> -> vector<8x800xf32>
    %259 = arith.addf %254, %258 : vector<8x800xf32>
    %c13_226 = arith.constant 13 : index
    %c0_227 = arith.constant 0 : index
    %c0_228 = arith.constant 0 : index
    %260 = vector.load %arg4[%c13_226, %c0_227, %c0_228] : memref<27x8x8xbf16, #tpu.memory_space<vmem>>, vector<1x8x8xbf16>
    %261 = vector.shape_cast %260 : vector<1x8x8xbf16> to vector<8x8xbf16>
    %c0_229 = arith.constant 0 : index
    %c228_230 = arith.constant 228 : index
    %262 = vector.load %arg6[%c0_229, %c228_230] : memref<8x1256xbf16, #tpu.memory_space<vmem>>, vector<8x800xbf16>
    %cst_231 = arith.constant dense<0.000000e+00> : vector<8x800xf32>
    %263 = tpu.matmul %261, %262, %cst_231 {dimension_numbers = #tpu.dot_dimension_numbers<[1], [0], [0], [1], [0, 0, 1, 1], [], []>} : vector<8x8xbf16>, vector<8x800xbf16>, vector<8x800xf32> -> vector<8x800xf32>
    %264 = arith.addf %259, %263 : vector<8x800xf32>
    %c14_232 = arith.constant 14 : index
    %c0_233 = arith.constant 0 : index
    %c0_234 = arith.constant 0 : index
    %265 = vector.load %arg4[%c14_232, %c0_233, %c0_234] : memref<27x8x8xbf16, #tpu.memory_space<vmem>>, vector<1x8x8xbf16>
    %266 = vector.shape_cast %265 : vector<1x8x8xbf16> to vector<8x8xbf16>
    %c0_235 = arith.constant 0 : index
    %c229_236 = arith.constant 229 : index
    %267 = vector.load %arg6[%c0_235, %c229_236] : memref<8x1256xbf16, #tpu.memory_space<vmem>>, vector<8x800xbf16>
    %cst_237 = arith.constant dense<0.000000e+00> : vector<8x800xf32>
    %268 = tpu.matmul %266, %267, %cst_237 {dimension_numbers = #tpu.dot_dimension_numbers<[1], [0], [0], [1], [0, 0, 1, 1], [], []>} : vector<8x8xbf16>, vector<8x800xbf16>, vector<8x800xf32> -> vector<8x800xf32>
    %269 = arith.addf %264, %268 : vector<8x800xf32>
    %c15_238 = arith.constant 15 : index
    %c0_239 = arith.constant 0 : index
    %c0_240 = arith.constant 0 : index
    %270 = vector.load %arg4[%c15_238, %c0_239, %c0_240] : memref<27x8x8xbf16, #tpu.memory_space<vmem>>, vector<1x8x8xbf16>
    %271 = vector.shape_cast %270 : vector<1x8x8xbf16> to vector<8x8xbf16>
    %c0_241 = arith.constant 0 : index
    %c237_242 = arith.constant 237 : index
    %272 = vector.load %arg6[%c0_241, %c237_242] : memref<8x1256xbf16, #tpu.memory_space<vmem>>, vector<8x800xbf16>
    %cst_243 = arith.constant dense<0.000000e+00> : vector<8x800xf32>
    %273 = tpu.matmul %271, %272, %cst_243 {dimension_numbers = #tpu.dot_dimension_numbers<[1], [0], [0], [1], [0, 0, 1, 1], [], []>} : vector<8x8xbf16>, vector<8x800xbf16>, vector<8x800xf32> -> vector<8x800xf32>
    %274 = arith.addf %269, %273 : vector<8x800xf32>
    %c16_244 = arith.constant 16 : index
    %c0_245 = arith.constant 0 : index
    %c0_246 = arith.constant 0 : index
    %275 = vector.load %arg4[%c16_244, %c0_245, %c0_246] : memref<27x8x8xbf16, #tpu.memory_space<vmem>>, vector<1x8x8xbf16>
    %276 = vector.shape_cast %275 : vector<1x8x8xbf16> to vector<8x8xbf16>
    %c0_247 = arith.constant 0 : index
    %c238_248 = arith.constant 238 : index
    %277 = vector.load %arg6[%c0_247, %c238_248] : memref<8x1256xbf16, #tpu.memory_space<vmem>>, vector<8x800xbf16>
    %cst_249 = arith.constant dense<0.000000e+00> : vector<8x800xf32>
    %278 = tpu.matmul %276, %277, %cst_249 {dimension_numbers = #tpu.dot_dimension_numbers<[1], [0], [0], [1], [0, 0, 1, 1], [], []>} : vector<8x8xbf16>, vector<8x800xbf16>, vector<8x800xf32> -> vector<8x800xf32>
    %279 = arith.addf %274, %278 : vector<8x800xf32>
    %c17_250 = arith.constant 17 : index
    %c0_251 = arith.constant 0 : index
    %c0_252 = arith.constant 0 : index
    %280 = vector.load %arg4[%c17_250, %c0_251, %c0_252] : memref<27x8x8xbf16, #tpu.memory_space<vmem>>, vector<1x8x8xbf16>
    %281 = vector.shape_cast %280 : vector<1x8x8xbf16> to vector<8x8xbf16>
    %c0_253 = arith.constant 0 : index
    %c239_254 = arith.constant 239 : index
    %282 = vector.load %arg6[%c0_253, %c239_254] : memref<8x1256xbf16, #tpu.memory_space<vmem>>, vector<8x800xbf16>
    %cst_255 = arith.constant dense<0.000000e+00> : vector<8x800xf32>
    %283 = tpu.matmul %281, %282, %cst_255 {dimension_numbers = #tpu.dot_dimension_numbers<[1], [0], [0], [1], [0, 0, 1, 1], [], []>} : vector<8x8xbf16>, vector<8x800xbf16>, vector<8x800xf32> -> vector<8x800xf32>
    %284 = arith.addf %279, %283 : vector<8x800xf32>
    %c18_256 = arith.constant 18 : index
    %c0_257 = arith.constant 0 : index
    %c0_258 = arith.constant 0 : index
    %285 = vector.load %arg4[%c18_256, %c0_257, %c0_258] : memref<27x8x8xbf16, #tpu.memory_space<vmem>>, vector<1x8x8xbf16>
    %286 = vector.shape_cast %285 : vector<1x8x8xbf16> to vector<8x8xbf16>
    %c0_259 = arith.constant 0 : index
    %c317_260 = arith.constant 317 : index
    %287 = vector.load %arg6[%c0_259, %c317_260] : memref<8x1256xbf16, #tpu.memory_space<vmem>>, vector<8x800xbf16>
    %cst_261 = arith.constant dense<0.000000e+00> : vector<8x800xf32>
    %288 = tpu.matmul %286, %287, %cst_261 {dimension_numbers = #tpu.dot_dimension_numbers<[1], [0], [0], [1], [0, 0, 1, 1], [], []>} : vector<8x8xbf16>, vector<8x800xbf16>, vector<8x800xf32> -> vector<8x800xf32>
    %289 = arith.addf %284, %288 : vector<8x800xf32>
    %c19_262 = arith.constant 19 : index
    %c0_263 = arith.constant 0 : index
    %c0_264 = arith.constant 0 : index
    %290 = vector.load %arg4[%c19_262, %c0_263, %c0_264] : memref<27x8x8xbf16, #tpu.memory_space<vmem>>, vector<1x8x8xbf16>
    %291 = vector.shape_cast %290 : vector<1x8x8xbf16> to vector<8x8xbf16>
    %c0_265 = arith.constant 0 : index
    %c318_266 = arith.constant 318 : index
    %292 = vector.load %arg6[%c0_265, %c318_266] : memref<8x1256xbf16, #tpu.memory_space<vmem>>, vector<8x800xbf16>
    %cst_267 = arith.constant dense<0.000000e+00> : vector<8x800xf32>
    %293 = tpu.matmul %291, %292, %cst_267 {dimension_numbers = #tpu.dot_dimension_numbers<[1], [0], [0], [1], [0, 0, 1, 1], [], []>} : vector<8x8xbf16>, vector<8x800xbf16>, vector<8x800xf32> -> vector<8x800xf32>
    %294 = arith.addf %289, %293 : vector<8x800xf32>
    %c20_268 = arith.constant 20 : index
    %c0_269 = arith.constant 0 : index
    %c0_270 = arith.constant 0 : index
    %295 = vector.load %arg4[%c20_268, %c0_269, %c0_270] : memref<27x8x8xbf16, #tpu.memory_space<vmem>>, vector<1x8x8xbf16>
    %296 = vector.shape_cast %295 : vector<1x8x8xbf16> to vector<8x8xbf16>
    %c0_271 = arith.constant 0 : index
    %c319_272 = arith.constant 319 : index
    %297 = vector.load %arg6[%c0_271, %c319_272] : memref<8x1256xbf16, #tpu.memory_space<vmem>>, vector<8x800xbf16>
    %cst_273 = arith.constant dense<0.000000e+00> : vector<8x800xf32>
    %298 = tpu.matmul %296, %297, %cst_273 {dimension_numbers = #tpu.dot_dimension_numbers<[1], [0], [0], [1], [0, 0, 1, 1], [], []>} : vector<8x8xbf16>, vector<8x800xbf16>, vector<8x800xf32> -> vector<8x800xf32>
    %299 = arith.addf %294, %298 : vector<8x800xf32>
    %c21_274 = arith.constant 21 : index
    %c0_275 = arith.constant 0 : index
    %c0_276 = arith.constant 0 : index
    %300 = vector.load %arg4[%c21_274, %c0_275, %c0_276] : memref<27x8x8xbf16, #tpu.memory_space<vmem>>, vector<1x8x8xbf16>
    %301 = vector.shape_cast %300 : vector<1x8x8xbf16> to vector<8x8xbf16>
    %c0_277 = arith.constant 0 : index
    %c327_278 = arith.constant 327 : index
    %302 = vector.load %arg6[%c0_277, %c327_278] : memref<8x1256xbf16, #tpu.memory_space<vmem>>, vector<8x800xbf16>
    %cst_279 = arith.constant dense<0.000000e+00> : vector<8x800xf32>
    %303 = tpu.matmul %301, %302, %cst_279 {dimension_numbers = #tpu.dot_dimension_numbers<[1], [0], [0], [1], [0, 0, 1, 1], [], []>} : vector<8x8xbf16>, vector<8x800xbf16>, vector<8x800xf32> -> vector<8x800xf32>
    %304 = arith.addf %299, %303 : vector<8x800xf32>
    %c22_280 = arith.constant 22 : index
    %c0_281 = arith.constant 0 : index
    %c0_282 = arith.constant 0 : index
    %305 = vector.load %arg4[%c22_280, %c0_281, %c0_282] : memref<27x8x8xbf16, #tpu.memory_space<vmem>>, vector<1x8x8xbf16>
    %306 = vector.shape_cast %305 : vector<1x8x8xbf16> to vector<8x8xbf16>
    %c0_283 = arith.constant 0 : index
    %c328_284 = arith.constant 328 : index
    %307 = vector.load %arg6[%c0_283, %c328_284] : memref<8x1256xbf16, #tpu.memory_space<vmem>>, vector<8x800xbf16>
    %cst_285 = arith.constant dense<0.000000e+00> : vector<8x800xf32>
    %308 = tpu.matmul %306, %307, %cst_285 {dimension_numbers = #tpu.dot_dimension_numbers<[1], [0], [0], [1], [0, 0, 1, 1], [], []>} : vector<8x8xbf16>, vector<8x800xbf16>, vector<8x800xf32> -> vector<8x800xf32>
    %309 = arith.addf %304, %308 : vector<8x800xf32>
    %c23_286 = arith.constant 23 : index
    %c0_287 = arith.constant 0 : index
    %c0_288 = arith.constant 0 : index
    %310 = vector.load %arg4[%c23_286, %c0_287, %c0_288] : memref<27x8x8xbf16, #tpu.memory_space<vmem>>, vector<1x8x8xbf16>
    %311 = vector.shape_cast %310 : vector<1x8x8xbf16> to vector<8x8xbf16>
    %c0_289 = arith.constant 0 : index
    %c329_290 = arith.constant 329 : index
    %312 = vector.load %arg6[%c0_289, %c329_290] : memref<8x1256xbf16, #tpu.memory_space<vmem>>, vector<8x800xbf16>
    %cst_291 = arith.constant dense<0.000000e+00> : vector<8x800xf32>
    %313 = tpu.matmul %311, %312, %cst_291 {dimension_numbers = #tpu.dot_dimension_numbers<[1], [0], [0], [1], [0, 0, 1, 1], [], []>} : vector<8x8xbf16>, vector<8x800xbf16>, vector<8x800xf32> -> vector<8x800xf32>
    %314 = arith.addf %309, %313 : vector<8x800xf32>
    %c24_292 = arith.constant 24 : index
    %c0_293 = arith.constant 0 : index
    %c0_294 = arith.constant 0 : index
    %315 = vector.load %arg4[%c24_292, %c0_293, %c0_294] : memref<27x8x8xbf16, #tpu.memory_space<vmem>>, vector<1x8x8xbf16>
    %316 = vector.shape_cast %315 : vector<1x8x8xbf16> to vector<8x8xbf16>
    %c0_295 = arith.constant 0 : index
    %c337_296 = arith.constant 337 : index
    %317 = vector.load %arg6[%c0_295, %c337_296] : memref<8x1256xbf16, #tpu.memory_space<vmem>>, vector<8x800xbf16>
    %cst_297 = arith.constant dense<0.000000e+00> : vector<8x800xf32>
    %318 = tpu.matmul %316, %317, %cst_297 {dimension_numbers = #tpu.dot_dimension_numbers<[1], [0], [0], [1], [0, 0, 1, 1], [], []>} : vector<8x8xbf16>, vector<8x800xbf16>, vector<8x800xf32> -> vector<8x800xf32>
    %319 = arith.addf %314, %318 : vector<8x800xf32>
    %c25_298 = arith.constant 25 : index
    %c0_299 = arith.constant 0 : index
    %c0_300 = arith.constant 0 : index
    %320 = vector.load %arg4[%c25_298, %c0_299, %c0_300] : memref<27x8x8xbf16, #tpu.memory_space<vmem>>, vector<1x8x8xbf16>
    %321 = vector.shape_cast %320 : vector<1x8x8xbf16> to vector<8x8xbf16>
    %c0_301 = arith.constant 0 : index
    %c338_302 = arith.constant 338 : index
    %322 = vector.load %arg6[%c0_301, %c338_302] : memref<8x1256xbf16, #tpu.memory_space<vmem>>, vector<8x800xbf16>
    %cst_303 = arith.constant dense<0.000000e+00> : vector<8x800xf32>
    %323 = tpu.matmul %321, %322, %cst_303 {dimension_numbers = #tpu.dot_dimension_numbers<[1], [0], [0], [1], [0, 0, 1, 1], [], []>} : vector<8x8xbf16>, vector<8x800xbf16>, vector<8x800xf32> -> vector<8x800xf32>
    %324 = arith.addf %319, %323 : vector<8x800xf32>
    %c26_304 = arith.constant 26 : index
    %c0_305 = arith.constant 0 : index
    %c0_306 = arith.constant 0 : index
    %325 = vector.load %arg4[%c26_304, %c0_305, %c0_306] : memref<27x8x8xbf16, #tpu.memory_space<vmem>>, vector<1x8x8xbf16>
    %326 = vector.shape_cast %325 : vector<1x8x8xbf16> to vector<8x8xbf16>
    %c0_307 = arith.constant 0 : index
    %c339_308 = arith.constant 339 : index
    %327 = vector.load %arg6[%c0_307, %c339_308] : memref<8x1256xbf16, #tpu.memory_space<vmem>>, vector<8x800xbf16>
    %cst_309 = arith.constant dense<0.000000e+00> : vector<8x800xf32>
    %328 = tpu.matmul %326, %327, %cst_309 {dimension_numbers = #tpu.dot_dimension_numbers<[1], [0], [0], [1], [0, 0, 1, 1], [], []>} : vector<8x8xbf16>, vector<8x800xbf16>, vector<8x800xf32> -> vector<8x800xf32>
    %329 = arith.addf %324, %328 : vector<8x800xf32>
    %330 = vector.broadcast %0 : vector<1x800xf32> to vector<8x800xf32>
    %331 = arith.mulf %329, %330 : vector<8x800xf32>
    %cst_310 = arith.constant dense<0.000000e+00> : vector<8xf32>
    %332 = vector.multi_reduction <add>, %331, %cst_310 [1] : vector<8x800xf32> to vector<8xf32>
    %333 = vector.shape_cast %332 : vector<8xf32> to vector<8x1xf32>
    %cst_311 = arith.constant 0.001953125 : f32
    %334 = vector.broadcast %cst_311 : f32 to vector<8x1xf32>
    %335 = arith.mulf %333, %334 : vector<8x1xf32>
    %336 = vector.broadcast %335 : vector<8x1xf32> to vector<8x800xf32>
    %337 = arith.subf %329, %336 : vector<8x800xf32>
    %338 = arith.mulf %337, %337 : vector<8x800xf32>
    %339 = vector.broadcast %0 : vector<1x800xf32> to vector<8x800xf32>
    %340 = arith.mulf %338, %339 : vector<8x800xf32>
    %cst_312 = arith.constant dense<0.000000e+00> : vector<8xf32>
    %341 = vector.multi_reduction <add>, %340, %cst_312 [1] : vector<8x800xf32> to vector<8xf32>
    %342 = vector.shape_cast %341 : vector<8xf32> to vector<8x1xf32>
    %cst_313 = arith.constant 0.001953125 : f32
    %343 = vector.broadcast %cst_313 : f32 to vector<8x1xf32>
    %344 = arith.mulf %342, %343 : vector<8x1xf32>
    %cst_314 = arith.constant 9.99999974E-6 : f32
    %345 = vector.broadcast %cst_314 : f32 to vector<8x1xf32>
    %346 = arith.addf %344, %345 : vector<8x1xf32>
    %347 = math.rsqrt %346 : vector<8x1xf32>
    %cst_315 = arith.constant 0.000000e+00 : f32
    %348 = vector.broadcast %cst_315 : f32 to vector<8x800xf32>
    %349 = arith.cmpf oge, %337, %348 : vector<8x800xf32>
    %cst_316 = arith.constant 2.000000e-01 : f32
    %350 = vector.broadcast %cst_316 : f32 to vector<8x1xf32>
    %351 = arith.mulf %350, %347 : vector<8x1xf32>
    %352 = vector.shape_cast %347 : vector<8x1xf32> to vector<8x1xf32>
    %353 = vector.broadcast %352 : vector<8x1xf32> to vector<8x800xf32>
    %354 = vector.shape_cast %351 : vector<8x1xf32> to vector<8x1xf32>
    %355 = vector.broadcast %354 : vector<8x1xf32> to vector<8x800xf32>
    %356 = arith.select %349, %353, %355 : vector<8x800xi1>, vector<8x800xf32>
    %357 = arith.mulf %337, %356 : vector<8x800xf32>
    %c0_317 = arith.constant 0 : index
    %c0_318 = arith.constant 0 : index
    %c0_319 = arith.constant 0 : index
    %358 = vector.load %arg5[%c0_317, %c0_318, %c0_319] : memref<1x8x800xf32, #tpu.memory_space<vmem>>, vector<1x8x800xf32>
    %359 = vector.shape_cast %358 : vector<1x8x800xf32> to vector<8x800xf32>
    %360 = vector.shape_cast %357 : vector<8x800xf32> to vector<1x8x800xf32>
    tpu.vector_store %arg5[%c0_317, %c0_318, %c0_319], %360 {strides = array<i32>} : memref<1x8x800xf32, #tpu.memory_space<vmem>>, vector<1x8x800xf32>,
    return
  }
  func.func @transform_0(%arg0: i32) -> (i32, i32, i32) {
    %c0_i32 = arith.constant 0 : i32
    %c0_i32_0 = arith.constant 0 : i32
    %c0_i32_1 = arith.constant 0 : i32
    return %arg0, %c0_i32, %c0_i32_0 : i32, i32, i32
  }
  func.func @transform_1(%arg0: i32) -> (i32, i32) {
    %c0_i32 = arith.constant 0 : i32
    %c0_i32_0 = arith.constant 0 : i32
    %c0_i32_1 = arith.constant 0 : i32
    return %c0_i32, %c0_i32_0 : i32, i32
  }
  func.func @transform_2(%arg0: i32) -> (i32, i32, i32) {
    %c0_i32 = arith.constant 0 : i32
    %c0_i32_0 = arith.constant 0 : i32
    %c0_i32_1 = arith.constant 0 : i32
    %c0_i32_2 = arith.constant 0 : i32
    return %c0_i32, %c0_i32_0, %c0_i32_1 : i32, i32, i32
  }
  func.func @transform_3(%arg0: i32) -> (i32, i32, i32) {
    %c0_i32 = arith.constant 0 : i32
    %c0_i32_0 = arith.constant 0 : i32
    %c0_i32_1 = arith.constant 0 : i32
    %c0_i32_2 = arith.constant 0 : i32
    return %c0_i32, %c0_i32_0, %c0_i32_1 : i32, i32, i32
  }
  func.func @transform_4(%arg0: i32) -> (i32, i32, i32) {
    %c0_i32 = arith.constant 0 : i32
    %c0_i32_0 = arith.constant 0 : i32
    %c0_i32_1 = arith.constant 0 : i32
    return %arg0, %c0_i32, %c0_i32_0 : i32, i32, i32
  }
}

</mosaic_0001>

<bundles_post_ra>
// kernel: conv3d_block_forward.1
= control target key start
LH: loop header
LB: loop body
LE: loop exit
PB: predicated region body
PF: predicated region fallthrough
CT: control target
= control target key end

     0   :  { %s15152_s15 = smov 0   ;;  %s18182_s0 = inlined_call_operand.vmem [shape: bf16[2,4,1256], index: 0, kind: input, shape index: {}]   ;;  %s18183_s1 = inlined_call_operand.vmem [shape: f32[1,800], index: 1, kind: input, shape index: {}]   ;;  %s18184_s2 = inlined_call_operand.vmem [shape: bf16[27,8,4], index: 2, kind: input, shape index: {}]   ;;  %s18185_s3 = inlined_call_operand.vmem [shape: bf16[27,8,8], index: 3, kind: input, shape index: {}]   ;;  %s18186_s4 = inlined_call_operand.vmem [shape: f32[2,8,800], index: 4, kind: output, shape index: {}]  }
   0x1 LB: > { %s13263_s16 = sadd.s32 4294967295, %s15094_s15   ;;  %p13267_p0 = scmp.ge.s32.totalorder %s15094_s15, 1  ;;  %s15094_s15 = sphi %s15152_s15, %s14_s15  }
   0x2   : > { %p162_p1 = scmp.lt.s32.totalorder %s15094_s15, 3 }
   0x4   : > { %p163_p2 = pnand %p13267_p0, %p162_p1 }
   0x5   : > { %p188_p3 = scmp.lt.s32.totalorder (!%p163_p2), %s13263_s16, 1  ;;  %v219_v0 = vlaneseq (!%p163_p2)  ;;  %v15096_v1 = vmov (!%p163_p2), 1983009808   ;;  %v15097_v6 = vmov (!%p163_p2), 0   ;;  %s15098_s21 = smov (!%p163_p2), 10   ;;  %vm265_vm0 = vcmask (!%p163_p2), 80896  }
   0x6   : > { %166 = sbr.rel (%p163_p2) target bundleno = 2343 (0x927), region = 36  ;;  %v217_v2 = vunpack.c.l.s4 (!%p163_p2), %v15096_v1  ;;  %331 = vmatprep.mubr.bf16.mxu0 (!%p163_p2), %v15097_v6  ;;  %200 = vst [vmem:[#allocation2] sm:$0xff] (!%p163_p2), %v15097_v6  ;;  %201 = vst [vmem:[#allocation2 + $0x8] sm:$0xff] (!%p163_p2), %v15097_v6  ;;  %372 = vmatprep.mubr.bf16.mxu1 (!%p163_p2), %v15097_v6  ;;  %s15099_s22 = smov (!%p163_p2), 11   ;;  %vm277_vm1 = vcmask (!%p163_p2), 1041408   ;;  %vm273_vm2 = vcmask (!%p163_p2), 31744  }
   0x7   : > { %v15162_v3 = vshrl.u32 (!%p163_p2), %v219_v0, 7  ;;  %202 = vst [vmem:[#allocation2 + $0x10] sm:$0xff] (!%p163_p2), %v15097_v6  ;;  %203 = vst [vmem:[#allocation2 + $0x18] sm:$0xff] (!%p163_p2), %v15097_v6  ;;  %s15100_s23 = smov (!%p163_p2), 9   ;;  %s15101_s24 = smov (!%p163_p2), 1   ;;  %v15107_v62 = vmov (!%p163_p2), 0.0  }
   0x8   : > { %v218_v4 = vunpack.c.0.s8 (!%p163_p2), %v217_v2  ;;  %s15102_s25 = smov (!%p163_p2), 127   ;;  %s15103_s26 = smov (!%p163_p2), 119   ;;  %v13270_v52 = vld [vmem:[%s18184_s2 + $0x4] sm:$0xf] (!%p163_p2)  ;;  %vm15108_vm3 = vmmov (!%p163_p2), 0   ;;  %vm478_vm4 = vcmask (!%p163_p2), 89088  }
   0x9   : > { %s15104_s27 = smov (!%p163_p2), 118   ;;  %s15105_s28 = smov (!%p163_p2), 117   ;;  %vm729_vm5 = vcmask (!%p163_p2), 72704   ;;  %vm987_vm6 = vcmask (!%p163_p2), 7168   ;;  %vm18216_vm7 = vcmask (!%p163_p2), 1039360   ;;  %vm18215_vm8 = vcmask (!%p163_p2), 973824  }
   0xa   : > { %v15166_v5 = vsub.s32 (!%p163_p2), %v218_v4, %v15162_v3  ;;  %s15106_s29 = smov (!%p163_p2), 39   ;;  %s15109_s6 = smov (!%p163_p2), 38   ;;  %vm18214_vm9 = vcmask (!%p163_p2), 965632   ;;  %vm18213_vm10 = vcmask (!%p163_p2), 957440   ;;  %vm18212_vm11 = vcmask (!%p163_p2), 318464  }
   0xb   : > { %s15110_s9 = smov (!%p163_p2), 37   ;;  %s15111_s12 = smov (!%p163_p2), 29   ;;  %vm18211_vm12 = vcmask (!%p163_p2), 310272   ;;  %vm18210_vm13 = vcmask (!%p163_p2), 302080   ;;  %vm18187_vm14 = vcmask (!%p163_p2), 236544   ;;  %vm18192_vm15 = vcmask (!%p163_p2), 228352  }
   0xc   : > { %s15113_s30 = smov (!%p163_p2), 27   ;;  %s15114_s8 = smov (!%p163_p2), 19  }
   0xd   : > { %s18360_s16 = smov (!%p188_p3, %s13263_s16), 1  ;;  %s15115_s13 = smov 18  }
   0xe   : > { %s15004_s17 = smul.u32 20, %s18360_s16  ;;  %s15116_s19 = smov 17  }
   0xf   : > { %s15117_s10 = smov 67   ;;  %s15118_s18 = smov 66  }
  0x10   : > { %s15177_s20 = scalar_lea.vmem %s18182_s0, %s15004_s17  ;;  %s15112_s17 = smov 28  }
  0x11   : > { %v209_v7 = vld [vmem:[%s15177_s20] sm:$0xff]  ;;  %v210_v10 = vld [vmem:[%s15177_s20 + $0x8] sm:$0xff]  ;;  %s18190_s11 = smov 65   ;;  %s18188_s7 = smov 57  }
  0x12   : > { %v222_v8 = vrot.slane %v209_v7, %v15166_v5  ;;  %v215_v9 = vcombine.high %v209_v7, %v209_v7  ;;  %v239_v14 = vrot.slane %v210_v10, %v15166_v5  ;;  %v232_v15 = vcombine.high %v210_v10, %v210_v10  ;;  %v1424_v19 = vld [vmem:[%s15177_s20 + $0x2] sm:$0xff]  ;;  %v1425_v24 = vld [vmem:[%s15177_s20 + $0xa] sm:$0x3f]  ;;  %s18193_s14 = smov 56  }
  0x13   : > { %v15218_v20 = vrot.slane %v1424_v19, %v15166_v5  ;;  %v1428_v21 = vcombine.high %v1424_v19, %v1424_v19  ;;  %v1452_v26 = vrot.slane %v1425_v24, %v15166_v5  ;;  %v1445_v27 = vcombine.high %v1425_v24, %v1425_v24  ;;  %v1679_v30 = vld [vmem:[%s15177_s20 + $0xa] sm:$0x3f]  ;;  %v208_v19 = vld [vmem:[%s18184_s2] sm:$0xf] }
  0x14   : > { %249 = vrot.lane.b32.xlu0 %v222_v8, %s15098_s21  ;;  %v229_v11 = vrot.slane %v215_v9, %v15166_v5  ;;  %v230_v12 = vcombine.high %v222_v8, %v222_v8  ;;  %v247_v16 = vcombine.high %v239_v14, %v239_v14  ;;  %v246_v17 = vrot.slane %v232_v15, %v15166_v5  ;;  %v1933_v35 = vld [vmem:[%s15177_s20 + $0xa] sm:$0x3f] }
  0x15   : > { %v15223_v22 = vcombine.high %v15218_v20, %v15218_v20  ;;  %v15228_v23 = vrot.slane %v1428_v21, %v15166_v5  ;;  %v1460_v28 = vcombine.high %v1452_v26, %v1452_v26  ;;  %v1459_v29 = vrot.slane %v1445_v27, %v15166_v5  ;;  %v2187_v40 = vld [vmem:[%s15177_s20 + $0xa] sm:$0x3f] }
  0x16   : > { %253 = vrot.lane.b32.xlu1 %v229_v11, %s15098_s21  ;;  %v231_v13 = vcombine.high %v229_v11, %v229_v11  ;;  %v248_v18 = vcombine.high %v246_v17, %v246_v17  ;;  %v1706_v31 = vrot.slane %v1679_v30, %v15166_v5  ;;  %v1699_v32 = vcombine.high %v1679_v30, %v1679_v30  ;;  %v2441_v55 = vld [vmem:[%s15177_s20 + $0xa] sm:$0x3f] }
  0x17   : > { %v15235_v25 = vcombine.high %v15228_v23, %v15228_v23  ;;  %v1960_v36 = vrot.slane %v1933_v35, %v15166_v5  ;;  %v1953_v37 = vcombine.high %v1933_v35, %v1933_v35  ;;  %v2214_v41 = vrot.slane %v2187_v40, %v15166_v5 }
  0x18   : > { %251 = vrot.lane.b32.xlu0 %v230_v12, %s15098_s21  ;;  %v1714_v33 = vcombine.high %v1706_v31, %v1706_v31  ;;  %v1713_v34 = vrot.slane %v1699_v32, %v15166_v5  ;;  %v2207_v42 = vcombine.high %v2187_v40, %v2187_v40  ;;  %v2468_v60 = vrot.slane %v2441_v55, %v15166_v5 }
  0x19   : > { %v1968_v38 = vcombine.high %v1960_v36, %v1960_v36  ;;  %v1967_v39 = vrot.slane %v1953_v37, %v15166_v5  ;;  %v2222_v43 = vcombine.high %v2214_v41, %v2214_v41  ;;  %v2461_v63 = vcombine.high %v2441_v55, %v2441_v55 }
  0x1a   : > { %255 = vrot.lane.b32.xlu1 %v231_v13, %s15098_s21  ;;  %v2221_v45 = vrot.slane %v2207_v42, %v15166_v5  ;;  %v2476_v1 = vcombine.high %v2468_v60, %v2468_v60 }
  0x1b   : > { %v2475_v10 = vrot.slane %v2461_v63, %v15166_v5 }
  0x1c   : > { %257 = vrot.lane.b32.xlu0 %v239_v14, %s15098_s21 }
  0x1e   : > { %259 = vrot.lane.b32.xlu1 %v247_v16, %s15098_s21 }
  0x20   : > { %261 = vrot.lane.b32.xlu0 %v246_v17, %s15098_s21 }
  0x22   : > { %263 = vrot.lane.b32.xlu1 %v248_v18, %s15098_s21 }
  0x24   : > { %462 = vrot.lane.b32.xlu0 %v222_v8, %s15099_s22 }
  0x26   : > { %464 = vrot.lane.b32.xlu1 %v230_v12, %s15099_s22 }
  0x28   : > { %466 = vrot.lane.b32.xlu0 %v229_v11, %s15099_s22 }
  0x2a   : > { %468 = vrot.lane.b32.xlu1 %v231_v13, %s15099_s22 }
  0x2c   : > { %470 = vrot.lane.b32.xlu0 %v239_v14, %s15099_s22 }
  0x2e   : > { %472 = vrot.lane.b32.xlu1 %v247_v16, %s15099_s22 }
  0x30   : > { %474 = vrot.lane.b32.xlu0 %v246_v17, %s15099_s22 }
  0x32   : > { %476 = vrot.lane.b32.xlu1 %v248_v18, %s15099_s22 }
  0x34   : > { %713 = vrot.lane.b32.xlu0 %v222_v8, %s15100_s23 }
  0x36   : > { %715 = vrot.lane.b32.xlu1 %v230_v12, %s15100_s23 }
  0x38   : > { %717 = vrot.lane.b32.xlu0 %v229_v11, %s15100_s23 }
  0x3a   : > { %719 = vrot.lane.b32.xlu1 %v231_v13, %s15100_s23 }
  0x3c   : > { %721 = vrot.lane.b32.xlu0 %v239_v14, %s15100_s23 }
  0x3e   : > { %723 = vrot.lane.b32.xlu1 %v247_v16, %s15100_s23 }
  0x40   : > { %725 = vrot.lane.b32.xlu0 %v246_v17, %s15100_s23 }
  0x42   : > { %727 = vrot.lane.b32.xlu1 %v248_v18, %s15100_s23 }
  0x44   : > { %971 = vrot.lane.b32.xlu0 %v222_v8, %s15101_s24 }
  0x46   : > { %973 = vrot.lane.b32.xlu1 %v230_v12, %s15101_s24 }
  0x48   : > { %975 = vrot.lane.b32.xlu0 %v229_v11, %s15101_s24 }
  0x4a   : > { %977 = vrot.lane.b32.xlu1 %v231_v13, %s15101_s24 }
  0x4c   : > { %979 = vrot.lane.b32.xlu0 %v239_v14, %s15101_s24 }
  0x4e   : > { %981 = vrot.lane.b32.xlu1 %v247_v16, %s15101_s24 }
  0x50   : > { %983 = vrot.lane.b32.xlu0 %v246_v17, %s15101_s24  ;;  %v2695_v17 = vld [vmem:[%s15177_s20 + $0xa] sm:$0x3f] }
  0x51   : > { %v2715_v27 = vcombine.high %v2695_v17, %v2695_v17 }
  0x52   : > { %985 = vrot.lane.b32.xlu1 %v248_v18, %s15101_s24 }
  0x54   : > { %1461 = vrot.lane.b32.xlu0 %v15218_v20, %s15102_s25 }
  0x56   : > { %1463 = vrot.lane.b32.xlu1 %v15223_v22, %s15102_s25 }
  0x58   : > { %1465 = vrot.lane.b32.xlu0 %v15228_v23, %s15102_s25 }
  0x5a   : > { %1467 = vrot.lane.b32.xlu1 %v15235_v25, %s15102_s25 }
  0x5c   : > { %1469 = vrot.lane.b32.xlu0 %v1452_v26, %s15102_s25  ;;  %v2722_v26 = vrot.slane %v2695_v17, %v15166_v5 }
  0x5e   : > { %1471 = vrot.lane.b32.xlu1 %v1460_v28, %s15102_s25  ;;  %v2730_v32 = vcombine.high %v2722_v26, %v2722_v26 }
  0x60   : > { %1473 = vrot.lane.b32.xlu0 %v1459_v29, %s15102_s25 }
  0x62   : > { %1715 = vrot.lane.b32.xlu1 %v15218_v20, %s15103_s26 }
  0x64   : > { %1717 = vrot.lane.b32.xlu0 %v15223_v22, %s15103_s26 }
  0x66   : > { %1719 = vrot.lane.b32.xlu1 %v15228_v23, %s15103_s26 }
  0x68   : > { %1721 = vrot.lane.b32.xlu0 %v15235_v25, %s15103_s26 }
  0x6a   : > { %1723 = vrot.lane.b32.xlu1 %v1706_v31, %s15103_s26 }
  0x6c   : > { %1725 = vrot.lane.b32.xlu0 %v1714_v33, %s15103_s26 }
  0x6e   : > { %1727 = vrot.lane.b32.xlu1 %v1713_v34, %s15103_s26  ;;  %v2729_v34 = vrot.slane %v2715_v27, %v15166_v5 }
  0x70   : > { %1969 = vrot.lane.b32.xlu0 %v15218_v20, %s15104_s27 }
  0x72   : > { %1971 = vrot.lane.b32.xlu1 %v15223_v22, %s15104_s27 }
  0x74   : > { %1973 = vrot.lane.b32.xlu0 %v15228_v23, %s15104_s27 }
  0x76   : > { %1975 = vrot.lane.b32.xlu1 %v15235_v25, %s15104_s27 }
  0x78   : > { %1977 = vrot.lane.b32.xlu0 %v1960_v36, %s15104_s27 }
  0x7a   : > { %1979 = vrot.lane.b32.xlu1 %v1968_v38, %s15104_s27 }
  0x7c   : > { %1981 = vrot.lane.b32.xlu0 %v1967_v39, %s15104_s27 }
  0x7e   : > { %2223 = vrot.lane.b32.xlu1 %v15218_v20, %s15105_s28 }
  0x80   : > { %2225 = vrot.lane.b32.xlu0 %v15223_v22, %s15105_s28 }
  0x82   : > { %2227 = vrot.lane.b32.xlu1 %v15228_v23, %s15105_s28 }
  0x84   : > { %2229 = vrot.lane.b32.xlu0 %v15235_v25, %s15105_s28 }
  0x86   : > { %v250_v44 = vpop.permute.xlu0 %249  ;;  %2231 = vrot.lane.b32.xlu1 %v2214_v41, %s15105_s28 }
  0x88   : > { %v254_v46 = vpop.permute.xlu1 %253  ;;  %2233 = vrot.lane.b32.xlu0 %v2222_v43, %s15105_s28  ;;  %v2949_v43 = vld [vmem:[%s15177_s20 + $0xa] sm:$0x3f] }
  0x8a   : > { %v252_v47 = vpop.permute.xlu0 %251  ;;  %2235 = vrot.lane.b32.xlu1 %v2221_v45, %s15105_s28 }
  0x8b   : > { %v267_v48 = vsel %vm265_vm0, %v252_v47, %v254_v46  ;;  %v266_v49 = vsel %vm265_vm0, %v250_v44, %v252_v47 }
  0x8c   : > { %13271 = vmatprep.subr.msk.bf16.mxu0 %vm277_vm1, %v267_v48  ;;  %v256_v50 = vpop.permute.xlu1 %255  ;;  %v279_v51 = vsel %vm277_vm1, %v266_v49, 0  ;;  %2477 = vrot.lane.b32.xlu0 %v15218_v20, %s15106_s29  ;;  %v13285_v48 = vld [vmem:[%s18184_s2 + $0x8] sm:$0xf]  ;;  %v2976_v49 = vrot.slane %v2949_v43, %v15166_v5 }
  0x8d   : > { %300 = vmatpush1.bf16.msra.mxu0 %v279_v51  ;;  %v268_v53 = vsel %vm265_vm0, %v254_v46, %v256_v50  ;;  %v2969_v51 = vcombine.high %v2949_v43, %v2949_v43 }
  0x8e   : > { %v258_v54 = vpop.permute.xlu0 %257  ;;  %2479 = vrot.lane.b32.xlu1 %v15223_v22, %s15106_s29  ;;  %v285_v58 = vsel %vm277_vm1, %v268_v53, 0  ;;  %v2984_v53 = vcombine.high %v2976_v49, %v2976_v49 }
  0x8f   : > { %v269_v56 = vsel %vm265_vm0, %v256_v50, %v258_v54 }
  0x90   : > { %13272 = vmatmul.mubr.msk.bf16.vlgmr.msra.gmra.mrb[0].mxu0 %vm273_vm2, %v13270_v52  ;;  %13273 = vmatprep.subr.msk.bf16.mxu1 %vm277_vm1, %v269_v56  ;;  %v260_v57 = vpop.permute.xlu1 %259 }
  0x91   : > { %v270_v59 = vsel %vm265_vm0, %v258_v54, %v260_v57  ;;  %341 = vmatpush1.bf16.msra.mxu1 %v285_v58  ;;  %413 = vmatprep.mubr.bf16.mxu0 %v15097_v6  ;;  %v2983_v58 = vrot.slane %v2969_v51, %v15166_v5 }
  0x92   : > { %v262_v61 = vpop.permute.xlu0 %261  ;;  %13848 = vmatprep.subr.bf16.mxu1 %v15107_v62  ;;  %2481 = vrot.lane.b32.xlu0 %v15228_v23, %s15106_s29  ;;  %v291_v4 = vsel %vm277_vm1, %v270_v59, 0 }
  0x93   : > { %v271_v0 = vsel %vm265_vm0, %v260_v57, %v262_v61  ;;  %2483 = vrot.lane.b32.xlu1 %v15235_v25, %s15106_s29 }
  0x94   : > { %13274 = vmatmul.mubr.msk.bf16.vlgmr.msra.gmra.mrb[0].mxu1 %vm273_vm2, %v13270_v52  ;;  %13275 = vmatprep.subr.msk.bf16.mxu0 %vm277_vm1, %v271_v0  ;;  %v264_v2 = vpop.permute.xlu1 %263 }
  0x95   : > { %v272_v7 = vsel %vm265_vm0, %v262_v61, %v264_v2  ;;  %382 = vmatpush1.bf16.msra.mxu0 %v291_v4  ;;  %13850 = vmatprep.mubr.msk.bf16.mxu1 %vm15108_vm3, %v15107_v62  ;;  %v3203_v4 = vld [vmem:[%s15177_s20 + $0xa] sm:$0xff] }
  0x96   : > { %v297_v8 = vsel %vm277_vm1, %v272_v7, 0  ;;  %v463_v9 = vpop.permute.xlu0 %462  ;;  %2485 = vrot.lane.b32.xlu0 %v2468_v60, %s15106_s29 }
  0x97   : > { %13849 = vmatpush3.bf16.msra.mxu1 %v297_v8  ;;  %2487 = vrot.lane.b32.xlu1 %v2476_v1, %s15106_s29 }
  0x98   : > { %13276 = vmatmul.mubr.msk.bf16.vlgmr.msra.gmra.mrb[4].mxu0 %vm273_vm2, %v13270_v52  ;;  %v465_v11 = vpop.permute.xlu1 %464 }
  0x99   : > { %v479_v12 = vsel %vm478_vm4, %v463_v9, %v465_v11  ;;  %542 = vmatprep.mubr.bf16.mxu0 %v15097_v6 }
  0x9a   : > { %v467_v13 = vpop.permute.xlu0 %466  ;;  %2489 = vrot.lane.b32.xlu0 %v2475_v10, %s15106_s29  ;;  %v490_v16 = vsel %vm277_vm1, %v479_v12, 0  ;;  %v15419_v10 = vrot.slane %v3203_v4, %v15166_v5 }
  0x9b   : > { %v480_v14 = vsel %vm478_vm4, %v465_v11, %v467_v13  ;;  %2731 = vrot.lane.b32.xlu1 %v15218_v20, %s15109_s6  ;;  %v3223_v11 = vcombine.high %v3203_v4, %v3203_v4 }
  0x9c   : > { %13851 = vmatmul.mubr.msk.bf16.vlgmr.msra.gmra.mrb[4].mxu1 %vm273_vm2, %v13270_v52  ;;  %13278 = vmatprep.subr.msk.bf16.mxu0 %vm277_vm1, %v480_v14  ;;  %v469_v15 = vpop.permute.xlu1 %468  ;;  %v15433_v17 = vcombine.high %v15419_v10, %v15419_v10 }
  0x9d   : > { %v481_v18 = vsel %vm478_vm4, %v467_v13, %v469_v15  ;;  %511 = vmatpush1.bf16.msra.mxu0 %v490_v16  ;;  %583 = vmatprep.mubr.bf16.mxu1 %v15097_v6 }
  0x9e   : > { %v471_v21 = vpop.permute.xlu0 %470  ;;  %2733 = vrot.lane.b32.xlu0 %v15223_v22, %s15109_s6  ;;  %v496_v29 = vsel %vm277_vm1, %v481_v18, 0 }
  0x9f   : > { %v482_v24 = vsel %vm478_vm4, %v469_v15, %v471_v21  ;;  %2735 = vrot.lane.b32.xlu1 %v15228_v23, %s15109_s6  ;;  %v13293_v15 = vld [vmem:[%s18184_s2 + $0xc] sm:$0xf] }
  0xa0   : > { %13279 = vmatmul.mubr.msk.bf16.vlgmr.msra.gmra.mrb[0].mxu0 %vm273_vm2, %v208_v19  ;;  %13280 = vmatprep.subr.msk.bf16.mxu1 %vm277_vm1, %v482_v24  ;;  %v473_v28 = vpop.permute.xlu1 %472 }
  0xa1   : > { %v483_v30 = vsel %vm478_vm4, %v471_v21, %v473_v28  ;;  %552 = vmatpush1.bf16.msra.mxu1 %v496_v29  ;;  %624 = vmatprep.mubr.bf16.mxu0 %v15097_v6  ;;  %v15440_v21 = vrot.slane %v3223_v11, %v15166_v5 }
  0xa2   : > { %v475_v31 = vpop.permute.xlu0 %474  ;;  %13854 = vmatprep.subr.bf16.mxu1 %v15107_v62  ;;  %2737 = vrot.lane.b32.xlu0 %v15235_v25, %s15109_s6  ;;  %v502_v36 = vsel %vm277_vm1, %v483_v30, 0 }
  0xa3   : > { %v484_v33 = vsel %vm478_vm4, %v473_v28, %v475_v31  ;;  %2739 = vrot.lane.b32.xlu1 %v2722_v26, %s15109_s6  ;;  %v15453_v30 = vcombine.high %v15440_v21, %v15440_v21 }
  0xa4   : > { %13281 = vmatmul.mubr.msk.bf16.vlgmr.msra.gmra.mrb[0].mxu1 %vm273_vm2, %v208_v19  ;;  %13282 = vmatprep.subr.msk.bf16.mxu0 %vm277_vm1, %v484_v33  ;;  %v477_v35 = vpop.permute.xlu1 %476 }
  0xa5   : > { %v485_v37 = vsel %vm478_vm4, %v475_v31, %v477_v35  ;;  %593 = vmatpush1.bf16.msra.mxu0 %v502_v36  ;;  %13856 = vmatprep.mubr.msk.bf16.mxu1 %vm15108_vm3, %v15107_v62  ;;  %v1232_v36 = vsel %vm277_vm1, %v15218_v20, 0 }
  0xa6   : > { %v508_v38 = vsel %vm277_vm1, %v485_v37, 0  ;;  %v714_v39 = vpop.permute.xlu0 %713  ;;  %2741 = vrot.lane.b32.xlu0 %v2730_v32, %s15109_s6 }
  0xa7   : > { %13855 = vmatpush3.bf16.msra.mxu1 %v508_v38  ;;  %2743 = vrot.lane.b32.xlu1 %v2729_v34, %s15109_s6 }
  0xa8   : > { %13283 = vmatmul.mubr.msk.bf16.vlgmr.msra.gmra.mrb[4].mxu0 %vm273_vm2, %v208_v19  ;;  %v716_v40 = vpop.permute.xlu1 %715 }
  0xa9   : > { %v730_v41 = vsel %vm729_vm5, %v714_v39, %v716_v40  ;;  %793 = vmatprep.mubr.bf16.mxu0 %v15097_v6 }
  0xaa   : > { %v718_v42 = vpop.permute.xlu0 %717  ;;  %2985 = vrot.lane.b32.xlu0 %v15218_v20, %s15110_s9  ;;  %v741_v46 = vsel %vm277_vm1, %v730_v41, 0 }
  0xab   : > { %v731_v44 = vsel %vm729_vm5, %v716_v40, %v718_v42  ;;  %2987 = vrot.lane.b32.xlu1 %v15223_v22, %s15110_s9  ;;  %v1238_v40 = vsel %vm277_vm1, %v15228_v23, 0 }
  0xac   : > { %13857 = vmatmul.mubr.msk.bf16.vlgmr.msra.gmra.mrb[4].mxu1 %vm273_vm2, %v208_v19  ;;  %13286 = vmatprep.subr.msk.bf16.mxu0 %vm277_vm1, %v731_v44  ;;  %v720_v45 = vpop.permute.xlu1 %719  ;;  %v1192_v19 = vld [vmem:[%s15177_s20 + $0xa] sm:$0x3f]  ;;  %v13301_v44 = vld [vmem:[%s18184_s2 + $0x10] sm:$0xf] }
  0xad   : > { %v732_v47 = vsel %vm729_vm5, %v718_v42, %v720_v45  ;;  %762 = vmatpush1.bf16.msra.mxu0 %v741_v46  ;;  %834 = vmatprep.mubr.bf16.mxu1 %v15097_v6  ;;  %v1219_v29 = vrot.slane %v1192_v19, %v15166_v5  ;;  %v1212_v42 = vcombine.high %v1192_v19, %v1192_v19 }
  0xae   : > { %v722_v50 = vpop.permute.xlu0 %721  ;;  %2989 = vrot.lane.b32.xlu0 %v15228_v23, %s15110_s9  ;;  %v747_v55 = vsel %vm277_vm1, %v732_v47, 0 }
  0xaf   : > { %v733_v52 = vsel %vm729_vm5, %v720_v45, %v722_v50  ;;  %2991 = vrot.lane.b32.xlu1 %v15235_v25, %s15110_s9  ;;  %v1227_v38 = vcombine.high %v1219_v29, %v1219_v29  ;;  %v1244_v45 = vsel %vm277_vm1, %v1219_v29, 0  ;;  %v1226_v46 = vrot.slane %v1212_v42, %v15166_v5  ;;  %v13317_v29 = vld [vmem:[%s18184_s2 + $0x18] sm:$0xf] }
  0xb0   : > { %13287 = vmatmul.mubr.msk.bf16.vlgmr.msra.gmra.mrb[0].mxu0 %vm273_vm2, %v13285_v48  ;;  %13288 = vmatprep.subr.msk.bf16.mxu1 %vm277_vm1, %v733_v52  ;;  %v724_v54 = vpop.permute.xlu1 %723 }
  0xb1   : > { %v734_v56 = vsel %vm729_vm5, %v722_v50, %v724_v54  ;;  %803 = vmatpush1.bf16.msra.mxu1 %v747_v55  ;;  %875 = vmatprep.mubr.bf16.mxu0 %v15097_v6  ;;  %v1250_v50 = vsel %vm277_vm1, %v1226_v46, 0 }
  0xb2   : > { %v726_v57 = vpop.permute.xlu0 %725  ;;  %13860 = vmatprep.subr.bf16.mxu1 %v15107_v62  ;;  %2993 = vrot.lane.b32.xlu0 %v2976_v49, %s15110_s9  ;;  %v753_v61 = vsel %vm277_vm1, %v734_v56, 0 }
  0xb3   : > { %v735_v59 = vsel %vm729_vm5, %v724_v54, %v726_v57  ;;  %2995 = vrot.lane.b32.xlu1 %v2984_v53, %s15110_s9 }
  0xb4   : > { %13289 = vmatmul.mubr.msk.bf16.vlgmr.msra.gmra.mrb[0].mxu1 %vm273_vm2, %v13285_v48  ;;  %13290 = vmatprep.subr.msk.bf16.mxu0 %vm277_vm1, %v735_v59  ;;  %v728_v60 = vpop.permute.xlu1 %727 }
  0xb5   : > { %v736_v63 = vsel %vm729_vm5, %v726_v57, %v728_v60  ;;  %844 = vmatpush1.bf16.msra.mxu0 %v753_v61  ;;  %13862 = vmatprep.mubr.msk.bf16.mxu1 %vm15108_vm3, %v15107_v62 }
  0xb6   : > { %v759_v0 = vsel %vm277_vm1, %v736_v63, 0  ;;  %v972_v1 = vpop.permute.xlu0 %971  ;;  %2997 = vrot.lane.b32.xlu0 %v2983_v58, %s15110_s9 }
  0xb7   : > { %13861 = vmatpush3.bf16.msra.mxu1 %v759_v0  ;;  %3240 = vrot.lane.b32.xlu1 %v15218_v20, %s15111_s12 }
  0xb8   : > { %13291 = vmatmul.mubr.msk.bf16.vlgmr.msra.gmra.mrb[4].mxu0 %vm273_vm2, %v13285_v48  ;;  %v974_v2 = vpop.permute.xlu1 %973 }
  0xb9   : > { %v988_v7 = vsel %vm987_vm6, %v972_v1, %v974_v2  ;;  %1051 = vmatprep.mubr.bf16.mxu0 %v15097_v6  ;;  %v13309_v1 = vld [vmem:[%s18184_s2 + $0x14] sm:$0xf] }
  0xba   : > { %v976_v8 = vpop.permute.xlu0 %975  ;;  %3242 = vrot.lane.b32.xlu0 %v15223_v22, %s15111_s12  ;;  %v999_v13 = vsel %vm277_vm1, %v988_v7, 0 }
  0xbb   : > { %v989_v9 = vsel %vm987_vm6, %v974_v2, %v976_v8  ;;  %3244 = vrot.lane.b32.xlu1 %v15228_v23, %s15111_s12 }
  0xbc   : > { %13863 = vmatmul.mubr.msk.bf16.vlgmr.msra.gmra.mrb[4].mxu1 %vm273_vm2, %v13285_v48  ;;  %13294 = vmatprep.subr.msk.bf16.mxu0 %vm277_vm1, %v989_v9  ;;  %v978_v12 = vpop.permute.xlu1 %977 }
  0xbd   : > { %v990_v14 = vsel %vm987_vm6, %v976_v8, %v978_v12  ;;  %1020 = vmatpush1.bf16.msra.mxu0 %v999_v13  ;;  %1092 = vmatprep.mubr.bf16.mxu1 %v15097_v6 }
  0xbe   : > { %v980_v16 = vpop.permute.xlu0 %979  ;;  %3246 = vrot.lane.b32.xlu0 %v15235_v25, %s15111_s12  ;;  %v1005_v26 = vsel %vm277_vm1, %v990_v14, 0 }
  0xbf   : > { %v991_v18 = vsel %vm987_vm6, %v978_v12, %v980_v16  ;;  %3248 = vrot.lane.b32.xlu1 %v15419_v10, %s15111_s12 }
  0xc0   : > { %13295 = vmatmul.mubr.msk.bf16.vlgmr.msra.gmra.mrb[0].mxu0 %vm273_vm2, %v13293_v15  ;;  %13296 = vmatprep.subr.msk.bf16.mxu1 %vm277_vm1, %v991_v18  ;;  %v982_v24 = vpop.permute.xlu1 %981 }
  0xc1   : > { %v992_v27 = vsel %vm987_vm6, %v980_v16, %v982_v24  ;;  %1061 = vmatpush1.bf16.msra.mxu1 %v1005_v26  ;;  %1133 = vmatprep.mubr.bf16.mxu0 %v15097_v6 }
  0xc2   : > { %v984_v28 = vpop.permute.xlu0 %983  ;;  %13866 = vmatprep.subr.bf16.mxu1 %v15107_v62  ;;  %3250 = vrot.lane.b32.xlu0 %v15433_v17, %s15111_s12  ;;  %v1011_v33 = vsel %vm277_vm1, %v992_v27, 0 }
  0xc3   : > { %v993_v31 = vsel %vm987_vm6, %v982_v24, %v984_v28  ;;  %3252 = vrot.lane.b32.xlu1 %v15440_v21, %s15111_s12 }
  0xc4   : > { %13297 = vmatmul.mubr.msk.bf16.vlgmr.msra.gmra.mrb[0].mxu1 %vm273_vm2, %v13293_v15  ;;  %13298 = vmatprep.subr.msk.bf16.mxu0 %vm277_vm1, %v993_v31  ;;  %v986_v32 = vpop.permute.xlu1 %985 }
  0xc5   : > { %v994_v34 = vsel %vm987_vm6, %v984_v28, %v986_v32  ;;  %1102 = vmatpush1.bf16.msra.mxu0 %v1011_v33  ;;  %13868 = vmatprep.mubr.msk.bf16.mxu1 %vm15108_vm3, %v15107_v62  ;;  %v4234_v33 = vld [vmem:[%s15177_s20 + $0x2] sm:$0xff] }
  0xc6   : > { %v1017_v35 = vsel %vm277_vm1, %v994_v34, 0  ;;  %13302 = vmatprep.subr.msk.bf16.mxu0 %vm277_vm1, %v15223_v22  ;;  %v1462_v37 = vpop.permute.xlu0 %1461  ;;  %3254 = vrot.lane.b32.xlu0 %v15453_v30, %s15111_s12 }
  0xc7   : > { %13867 = vmatpush3.bf16.msra.mxu1 %v1017_v35  ;;  %3498 = vrot.lane.b32.xlu1 %v15218_v20, %s15112_s17 }
  0xc8   : > { %13299 = vmatmul.mubr.msk.bf16.vlgmr.msra.gmra.mrb[4].mxu0 %vm273_vm2, %v13293_v15  ;;  %13304 = vmatprep.subr.msk.bf16.mxu1 %vm277_vm1, %v15235_v25  ;;  %v1464_v39 = vpop.permute.xlu1 %1463 }
  0xc9   : > { %1253 = vmatpush1.bf16.msra.mxu0 %v1232_v36  ;;  %1284 = vmatprep.mubr.bf16.mxu0 %v15097_v6  ;;  %v1476_v52 = vsel %vm18216_vm7, %v1462_v37, %v1464_v39  ;;  %v4245_v37 = vrot.slane %v4234_v33, %v15166_v5 }
  0xca   : > { %13306 = vmatprep.subr.msk.bf16.mxu0 %vm277_vm1, %v1227_v38  ;;  %v1466_v41 = vpop.permute.xlu0 %1465  ;;  %3500 = vrot.lane.b32.xlu0 %v15223_v22, %s15112_s17  ;;  %v1486_v55 = vsel %vm277_vm1, %v1476_v52, 0  ;;  %v4238_v38 = vcombine.high %v4234_v33, %v4234_v33  ;;  %v13325_v52 = vld [vmem:[%s18184_s2 + $0x1c] sm:$0xf] }
  0xcb   : > { %3502 = vrot.lane.b32.xlu1 %v15228_v23, %s15112_s17  ;;  %v1477_v48 = vsel %vm18216_vm7, %v1464_v39, %v1466_v41  ;;  %v4253_v42 = vcombine.high %v4245_v37, %v4245_v37 }
  0xcc   : > { %13869 = vmatmul.mubr.msk.bf16.vlgmr.msra.gmra.mrb[4].mxu1 %vm273_vm2, %v13293_v15  ;;  %v1468_v43 = vpop.permute.xlu1 %1467 }
  0xcd   : > { %1294 = vmatpush1.bf16.msra.mxu1 %v1238_v40  ;;  %1325 = vmatprep.mubr.bf16.mxu1 %v15097_v6  ;;  %v1478_v57 = vsel %vm18216_vm7, %v1466_v41, %v1468_v43 }
  0xce   : > { %13872 = vmatprep.subr.bf16.mxu1 %v15107_v62  ;;  %v1470_v47 = vpop.permute.xlu0 %1469  ;;  %3504 = vrot.lane.b32.xlu0 %v15235_v25, %s15112_s17  ;;  %v1492_v60 = vsel %vm277_vm1, %v1478_v57, 0 }
  0xcf   : > { %3506 = vrot.lane.b32.xlu1 %v15419_v10, %s15112_s17  ;;  %v1479_v53 = vsel %vm18216_vm7, %v1468_v43, %v1470_v47 }
  0xd0   : > { %13303 = vmatmul.mubr.msk.bf16.vlgmr.msra.gmra.mrb[0].mxu0 %vm273_vm2, %v13301_v44  ;;  %v1472_v49 = vpop.permute.xlu1 %1471 }
  0xd1   : > { %1335 = vmatpush1.bf16.msra.mxu0 %v1244_v45  ;;  %1366 = vmatprep.mubr.bf16.mxu0 %v15097_v6  ;;  %v1480_v63 = vsel %vm18216_vm7, %v1470_v47, %v1472_v49  ;;  %v4252_v45 = vrot.slane %v4238_v38, %v15166_v5  ;;  %v13341_v38 = vld [vmem:[%s18184_s2 + $0x24] sm:$0xf] }
  0xd2   : > { %13310 = vmatprep.subr.msk.bf16.mxu0 %vm277_vm1, %v1477_v48  ;;  %v1474_v51 = vpop.permute.xlu0 %1473  ;;  %3508 = vrot.lane.b32.xlu0 %v15433_v17, %s15112_s17  ;;  %v1498_v2 = vsel %vm277_vm1, %v1480_v63, 0 }
  0xd3   : > { %3510 = vrot.lane.b32.xlu1 %v15440_v21, %s15112_s17  ;;  %v1481_v58 = vsel %vm18216_vm7, %v1472_v49, %v1474_v51  ;;  %v1504_v9 = vsel %vm277_vm1, %v1474_v51, 0  ;;  %v4254_v49 = vcombine.high %v4252_v45, %v4252_v45 }
  0xd4   : > { %13305 = vmatmul.mubr.msk.bf16.vlgmr.msra.gmra.mrb[0].mxu1 %vm273_vm2, %v13301_v44  ;;  %v1716_v54 = vpop.permute.xlu1 %1715 }
  0xd5   : > { %13873 = vmatpush3.bf16.msra.mxu1 %v1250_v50  ;;  %13874 = vmatprep.mubr.msk.bf16.mxu1 %vm15108_vm3, %v15107_v62 }
  0xd6   : > { %13312 = vmatprep.subr.msk.bf16.mxu1 %vm277_vm1, %v1479_v53  ;;  %v1718_v56 = vpop.permute.xlu0 %1717  ;;  %3512 = vrot.lane.b32.xlu0 %v15453_v30, %s15112_s17 }
  0xd7   : > { %3756 = vrot.lane.b32.xlu1 %v15218_v20, %s15113_s30  ;;  %v1730_v12 = vsel %vm18215_vm8, %v1716_v54, %v1718_v56 }
  0xd8   : > { %13307 = vmatmul.mubr.msk.bf16.vlgmr.msra.gmra.mrb[4].mxu0 %vm273_vm2, %v13301_v44  ;;  %v1720_v59 = vpop.permute.xlu1 %1719  ;;  %v1740_v15 = vsel %vm277_vm1, %v1730_v12, 0 }
  0xd9   : > { %1507 = vmatpush1.bf16.msra.mxu0 %v1486_v55  ;;  %1538 = vmatprep.mubr.bf16.mxu0 %v15097_v6  ;;  %v1731_v7 = vsel %vm18215_vm8, %v1718_v56, %v1720_v59 }
  0xda   : > { %13314 = vmatprep.subr.msk.bf16.mxu0 %vm277_vm1, %v1481_v58  ;;  %v1722_v61 = vpop.permute.xlu0 %1721  ;;  %3758 = vrot.lane.b32.xlu0 %v15223_v22, %s15113_s30 }
  0xdb   : > { %3760 = vrot.lane.b32.xlu1 %v15228_v23, %s15113_s30  ;;  %v1732_v18 = vsel %vm18215_vm8, %v1720_v59, %v1722_v61 }
  0xdc   : > { %13875 = vmatmul.mubr.msk.bf16.vlgmr.msra.gmra.mrb[4].mxu1 %vm273_vm2, %v13301_v44  ;;  %v1724_v0 = vpop.permute.xlu1 %1723  ;;  %v1746_v26 = vsel %vm277_vm1, %v1732_v18, 0 }
  0xdd   : > { %1548 = vmatpush1.bf16.msra.mxu1 %v1492_v60  ;;  %1579 = vmatprep.mubr.bf16.mxu1 %v15097_v6  ;;  %v1733_v13 = vsel %vm18215_vm8, %v1722_v61, %v1724_v0 }
  0xde   : > { %13878 = vmatprep.subr.bf16.mxu1 %v15107_v62  ;;  %v1726_v4 = vpop.permute.xlu0 %1725  ;;  %3762 = vrot.lane.b32.xlu0 %v15235_v25, %s15113_s30 }
  0xdf   : > { %3764 = vrot.lane.b32.xlu1 %v15419_v10, %s15113_s30  ;;  %v1734_v28 = vsel %vm18215_vm8, %v1724_v0, %v1726_v4 }
  0xe0   : > { %13311 = vmatmul.mubr.msk.bf16.vlgmr.msra.gmra.mrb[0].mxu0 %vm273_vm2, %v13309_v1  ;;  %v1728_v8 = vpop.permute.xlu1 %1727  ;;  %v1752_v31 = vsel %vm277_vm1, %v1734_v28, 0 }
  0xe1   : > { %1589 = vmatpush1.bf16.msra.mxu0 %v1498_v2  ;;  %1620 = vmatprep.mubr.bf16.mxu0 %v15097_v6  ;;  %v1735_v19 = vsel %vm18215_vm8, %v1726_v4, %v1728_v8  ;;  %v1758_v34 = vsel %vm277_vm1, %v1728_v8, 0  ;;  %v15643_v2 = vld [vmem:[#allocation2] sm:$0xff] }
  0xe2   : > { %13318 = vmatprep.subr.msk.bf16.mxu0 %vm277_vm1, %v1731_v7  ;;  %v1970_v11 = vpop.permute.xlu0 %1969  ;;  %3766 = vrot.lane.b32.xlu0 %v15433_v17, %s15113_s30 }
  0xe3   : > { %3768 = vrot.lane.b32.xlu1 %v15440_v21, %s15113_s30 }
  0xe4   : > { %13313 = vmatmul.mubr.msk.bf16.vlgmr.msra.gmra.mrb[0].mxu1 %vm273_vm2, %v13309_v1  ;;  %v1972_v14 = vpop.permute.xlu1 %1971 }
  0xe5   : > { %13879 = vmatpush3.bf16.msra.mxu1 %v1504_v9  ;;  %13880 = vmatprep.mubr.msk.bf16.mxu1 %vm15108_vm3, %v15107_v62 }
  0xe6   : > { %13320 = vmatprep.subr.msk.bf16.mxu1 %vm277_vm1, %v1733_v13  ;;  %v1974_v16 = vpop.permute.xlu0 %1973  ;;  %3770 = vrot.lane.b32.xlu0 %v15453_v30, %s15113_s30 }
  0xe7   : > { %4014 = vrot.lane.b32.xlu1 %v15218_v20, %s15114_s8 }
  0xe8   : > { %13315 = vmatmul.mubr.msk.bf16.vlgmr.msra.gmra.mrb[4].mxu0 %vm273_vm2, %v13309_v1  ;;  %v1976_v24 = vpop.permute.xlu1 %1975 }
  0xe9   : > { %1761 = vmatpush1.bf16.msra.mxu0 %v1740_v15  ;;  %1792 = vmatprep.mubr.bf16.mxu0 %v15097_v6  ;;  %v1986_v43 = vsel %vm18214_vm9, %v1974_v16, %v1976_v24 }
  0xea   : > { %13322 = vmatprep.subr.msk.bf16.mxu0 %vm277_vm1, %v1735_v19  ;;  %v1978_v27 = vpop.permute.xlu0 %1977  ;;  %4016 = vrot.lane.b32.xlu0 %v15223_v22, %s15114_s8  ;;  %v2000_v47 = vsel %vm277_vm1, %v1986_v43, 0 }
  0xeb   : > { %4018 = vrot.lane.b32.xlu1 %v15228_v23, %s15114_s8  ;;  %v1985_v23 = vsel %vm18214_vm9, %v1972_v14, %v1974_v16  ;;  %v1987_v36 = vsel %vm18214_vm9, %v1976_v24, %v1978_v27  ;;  %v4750_v16 = vld [vmem:[%s15177_s20 + $0x4] sm:$0xff] }
  0xec   : > { %13881 = vmatmul.mubr.msk.bf16.vlgmr.msra.gmra.mrb[4].mxu1 %vm273_vm2, %v13309_v1  ;;  %v1980_v20 = vpop.permute.xlu1 %1979 }
  0xed   : > { %1802 = vmatpush1.bf16.msra.mxu1 %v1746_v26  ;;  %1833 = vmatprep.mubr.bf16.mxu1 %v15097_v6  ;;  %v1988_v50 = vsel %vm18214_vm9, %v1978_v27, %v1980_v20  ;;  %v15682_v26 = vrot.slane %v4750_v16, %v15166_v5  ;;  %v4754_v27 = vcombine.high %v4750_v16, %v4750_v16 }
  0xee   : > { %13884 = vmatprep.subr.bf16.mxu1 %v15107_v62  ;;  %v1982_v22 = vpop.permute.xlu0 %1981  ;;  %4020 = vrot.lane.b32.xlu0 %v15235_v25, %s15114_s8  ;;  %v1984_v25 = vsel %vm18214_vm9, %v1970_v11, %v1972_v14  ;;  %v2006_v53 = vsel %vm277_vm1, %v1988_v50, 0  ;;  %v13333_v11 = vld [vmem:[%s18184_s2 + $0x20] sm:$0xf] }
  0xef   : > { %4022 = vrot.lane.b32.xlu1 %v15419_v10, %s15114_s8  ;;  %v1994_v40 = vsel %vm277_vm1, %v1984_v25, 0  ;;  %v1989_v44 = vsel %vm18214_vm9, %v1980_v20, %v1982_v22  ;;  %v2012_v57 = vsel %vm277_vm1, %v1982_v22, 0  ;;  %v15705_v22 = vrot.slane %v4754_v27, %v15166_v5 }
  0xf0   : > { %13319 = vmatmul.mubr.msk.bf16.vlgmr.msra.gmra.mrb[0].mxu0 %vm273_vm2, %v13317_v29  ;;  %v2224_v32 = vpop.permute.xlu1 %2223 }
  0xf1   : > { %1843 = vmatpush1.bf16.msra.mxu0 %v1752_v31  ;;  %1874 = vmatprep.mubr.bf16.mxu0 %v15097_v6 }
  0xf2   : > { %13326 = vmatprep.subr.msk.bf16.mxu0 %vm277_vm1, %v1985_v23  ;;  %v2226_v35 = vpop.permute.xlu0 %2225  ;;  %4024 = vrot.lane.b32.xlu0 %v15433_v17, %s15114_s8 }
  0xf3   : > { %4026 = vrot.lane.b32.xlu1 %v15440_v21, %s15114_s8  ;;  %v2238_v58 = vsel %vm18213_vm10, %v2224_v32, %v2226_v35 }
  0xf4   : > { %13321 = vmatmul.mubr.msk.bf16.vlgmr.msra.gmra.mrb[0].mxu1 %vm273_vm2, %v13317_v29  ;;  %v2228_v39 = vpop.permute.xlu1 %2227  ;;  %v2248_v61 = vsel %vm277_vm1, %v2238_v58, 0 }
  0xf5   : > { %13885 = vmatpush3.bf16.msra.mxu1 %v1758_v34  ;;  %13886 = vmatprep.mubr.msk.bf16.mxu1 %vm15108_vm3, %v15107_v62  ;;  %v2239_v55 = vsel %vm18213_vm10, %v2226_v35, %v2228_v39  ;;  %v15718_v34 = vcombine.high %v15705_v22, %v15705_v22 }
  0xf6   : > { %13328 = vmatprep.subr.msk.bf16.mxu1 %vm277_vm1, %v1987_v36  ;;  %v2230_v41 = vpop.permute.xlu0 %2229  ;;  %4028 = vrot.lane.b32.xlu0 %v15453_v30, %s15114_s8 }
  0xf7   : > { %4272 = vrot.lane.b32.xlu1 %v4245_v37, %s15115_s13  ;;  %v2240_v63 = vsel %vm18213_vm10, %v2228_v39, %v2230_v41 }
  0xf8   : > { %13323 = vmatmul.mubr.msk.bf16.vlgmr.msra.gmra.mrb[4].mxu0 %vm273_vm2, %v13317_v29  ;;  %v2232_v46 = vpop.permute.xlu1 %2231  ;;  %v2254_v7 = vsel %vm277_vm1, %v2240_v63, 0  ;;  %v13349_v63 = vld [vmem:[%s18184_s2 + $0x28] sm:$0xf] }
  0xf9   : > { %2015 = vmatpush1.bf16.msra.mxu0 %v1994_v40  ;;  %2046 = vmatprep.mubr.bf16.mxu0 %v15097_v6  ;;  %v2241_v59 = vsel %vm18213_vm10, %v2230_v41, %v2232_v46 }
  0xfa   : > { %13330 = vmatprep.subr.msk.bf16.mxu0 %vm277_vm1, %v1989_v44  ;;  %v2234_v48 = vpop.permute.xlu0 %2233  ;;  %4274 = vrot.lane.b32.xlu0 %v4253_v42, %s15115_s13 }
  0xfb   : > { %4276 = vrot.lane.b32.xlu1 %v4252_v45, %s15115_s13  ;;  %v2242_v8 = vsel %vm18213_vm10, %v2232_v46, %v2234_v48 }
  0xfc   : > { %13887 = vmatmul.mubr.msk.bf16.vlgmr.msra.gmra.mrb[4].mxu1 %vm273_vm2, %v13317_v29  ;;  %v2236_v51 = vpop.permute.xlu1 %2235  ;;  %v2260_v13 = vsel %vm277_vm1, %v2242_v8, 0 }
  0xfd   : > { %2056 = vmatpush1.bf16.msra.mxu1 %v2000_v47  ;;  %2087 = vmatprep.mubr.bf16.mxu1 %v15097_v6  ;;  %v2243_v0 = vsel %vm18213_vm10, %v2234_v48, %v2236_v51  ;;  %v2266_v19 = vsel %vm277_vm1, %v2236_v51, 0 }
  0xfe   : > { %13890 = vmatprep.subr.bf16.mxu1 %v15107_v62  ;;  %v2478_v54 = vpop.permute.xlu0 %2477  ;;  %4278 = vrot.lane.b32.xlu0 %v4254_v49, %s15115_s13 }
  0xff   : > { %4280 = vrot.lane.b32.xlu1 %v15419_v10, %s15115_s13 }
 0x100   : > { %13327 = vmatmul.mubr.msk.bf16.vlgmr.msra.gmra.mrb[0].mxu0 %vm273_vm2, %v13325_v52  ;;  %v2480_v56 = vpop.permute.xlu1 %2479 }
 0x101   : > { %2097 = vmatpush1.bf16.msra.mxu0 %v2006_v53  ;;  %2128 = vmatprep.mubr.bf16.mxu0 %v15097_v6  ;;  %v2492_v24 = vsel %vm18212_vm11, %v2478_v54, %v2480_v56 }
 0x102   : > { %13334 = vmatprep.subr.msk.bf16.mxu0 %vm277_vm1, %v2239_v55  ;;  %4282 = vrot.lane.b32.xlu0 %v15433_v17, %s15115_s13  ;;  %v2502_v20 = vsel %vm277_vm1, %v2492_v24, 0 }
 0x103   : > { %4284 = vrot.lane.b32.xlu1 %v15440_v21, %s15115_s13 }
 0x104   : > { %13329 = vmatmul.mubr.msk.bf16.vlgmr.msra.gmra.mrb[0].mxu1 %vm273_vm2, %v13325_v52  ;;  %v2482_v60 = vpop.permute.xlu0 %2481 }
 0x105   : > { %13891 = vmatpush3.bf16.msra.mxu1 %v2012_v57  ;;  %13892 = vmatprep.mubr.msk.bf16.mxu1 %vm15108_vm3, %v15107_v62  ;;  %v2484_v6 = vpop.permute.xlu1 %2483  ;;  %v2493_v14 = vsel %vm18212_vm11, %v2480_v56, %v2482_v60 }
 0x106   : > { %13336 = vmatprep.subr.msk.bf16.mxu1 %vm277_vm1, %v2241_v59  ;;  %4286 = vrot.lane.b32.xlu0 %v15453_v30, %s15115_s13  ;;  %v2494_v29 = vsel %vm18212_vm11, %v2482_v60, %v2484_v6 }
 0x107   : > { %4530 = vrot.lane.b32.xlu1 %v4245_v37, %s15116_s19  ;;  %v2508_v33 = vsel %vm277_vm1, %v2494_v29, 0 }
 0x108   : > { %13331 = vmatmul.mubr.msk.bf16.vlgmr.msra.gmra.mrb[4].mxu0 %vm273_vm2, %v13325_v52  ;;  %v2486_v1 = vpop.permute.xlu0 %2485 }
 0x109   : > { %2269 = vmatpush1.bf16.msra.mxu0 %v2248_v61  ;;  %2300 = vmatprep.mubr.bf16.mxu0 %v15643_v2  ;;  %v2488_v4 = vpop.permute.xlu1 %2487 }
 0x10a   : > { %13338 = vmatprep.subr.msk.bf16.mxu0 %vm277_vm1, %v2243_v0  ;;  %4532 = vrot.lane.b32.xlu0 %v4253_v42, %s15116_s19  ;;  %v2496_v35 = vsel %vm18212_vm11, %v2486_v1, %v2488_v4 }
 0x10b   : > { %4534 = vrot.lane.b32.xlu1 %v4252_v45, %s15116_s19  ;;  %v2514_v40 = vsel %vm277_vm1, %v2496_v35, 0 }
 0x10c   : > { %13893 = vmatmul.mubr.msk.bf16.vlgmr.msra.gmra.mrb[4].mxu1 %vm273_vm2, %v13325_v52  ;;  %v15652_v9 = vpop.permute.xlu0 %2489  ;;  %v5005_v52 = vld [vmem:[%s15177_s20 + $0xc] sm:$0x3f] }
 0x10d   : > { %2310 = vmatpush1.bf16.msra.mxu1 %v2254_v7  ;;  %2341 = vmatprep.mubr.bf16.mxu1 %v15643_v2  ;;  %v15658_v12 = vpop.permute.xlu1 %2731  ;;  %v2497_v31 = vsel %vm18212_vm11, %v2488_v4, %v15652_v9  ;;  %v2520_v46 = vsel %vm277_vm1, %v15652_v9, 0  ;;  %v5032_v57 = vrot.slane %v5005_v52, %v15166_v5  ;;  %v5025_v59 = vcombine.high %v5005_v52, %v5005_v52 }
 0x10e   : > { %13896 = vmatprep.subr.bf16.mxu1 %v15107_v62  ;;  %4536 = vrot.lane.b32.xlu0 %v4254_v49, %s15116_s19 }
 0x10f   : > { %4538 = vrot.lane.b32.xlu1 %v15419_v10, %s15116_s19  ;;  %v2495_v10 = vsel %vm18212_vm11, %v2484_v6, %v2486_v1  ;;  %v5040_v6 = vcombine.high %v5032_v57, %v5032_v57  ;;  %v5039_v4 = vrot.slane %v5025_v59, %v15166_v5 }
 0x110   : > { %13335 = vmatmul.mubr.msk.bf16.vlgmr.msra.gmra.mrb[0].mxu0 %vm273_vm2, %v13333_v11  ;;  %v15667_v15 = vpop.permute.xlu0 %2733 }
 0x111   : > { %2351 = vmatpush1.bf16.msra.mxu0 %v2260_v13  ;;  %2382 = vmatprep.mubr.bf16.mxu0 %v15643_v2  ;;  %v15671_v18 = vpop.permute.xlu1 %2735  ;;  %v2746_v47 = vsel %vm18211_vm12, %v15658_v12, %v15667_v15 }
 0x112   : > { %13342 = vmatprep.subr.msk.bf16.mxu0 %vm277_vm1, %v2493_v14  ;;  %4540 = vrot.lane.b32.xlu0 %v15433_v17, %s15116_s19  ;;  %v2747_v42 = vsel %vm18211_vm12, %v15667_v15, %v15671_v18  ;;  %v2756_v51 = vsel %vm277_vm1, %v2746_v47, 0  ;;  %v5259_v15 = vld [vmem:[%s15177_s20 + $0xc] sm:$0x3f] }
 0x113   : > { %4542 = vrot.lane.b32.xlu1 %v15440_v21, %s15116_s19  ;;  %v15697_v21 = vcombine.high %v15682_v26, %v15682_v26  ;;  %v5279_v27 = vcombine.high %v5259_v15, %v5259_v15 }
 0x114   : > { %13337 = vmatmul.mubr.msk.bf16.vlgmr.msra.gmra.mrb[0].mxu1 %vm273_vm2, %v13333_v11  ;;  %v15685_v28 = vpop.permute.xlu0 %2737 }
 0x115   : > { %13897 = vmatpush3.bf16.msra.mxu1 %v2266_v19  ;;  %13898 = vmatprep.mubr.msk.bf16.mxu1 %vm15108_vm3, %v15107_v62  ;;  %v15689_v17 = vpop.permute.xlu1 %2739  ;;  %v2748_v53 = vsel %vm18211_vm12, %v15671_v18, %v15685_v28 }
 0x116   : > { %13344 = vmatprep.subr.msk.bf16.mxu1 %vm277_vm1, %v2495_v10  ;;  %4544 = vrot.lane.b32.xlu0 %v15453_v30, %s15116_s19  ;;  %v4751_v30 = vld [vmem:[%s15177_s20 + $0xc] sm:$0x3f]  ;;  %v2749_v48 = vsel %vm18211_vm12, %v15685_v28, %v15689_v17  ;;  %v2762_v58 = vsel %vm277_vm1, %v2748_v53, 0  ;;  %v5286_v10 = vrot.slane %v5259_v15, %v15166_v5 }
 0x117   : > { %4787 = vrot.lane.b32.xlu1 %v15682_v26, %s15117_s10  ;;  %v4778_v25 = vrot.slane %v4751_v30, %v15166_v5  ;;  %v4771_v36 = vcombine.high %v4751_v30, %v4751_v30 }
 0x118   : > { %13339 = vmatmul.mubr.msk.bf16.vlgmr.msra.gmra.mrb[4].mxu0 %vm273_vm2, %v13333_v11  ;;  %v2742_v23 = vpop.permute.xlu0 %2741  ;;  %v5294_v29 = vcombine.high %v5286_v10, %v5286_v10 }
 0x119   : > { %2523 = vmatpush1.bf16.msra.mxu0 %v2502_v20  ;;  %2554 = vmatprep.mubr.bf16.mxu0 %v15643_v2  ;;  %v15710_v32 = vpop.permute.xlu1 %2743  ;;  %v4786_v41 = vcombine.high %v4778_v25, %v4778_v25  ;;  %v4785_v43 = vrot.slane %v4771_v36, %v15166_v5  ;;  %v2750_v60 = vsel %vm18211_vm12, %v15689_v17, %v2742_v23 }
 0x11a   : > { %13346 = vmatprep.subr.msk.bf16.mxu0 %vm277_vm1, %v2497_v31  ;;  %4789 = vrot.lane.b32.xlu0 %v15697_v21, %s15117_s10  ;;  %v2751_v54 = vsel %vm18211_vm12, %v2742_v23, %v15710_v32  ;;  %v2768_v1 = vsel %vm277_vm1, %v2750_v60, 0  ;;  %v5293_v23 = vrot.slane %v5279_v27, %v15166_v5  ;;  %vm205_vm12 = vcmask 850948  }
 0x11b   : > { %4791 = vrot.lane.b32.xlu1 %v15705_v22, %s15117_s10 }
 0x11c   : > { %13899 = vmatmul.mubr.msk.bf16.vlgmr.msra.gmra.mrb[4].mxu1 %vm273_vm2, %v13333_v11  ;;  %v15725_v37 = vpop.permute.xlu0 %2985  ;;  %v2774_v11 = vsel %vm277_vm1, %v15710_v32, 0  ;;  %v13357_v32 = vld [vmem:[%s18184_s2 + $0x2c] sm:$0xf] }
 0x11d   : > { %2564 = vmatpush1.bf16.msra.mxu1 %v2508_v33  ;;  %2595 = vmatprep.mubr.bf16.mxu1 %v15643_v2  ;;  %v15731_v39 = vpop.permute.xlu1 %2987 }
 0x11e   : > { %13902 = vmatprep.subr.bf16.mxu1 %v15107_v62  ;;  %4793 = vrot.lane.b32.xlu0 %v15718_v34, %s15117_s10  ;;  %v3000_v12 = vsel %vm18210_vm13, %v15725_v37, %v15731_v39 }
 0x11f   : > { %4795 = vrot.lane.b32.xlu1 %v4778_v25, %s15117_s10  ;;  %v3010_v18 = vsel %vm277_vm1, %v3000_v12, 0 }
 0x120   : > { %13343 = vmatmul.mubr.msk.bf16.vlgmr.msra.gmra.mrb[0].mxu0 %vm273_vm2, %v13341_v38  ;;  %v15743_v44 = vpop.permute.xlu0 %2989 }
 0x121   : > { %2605 = vmatpush1.bf16.msra.mxu0 %v2514_v40  ;;  %2636 = vmatprep.mubr.bf16.mxu0 %v15643_v2  ;;  %v15746_v45 = vpop.permute.xlu1 %2991  ;;  %v3001_v7 = vsel %vm18210_vm13, %v15731_v39, %v15743_v44  ;;  %v5513_v39 = vld [vmem:[%s15177_s20 + $0xc] sm:$0x3f] }
 0x122   : > { %13350 = vmatprep.subr.msk.bf16.mxu0 %vm277_vm1, %v2747_v42  ;;  %4797 = vrot.lane.b32.xlu0 %v4786_v41, %s15117_s10  ;;  %v3002_v19 = vsel %vm18210_vm13, %v15743_v44, %v15746_v45  ;;  %v5540_v44 = vrot.slane %v5513_v39, %v15166_v5 }
 0x123   : > { %4799 = vrot.lane.b32.xlu1 %v4785_v43, %s15117_s10  ;;  %v3016_v20 = vsel %vm277_vm1, %v3002_v19, 0 }
 0x124   : > { %13345 = vmatmul.mubr.msk.bf16.vlgmr.msra.gmra.mrb[0].mxu1 %vm273_vm2, %v13341_v38  ;;  %v15760_v49 = vpop.permute.xlu0 %2993 }
 0x125   : > { %13903 = vmatpush3.bf16.msra.mxu1 %v2520_v46  ;;  %13904 = vmatprep.mubr.msk.bf16.mxu1 %vm15108_vm3, %v15107_v62  ;;  %v15764_v50 = vpop.permute.xlu1 %2995  ;;  %v3003_v13 = vsel %vm18210_vm13, %v15746_v45, %v15760_v49  ;;  %v5533_v46 = vcombine.high %v5513_v39, %v5513_v39 }
 0x126   : > { %13352 = vmatprep.subr.msk.bf16.mxu1 %vm277_vm1, %v2749_v48  ;;  %5041 = vrot.lane.b32.xlu0 %v15682_v26, %s15118_s18  ;;  %v3004_v31 = vsel %vm18210_vm13, %v15760_v49, %v15764_v50  ;;  %v5548_v49 = vcombine.high %v5540_v44, %v5540_v44 }
 0x127   : > { %5043 = vrot.lane.b32.xlu1 %v15697_v21, %s15118_s18  ;;  %v3022_v35 = vsel %vm277_vm1, %v3004_v31, 0  ;;  %v5547_v53 = vrot.slane %v5533_v46, %v15166_v5 }
 0x128   : > { %13347 = vmatmul.mubr.msk.bf16.vlgmr.msra.gmra.mrb[4].mxu0 %vm273_vm2, %v13341_v38  ;;  %v15779_v55 = vpop.permute.xlu0 %2997 }
 0x129   : > { %2777 = vmatpush1.bf16.msra.mxu0 %v2756_v51  ;;  %2808 = vmatprep.mubr.bf16.mxu0 %v15643_v2  ;;  %v15782_v56 = vpop.permute.xlu1 %3240  ;;  %v3005_v24 = vsel %vm18210_vm13, %v15764_v50, %v15779_v55  ;;  %vm204_vm13 = vcmask 1043456  }
 0x12a   : > { %13354 = vmatprep.subr.msk.bf16.mxu0 %vm277_vm1, %v2751_v54  ;;  %5045 = vrot.lane.b32.xlu0 %v15705_v22, %s15118_s18  ;;  %vm206_vm7 = vmor %vm205_vm12, %vm204_vm13 }
 0x12b   : > { %5047 = vrot.lane.b32.xlu1 %v15718_v34, %s15118_s18 }
 0x12c   : > { %13905 = vmatmul.mubr.msk.bf16.vlgmr.msra.gmra.mrb[4].mxu1 %vm273_vm2, %v13341_v38  ;;  %v15794_v61 = vpop.permute.xlu0 %3242  ;;  %v3028_v38 = vsel %vm277_vm1, %v15779_v55, 0 }
 0x12d   : > { %2818 = vmatpush1.bf16.msra.mxu1 %v2762_v58  ;;  %2849 = vmatprep.mubr.bf16.mxu1 %v15643_v2  ;;  %v15800_v0 = vpop.permute.xlu1 %3244  ;;  %v3257_v40 = vsel %vm18187_vm14, %v15782_v56, %v15794_v61  ;;  %v13365_v56 = vld [vmem:[%s18184_s2 + $0x30] sm:$0xf] }
 0x12e   : > { %13908 = vmatprep.subr.bf16.mxu1 %v15107_v62  ;;  %5049 = vrot.lane.b32.xlu0 %v5032_v57, %s15118_s18  ;;  %v3258_v25 = vsel %vm18187_vm14, %v15794_v61, %v15800_v0  ;;  %v3268_v45 = vsel %vm277_vm1, %v3257_v40, 0  ;;  %v5767_v61 = vld [vmem:[%s15177_s20 + $0xc] sm:$0x3f] }
 0x12f   : > { %5051 = vrot.lane.b32.xlu1 %v5040_v6, %s15118_s18 }
 0x130   : > { %13351 = vmatmul.mubr.msk.bf16.vlgmr.msra.gmra.mrb[0].mxu0 %vm273_vm2, %v13349_v63  ;;  %v15811_v8 = vpop.permute.xlu0 %3246 }
 0x131   : > { %2859 = vmatpush1.bf16.msra.mxu0 %v2768_v1  ;;  %2890 = vmatprep.mubr.bf16.mxu0 %v15643_v2  ;;  %v15814_v9 = vpop.permute.xlu1 %3248  ;;  %v3259_v47 = vsel %vm18187_vm14, %v15800_v0, %v15811_v8 }
 0x132   : > { %13358 = vmatprep.subr.msk.bf16.mxu0 %vm277_vm1, %v3001_v7  ;;  %5053 = vrot.lane.b32.xlu0 %v5039_v4, %s15118_s18  ;;  %v3260_v41 = vsel %vm18187_vm14, %v15811_v8, %v15814_v9  ;;  %v3274_v52 = vsel %vm277_vm1, %v3259_v47, 0  ;;  %v5794_v7 = vrot.slane %v5767_v61, %v15166_v5  ;;  %v5787_v8 = vcombine.high %v5767_v61, %v5767_v61 }
 0x133   : > { %5295 = vrot.lane.b32.xlu1 %v15682_v26, %s18190_s11 }
 0x134   : > { %13353 = vmatmul.mubr.msk.bf16.vlgmr.msra.gmra.mrb[0].mxu1 %vm273_vm2, %v13349_v63  ;;  %v15829_v14 = vpop.permute.xlu0 %3250 }
 0x135   : > { %13909 = vmatpush3.bf16.msra.mxu1 %v2774_v11  ;;  %13910 = vmatprep.mubr.msk.bf16.mxu1 %vm15108_vm3, %v15107_v62  ;;  %v15834_v16 = vpop.permute.xlu1 %3252  ;;  %v3261_v54 = vsel %vm18187_vm14, %v15814_v9, %v15829_v14 }
 0x136   : > { %13360 = vmatprep.subr.msk.bf16.mxu1 %vm277_vm1, %v3003_v13  ;;  %5297 = vrot.lane.b32.xlu0 %v15697_v21, %s18190_s11  ;;  %v3262_v48 = vsel %vm18187_vm14, %v15829_v14, %v15834_v16  ;;  %v3280_v58 = vsel %vm277_vm1, %v3261_v54, 0  ;;  %v5802_v13 = vcombine.high %v5794_v7, %v5794_v7 }
 0x137   : > { %5299 = vrot.lane.b32.xlu1 %v15705_v22, %s18190_s11 }
 0x138   : > { %13355 = vmatmul.mubr.msk.bf16.vlgmr.msra.gmra.mrb[4].mxu0 %vm273_vm2, %v13349_v63  ;;  %v15850_v28 = vpop.permute.xlu0 %3254 }
 0x139   : > { %3031 = vmatpush1.bf16.msra.mxu0 %v3010_v18  ;;  %3062 = vmatprep.mubr.bf16.mxu0 %v15643_v2  ;;  %v15853_v17 = vpop.permute.xlu1 %3498  ;;  %v3263_v59 = vsel %vm18187_vm14, %v15834_v16, %v15850_v28  ;;  %v5801_v16 = vrot.slane %v5787_v8, %v15166_v5  ;;  %vm18195_vm14 = vcmask 220160   ;;  %v13373_v28 = vld [vmem:[%s18184_s2 + $0x34] sm:$0xf] }
 0x13a   : > { %13362 = vmatprep.subr.msk.bf16.mxu0 %vm277_vm1, %v3005_v24  ;;  %5301 = vrot.lane.b32.xlu0 %v15718_v34, %s18190_s11  ;;  %v3286_v0 = vsel %vm277_vm1, %v3263_v59, 0 }
 0x13b   : > { %5303 = vrot.lane.b32.xlu1 %v5286_v10, %s18190_s11 }
 0x13c   : > { %13911 = vmatmul.mubr.msk.bf16.vlgmr.msra.gmra.mrb[4].mxu1 %vm273_vm2, %v13349_v63  ;;  %v15865_v30 = vpop.permute.xlu0 %3500 }
 0x13d   : > { %3072 = vmatpush1.bf16.msra.mxu1 %v3016_v20  ;;  %3103 = vmatprep.mubr.bf16.mxu1 %v15643_v2  ;;  %v15871_v33 = vpop.permute.xlu1 %3502  ;;  %v3515_v1 = vsel %vm18192_vm15, %v15853_v17, %v15865_v30 }
 0x13e   : > { %13914 = vmatprep.subr.bf16.mxu1 %v15107_v62  ;;  %5305 = vrot.lane.b32.xlu0 %v5294_v29, %s18190_s11  ;;  %v3516_v60 = vsel %vm18192_vm15, %v15865_v30, %v15871_v33  ;;  %v3526_v12 = vsel %vm277_vm1, %v3515_v1, 0  ;;  %v6021_v29 = vld [vmem:[%s15177_s20 + $0xc] sm:$0x3f] }
 0x13f   : > { %5307 = vrot.lane.b32.xlu1 %v5293_v23, %s18190_s11  ;;  %s15122_s11 = smov 55  }
 0x140   : > { %13359 = vmatmul.mubr.msk.bf16.vlgmr.msra.gmra.mrb[0].mxu0 %vm273_vm2, %v13357_v32  ;;  %v15881_v36 = vpop.permute.xlu0 %3504 }
 0x141   : > { %3113 = vmatpush1.bf16.msra.mxu0 %v3022_v35  ;;  %3144 = vmatprep.mubr.bf16.mxu0 %v15643_v2  ;;  %v15884_v37 = vpop.permute.xlu1 %3506  ;;  %v3517_v14 = vsel %vm18192_vm15, %v15871_v33, %v15881_v36  ;;  %v6048_v33 = vrot.slane %v6021_v29, %v15166_v5 }
 0x142   : > { %13366 = vmatprep.subr.msk.bf16.mxu0 %vm277_vm1, %v3258_v25  ;;  %5549 = vrot.lane.b32.xlu0 %v15682_v26, %s18188_s7  ;;  %v3518_v4 = vsel %vm18192_vm15, %v15881_v36, %v15884_v37  ;;  %v3532_v24 = vsel %vm277_vm1, %v3517_v14, 0  ;;  %v6041_v25 = vcombine.high %v6021_v29, %v6021_v29  ;;  %v6529_v14 = vld [vmem:[%s15177_s20 + $0xc] sm:$0x3f] }
 0x143   : > { %5551 = vrot.lane.b32.xlu1 %v15697_v21, %s18188_s7 }
 0x144   : > { %13361 = vmatmul.mubr.msk.bf16.vlgmr.msra.gmra.mrb[0].mxu1 %vm273_vm2, %v13357_v32  ;;  %v15901_v42 = vpop.permute.xlu0 %3508 }
 0x145   : > { %13915 = vmatpush3.bf16.msra.mxu1 %v3028_v38  ;;  %13916 = vmatprep.mubr.msk.bf16.mxu1 %vm15108_vm3, %v15107_v62  ;;  %v15905_v43 = vpop.permute.xlu1 %3510  ;;  %v3519_v10 = vsel %vm18192_vm15, %v15884_v37, %v15901_v42  ;;  %v6056_v38 = vcombine.high %v6048_v33, %v6048_v33 }
 0x146   : > { %13368 = vmatprep.subr.msk.bf16.mxu1 %vm277_vm1, %v3260_v41  ;;  %5553 = vrot.lane.b32.xlu0 %v15705_v22, %s18188_s7  ;;  %v3520_v15 = vsel %vm18192_vm15, %v15901_v42, %v15905_v43  ;;  %v3538_v20 = vsel %vm277_vm1, %v3519_v10, 0  ;;  %v6055_v42 = vrot.slane %v6041_v25, %v15166_v5 }
 0x147   : > { %5555 = vrot.lane.b32.xlu1 %v15718_v34, %s18188_s7 }
 0x148   : > { %13363 = vmatmul.mubr.msk.bf16.vlgmr.msra.gmra.mrb[4].mxu0 %vm273_vm2, %v13357_v32  ;;  %v15921_v50 = vpop.permute.xlu0 %3512 }
 0x149   : > { %3289 = vmatpush1.bf16.msra.mxu0 %v3268_v45  ;;  %3320 = vmatprep.mubr.bf16.mxu0 %v15643_v2  ;;  %v15924_v51 = vpop.permute.xlu1 %3756  ;;  %v3521_v31 = vsel %vm18192_vm15, %v15905_v43, %v15921_v50  ;;  %vm18198_vm15 = vcmask 154624   ;;  %v6275_v50 = vld [vmem:[%s15177_s20 + $0xc] sm:$0x3f] }
 0x14a   : > { %13370 = vmatprep.subr.msk.bf16.mxu0 %vm277_vm1, %v3262_v48  ;;  %5557 = vrot.lane.b32.xlu0 %v5540_v44, %s18188_s7  ;;  %v3544_v35 = vsel %vm277_vm1, %v3521_v31, 0 }
 0x14b   : > { %5559 = vrot.lane.b32.xlu1 %v5548_v49, %s18188_s7 }
 0x14c   : > { %13917 = vmatmul.mubr.msk.bf16.vlgmr.msra.gmra.mrb[4].mxu1 %vm273_vm2, %v13357_v32  ;;  %v15935_v55 = vpop.permute.xlu0 %3758 }
 0x14d   : > { %3330 = vmatpush1.bf16.msra.mxu1 %v3274_v52  ;;  %3361 = vmatprep.mubr.bf16.mxu1 %v15643_v2  ;;  %v15941_v57 = vpop.permute.xlu1 %3760  ;;  %v3773_v36 = vsel %vm18195_vm14, %v15924_v51, %v15935_v55  ;;  %v13381_v51 = vld [vmem:[%s18184_s2 + $0x38] sm:$0xf] }
 0x14e   : > { %13920 = vmatprep.subr.bf16.mxu1 %v15107_v62  ;;  %5561 = vrot.lane.b32.xlu0 %v5547_v53, %s18188_s7  ;;  %v3774_v23 = vsel %vm18195_vm14, %v15935_v55, %v15941_v57  ;;  %v3784_v41 = vsel %vm277_vm1, %v3773_v36, 0  ;;  %s18196_s7 = smov 47  }
 0x14f   : > { %5803 = vrot.lane.b32.xlu1 %v15682_v26, %s18193_s14 }
 0x150   : > { %13367 = vmatmul.mubr.msk.bf16.vlgmr.msra.gmra.mrb[0].mxu0 %vm273_vm2, %v13365_v56  ;;  %v15955_v6 = vpop.permute.xlu0 %3762 }
 0x151   : > { %3371 = vmatpush1.bf16.msra.mxu0 %v3280_v58  ;;  %3402 = vmatprep.mubr.bf16.mxu0 %v15643_v2  ;;  %v15959_v63 = vpop.permute.xlu1 %3764  ;;  %v3775_v43 = vsel %vm18195_vm14, %v15941_v57, %v15955_v6  ;;  %v6295_v57 = vcombine.high %v6275_v50, %v6275_v50 }
 0x152   : > { %13374 = vmatprep.subr.msk.bf16.mxu0 %vm277_vm1, %v3516_v60  ;;  %5805 = vrot.lane.b32.xlu0 %v15697_v21, %s18193_s14  ;;  %v3776_v37 = vsel %vm18195_vm14, %v15955_v6, %v15959_v63  ;;  %v3790_v47 = vsel %vm277_vm1, %v3775_v43, 0 }
 0x153   : > { %5807 = vrot.lane.b32.xlu1 %v15705_v22, %s18193_s14 }
 0x154   : > { %13369 = vmatmul.mubr.msk.bf16.vlgmr.msra.gmra.mrb[0].mxu1 %vm273_vm2, %v13365_v56  ;;  %v15975_v9 = vpop.permute.xlu0 %3766 }
 0x155   : > { %13921 = vmatpush3.bf16.msra.mxu1 %v3286_v0  ;;  %13922 = vmatprep.mubr.msk.bf16.mxu1 %vm15108_vm3, %v15107_v62  ;;  %v15979_v11 = vpop.permute.xlu1 %3768  ;;  %v3777_v48 = vsel %vm18195_vm14, %v15959_v63, %v15975_v9  ;;  %v6309_v0 = vrot.slane %v6295_v57, %v15166_v5 }
 0x156   : > { %13376 = vmatprep.subr.msk.bf16.mxu1 %vm277_vm1, %v3518_v4  ;;  %5809 = vrot.lane.b32.xlu0 %v15718_v34, %s18193_s14  ;;  %v3778_v44 = vsel %vm18195_vm14, %v15975_v9, %v15979_v11  ;;  %v3796_v53 = vsel %vm277_vm1, %v3777_v48, 0 }
 0x157   : > { %5811 = vrot.lane.b32.xlu1 %v5794_v7, %s18193_s14 }
 0x158   : > { %13371 = vmatmul.mubr.msk.bf16.vlgmr.msra.gmra.mrb[4].mxu0 %vm273_vm2, %v13365_v56  ;;  %v15994_v18 = vpop.permute.xlu0 %3770 }
 0x159   : > { %3547 = vmatpush1.bf16.msra.mxu0 %v3526_v12  ;;  %3578 = vmatprep.mubr.bf16.mxu0 %v15643_v2  ;;  %v15997_v19 = vpop.permute.xlu1 %4014  ;;  %v3779_v54 = vsel %vm18195_vm14, %v15979_v11, %v15994_v18  ;;  %vm18199_vm14 = vcmask 146432   ;;  %v13389_v18 = vld [vmem:[%s18184_s2 + $0x3c] sm:$0xf] }
 0x15a   : > { %13378 = vmatprep.subr.msk.bf16.mxu0 %vm277_vm1, %v3520_v15  ;;  %5813 = vrot.lane.b32.xlu0 %v5802_v13, %s18193_s14  ;;  %v3802_v60 = vsel %vm277_vm1, %v3779_v54, 0 }
 0x15b   : > { %5815 = vrot.lane.b32.xlu1 %v5801_v16, %s18193_s14  ;;  %s15124_s14 = smov 46  }
 0x15c   : > { %13923 = vmatmul.mubr.msk.bf16.vlgmr.msra.gmra.mrb[4].mxu1 %vm273_vm2, %v13365_v56  ;;  %v16007_v27 = vpop.permute.xlu0 %4016  ;;  %v6302_v56 = vrot.slane %v6275_v50, %v15166_v5 }
 0x15d   : > { %3588 = vmatpush1.bf16.msra.mxu1 %v3532_v24  ;;  %3619 = vmatprep.mubr.bf16.mxu1 %v15643_v2  ;;  %v16013_v17 = vpop.permute.xlu1 %4018  ;;  %v4031_v61 = vsel %vm18198_vm15, %v15997_v19, %v16007_v27  ;;  %v6556_v24 = vrot.slane %v6529_v14, %v15166_v5 }
 0x15e   : > { %13926 = vmatprep.subr.bf16.mxu1 %v15107_v62  ;;  %6057 = vrot.lane.b32.xlu0 %v15682_v26, %s15122_s11  ;;  %v4032_v55 = vsel %vm18198_vm15, %v16007_v27, %v16013_v17  ;;  %v6310_v6 = vcombine.high %v6302_v56, %v6302_v56  ;;  %v4042_v7 = vsel %vm277_vm1, %v4031_v61, 0  ;;  %v6549_v27 = vcombine.high %v6529_v14, %v6529_v14 }
 0x15f   : > { %6059 = vrot.lane.b32.xlu1 %v15697_v21, %s15122_s11 }
 0x160   : > { %13375 = vmatmul.mubr.msk.bf16.vlgmr.msra.gmra.mrb[0].mxu0 %vm273_vm2, %v13373_v28  ;;  %v16029_v30 = vpop.permute.xlu0 %4020 }
 0x161   : > { %3629 = vmatpush1.bf16.msra.mxu0 %v3538_v20  ;;  %3660 = vmatprep.mubr.bf16.mxu0 %v15643_v2  ;;  %v16032_v32 = vpop.permute.xlu1 %4022  ;;  %v4033_v8 = vsel %vm18198_vm15, %v16013_v17, %v16029_v30  ;;  %v6564_v20 = vcombine.high %v6556_v24, %v6556_v24 }
 0x162   : > { %13382 = vmatprep.subr.msk.bf16.mxu0 %vm277_vm1, %v3774_v23  ;;  %6061 = vrot.lane.b32.xlu0 %v15705_v22, %s15122_s11  ;;  %v4034_v63 = vsel %vm18198_vm15, %v16029_v30, %v16032_v32  ;;  %v4048_v13 = vsel %vm277_vm1, %v4033_v8, 0  ;;  %v6563_v30 = vrot.slane %v6549_v27, %v15166_v5 }
 0x163   : > { %6063 = vrot.lane.b32.xlu1 %v15718_v34, %s15122_s11 }
 0x164   : > { %13377 = vmatmul.mubr.msk.bf16.vlgmr.msra.gmra.mrb[0].mxu1 %vm273_vm2, %v13373_v28  ;;  %v16048_v39 = vpop.permute.xlu0 %4024 }
 0x165   : > { %13927 = vmatpush3.bf16.msra.mxu1 %v3544_v35  ;;  %13928 = vmatprep.mubr.msk.bf16.mxu1 %vm15108_vm3, %v15107_v62  ;;  %v16052_v40 = vpop.permute.xlu1 %4026  ;;  %v4035_v15 = vsel %vm18198_vm15, %v16032_v32, %v16048_v39 }
 0x166   : > { %13384 = vmatprep.subr.msk.bf16.mxu1 %vm277_vm1, %v3776_v37  ;;  %6065 = vrot.lane.b32.xlu0 %v6048_v33, %s15122_s11  ;;  %v4036_v9 = vsel %vm18198_vm15, %v16048_v39, %v16052_v40  ;;  %v4054_v10 = vsel %vm277_vm1, %v4035_v15, 0 }
 0x167   : > { %6067 = vrot.lane.b32.xlu1 %v6056_v38, %s15122_s11 }
 0x168   : > { %13379 = vmatmul.mubr.msk.bf16.vlgmr.msra.gmra.mrb[4].mxu0 %vm273_vm2, %v13373_v28  ;;  %v16066_v45 = vpop.permute.xlu0 %4028 }
 0x169   : > { %3805 = vmatpush1.bf16.msra.mxu0 %v3784_v41  ;;  %3836 = vmatprep.mubr.bf16.mxu0 %v15643_v2  ;;  %v16069_v46 = vpop.permute.xlu1 %4272 }
 0x16a   : > { %13386 = vmatprep.subr.msk.bf16.mxu0 %vm277_vm1, %v3778_v44  ;;  %6069 = vrot.lane.b32.xlu0 %v6055_v42, %s15122_s11 }
 0x16b   : > { %6311 = vrot.lane.b32.xlu1 %v15682_v26, %s18196_s7 }
 0x16c   : > { %13929 = vmatmul.mubr.msk.bf16.vlgmr.msra.gmra.mrb[4].mxu1 %vm273_vm2, %v13373_v28  ;;  %v16080_v49 = vpop.permute.xlu0 %4274  ;;  %v4037_v28 = vsel %vm18198_vm15, %v16052_v40, %v16066_v45  ;;  %v6783_v40 = vld [vmem:[%s15177_s20 + $0xc] sm:$0x3f]  ;;  %vm18200_vm15 = vcmask 138240   ;;  %s15126_s20 = smov 100  }
 0x16d   : > { %3846 = vmatpush1.bf16.msra.mxu1 %v3790_v47  ;;  %3877 = vmatprep.mubr.bf16.mxu1 %v15643_v2  ;;  %v16087_v52 = vpop.permute.xlu1 %4276  ;;  %v4060_v23 = vsel %vm277_vm1, %v4037_v28, 0  ;;  %v4289_v32 = vsel %vm18199_vm14, %v16069_v46, %v16080_v49  ;;  %v6810_v43 = vrot.slane %v6783_v40, %v15166_v5  ;;  %v6803_v44 = vcombine.high %v6783_v40, %v6783_v40  ;;  %v13397_v46 = vld [vmem:[%s18184_s2 + $0x40] sm:$0xf] }
 0x16e   : > { %13932 = vmatprep.subr.bf16.mxu1 %v15107_v62  ;;  %6313 = vrot.lane.b32.xlu0 %v15697_v21, %s18196_s7  ;;  %v4290_v17 = vsel %vm18199_vm14, %v16080_v49, %v16087_v52  ;;  %v4300_v36 = vsel %vm277_vm1, %v4289_v32, 0 }
 0x16f   : > { %6315 = vrot.lane.b32.xlu1 %v15705_v22, %s18196_s7  ;;  %v6817_v50 = vrot.slane %v6803_v44, %v15166_v5 }
 0x170   : > { %13383 = vmatmul.mubr.msk.bf16.vlgmr.msra.gmra.mrb[0].mxu0 %vm273_vm2, %v13381_v51  ;;  %v16103_v58 = vpop.permute.xlu0 %4278 }
 0x171   : > { %3887 = vmatpush1.bf16.msra.mxu0 %v3796_v53  ;;  %3918 = vmatprep.mubr.bf16.mxu0 %v15643_v2  ;;  %v16106_v59 = vpop.permute.xlu1 %4280  ;;  %v4291_v37 = vsel %vm18199_vm14, %v16087_v52, %v16103_v58 }
 0x172   : > { %13390 = vmatprep.subr.msk.bf16.mxu0 %vm277_vm1, %v4032_v55  ;;  %6317 = vrot.lane.b32.xlu0 %v15718_v34, %s18196_s7  ;;  %v4292_v33 = vsel %vm18199_vm14, %v16103_v58, %v16106_v59  ;;  %v4306_v42 = vsel %vm277_vm1, %v4291_v37, 0 }
 0x173   : > { %6319 = vrot.lane.b32.xlu1 %v6302_v56, %s18196_s7 }
 0x174   : > { %13385 = vmatmul.mubr.msk.bf16.vlgmr.msra.gmra.mrb[0].mxu1 %vm273_vm2, %v13381_v51  ;;  %v16121_v1 = vpop.permute.xlu0 %4282 }
 0x175   : > { %13933 = vmatpush3.bf16.msra.mxu1 %v3802_v60  ;;  %13934 = vmatprep.mubr.msk.bf16.mxu1 %vm15108_vm3, %v15107_v62  ;;  %v16125_v4 = vpop.permute.xlu1 %4284 }
 0x176   : > { %13392 = vmatprep.subr.msk.bf16.mxu1 %vm277_vm1, %v4034_v63  ;;  %6321 = vrot.lane.b32.xlu0 %v6310_v6, %s18196_s7  ;;  %v4294_v38 = vsel %vm18199_vm14, %v16121_v1, %v16125_v4 }
 0x177   : > { %6323 = vrot.lane.b32.xlu1 %v6309_v0, %s18196_s7  ;;  %s15125_s7 = smov 45   ;;  %v13405_v0 = vld [vmem:[%s18184_s2 + $0x44] sm:$0xf] }
 0x178   : > { %13387 = vmatmul.mubr.msk.bf16.vlgmr.msra.gmra.mrb[4].mxu0 %vm273_vm2, %v13381_v51  ;;  %v16138_v11 = vpop.permute.xlu0 %4286 }
 0x179   : > { %4063 = vmatpush1.bf16.msra.mxu0 %v4042_v7  ;;  %4094 = vmatprep.mubr.bf16.mxu0 %v15643_v2  ;;  %v16141_v12 = vpop.permute.xlu1 %4530  ;;  %v4295_v48 = vsel %vm18199_vm14, %v16125_v4, %v16138_v11 }
 0x17a   : > { %13394 = vmatprep.subr.msk.bf16.mxu0 %vm277_vm1, %v4036_v9  ;;  %6565 = vrot.lane.b32.xlu0 %v15682_v26, %s15124_s14  ;;  %v4318_v52 = vsel %vm277_vm1, %v4295_v48, 0 }
 0x17b   : > { %6567 = vrot.lane.b32.xlu1 %v15697_v21, %s15124_s14 }
 0x17c   : > { %13935 = vmatmul.mubr.msk.bf16.vlgmr.msra.gmra.mrb[4].mxu1 %vm273_vm2, %v13381_v51  ;;  %v16154_v16 = vpop.permute.xlu0 %4532 }
 0x17d   : > { %4104 = vmatpush1.bf16.msra.mxu1 %v4048_v13  ;;  %4135 = vmatprep.mubr.bf16.mxu1 %v15643_v2  ;;  %v16160_v19 = vpop.permute.xlu1 %4534  ;;  %v4547_v53 = vsel %vm18200_vm15, %v16141_v12, %v16154_v16 }
 0x17e   : > { %13938 = vmatprep.subr.bf16.mxu1 %v15107_v62  ;;  %6569 = vrot.lane.b32.xlu0 %v15705_v22, %s15124_s14  ;;  %v4548_v49 = vsel %vm18200_vm15, %v16154_v16, %v16160_v19  ;;  %v4558_v56 = vsel %vm277_vm1, %v4547_v53, 0 }
 0x17f   : > { %6571 = vrot.lane.b32.xlu1 %v15718_v34, %s15124_s14 }
 0x180   : > { %13391 = vmatmul.mubr.msk.bf16.vlgmr.msra.gmra.mrb[0].mxu0 %vm273_vm2, %v13389_v18  ;;  %v16176_v29 = vpop.permute.xlu0 %4536 }
 0x181   : > { %4145 = vmatpush1.bf16.msra.mxu0 %v4054_v10  ;;  %4176 = vmatprep.mubr.bf16.mxu0 %v15643_v2  ;;  %v16179_v31 = vpop.permute.xlu1 %4538  ;;  %v4549_v57 = vsel %vm18200_vm15, %v16160_v19, %v16176_v29 }
 0x182   : > { %13398 = vmatprep.subr.msk.bf16.mxu0 %vm277_vm1, %v4290_v17  ;;  %6573 = vrot.lane.b32.xlu0 %v6556_v24, %s15124_s14  ;;  %v4550_v5 = vsel %vm18200_vm15, %v16176_v29, %v16179_v31  ;;  %v4564_v6 = vsel %vm277_vm1, %v4549_v57, 0  ;;  %v13413_v29 = vld [vmem:[%s18184_s2 + $0x48] sm:$0xf] }
 0x183   : > { %6575 = vrot.lane.b32.xlu1 %v6564_v20, %s15124_s14 }
 0x184   : > { %13393 = vmatmul.mubr.msk.bf16.vlgmr.msra.gmra.mrb[0].mxu1 %vm273_vm2, %v13389_v18  ;;  %v16193_v35 = vpop.permute.xlu0 %4540 }
 0x185   : > { %13939 = vmatpush3.bf16.msra.mxu1 %v4060_v23  ;;  %13940 = vmatprep.mubr.msk.bf16.mxu1 %vm15108_vm3, %v15107_v62  ;;  %v16197_v25 = vpop.permute.xlu1 %4542  ;;  %v4551_v61 = vsel %vm18200_vm15, %v16179_v31, %v16193_v35 }
 0x186   : > { %13400 = vmatprep.subr.msk.bf16.mxu1 %vm277_vm1, %v4292_v33  ;;  %6577 = vrot.lane.b32.xlu0 %v6563_v30, %s15124_s14  ;;  %v4552_v58 = vsel %vm18200_vm15, %v16193_v35, %v16197_v25  ;;  %v4570_v4 = vsel %vm277_vm1, %v4551_v61, 0  ;;  %v16333_v33 = vld [vmem:[#allocation2] sm:$0xff] }
 0x187   : > { %6819 = vrot.lane.b32.xlu1 %v15682_v26, %s15125_s7  ;;  %v4293_v26 = vsel %vm18199_vm14, %v16106_v59, %v16121_v1  ;;  %vm18201_vm14 = vcmask 547840   ;;  %207 = vst.msk [vmem:[#allocation2 + $0x20] sm:$0xff] %vm206_vm7, %v16333_v33  ;;  %vm7200_vm7 = vcmask 1044256  }
 0x188   : > { %13395 = vmatmul.mubr.msk.bf16.vlgmr.msra.gmra.mrb[4].mxu0 %vm273_vm2, %v13389_v18  ;;  %v16211_v39 = vpop.permute.xlu0 %4544  ;;  %v4312_v47 = vsel %vm277_vm1, %v4293_v26, 0 }
 0x189   : > { %4321 = vmatpush1.bf16.msra.mxu0 %v4300_v36  ;;  %4352 = vmatprep.mubr.bf16.mxu0 %v15643_v2  ;;  %v16215_v41 = vpop.permute.xlu1 %4787  ;;  %v4553_v7 = vsel %vm18200_vm15, %v16197_v25, %v16211_v39  ;;  %vm18202_vm15 = vcmask 539648  }
 0x18a   : > { %13402 = vmatprep.subr.msk.bf16.mxu0 %vm277_vm1, %v4294_v38  ;;  %6821 = vrot.lane.b32.xlu0 %v15697_v21, %s15125_s7  ;;  %v4576_v12 = vsel %vm277_vm1, %v4553_v7, 0 }
 0x18b   : > { %6823 = vrot.lane.b32.xlu1 %v15705_v22, %s15125_s7  ;;  %v6818_v22 = vcombine.high %v6810_v43, %v6810_v43 }
 0x18c   : > { %13941 = vmatmul.mubr.msk.bf16.vlgmr.msra.gmra.mrb[4].mxu1 %vm273_vm2, %v13389_v18  ;;  %v4790_v45 = vpop.permute.xlu0 %4789 }
 0x18d   : > { %4362 = vmatpush1.bf16.msra.mxu1 %v4306_v42  ;;  %4393 = vmatprep.mubr.bf16.mxu1 %v15643_v2  ;;  %v16232_v21 = vpop.permute.xlu1 %4791  ;;  %v4802_v13 = vsel %vm18201_vm14, %v16215_v41, %v4790_v45 }
 0x18e   : > { %13944 = vmatprep.subr.bf16.mxu1 %v15107_v62  ;;  %6825 = vrot.lane.b32.xlu0 %v15718_v34, %s15125_s7  ;;  %v4803_v8 = vsel %vm18201_vm14, %v4790_v45, %v16232_v21  ;;  %v4812_v18 = vsel %vm277_vm1, %v4802_v13, 0  ;;  %v13421_v45 = vld [vmem:[%s18184_s2 + $0x4c] sm:$0xf] }
 0x18f   : > { %6827 = vrot.lane.b32.xlu1 %v6810_v43, %s15125_s7 }
 0x190   : > { %13399 = vmatmul.mubr.msk.bf16.vlgmr.msra.gmra.mrb[0].mxu0 %vm273_vm2, %v13397_v46  ;;  %v4794_v51 = vpop.permute.xlu0 %4793 }
 0x191   : > { %4403 = vmatpush1.bf16.msra.mxu0 %v4312_v47  ;;  %4434 = vmatprep.mubr.bf16.mxu0 %v15643_v2  ;;  %v4796_v34 = vpop.permute.xlu1 %4795  ;;  %v4804_v19 = vsel %vm18201_vm14, %v16232_v21, %v4794_v51 }
 0x192   : > { %13406 = vmatprep.subr.msk.bf16.mxu0 %vm277_vm1, %v4548_v49  ;;  %6829 = vrot.lane.b32.xlu0 %v6818_v22, %s15125_s7  ;;  %v4805_v14 = vsel %vm18201_vm14, %v4794_v51, %v4796_v34  ;;  %v4818_v28 = vsel %vm277_vm1, %v4804_v19, 0 }
 0x193   : > { %6831 = vrot.lane.b32.xlu1 %v6817_v50, %s15125_s7 }
 0x194   : > { %13401 = vmatmul.mubr.msk.bf16.vlgmr.msra.gmra.mrb[0].mxu1 %vm273_vm2, %v13397_v46  ;;  %v4798_v54 = vpop.permute.xlu0 %4797 }
 0x195   : > { %13945 = vmatpush3.bf16.msra.mxu1 %v4318_v52  ;;  %13946 = vmatprep.mubr.msk.bf16.mxu1 %vm15108_vm3, %v15107_v62  ;;  %v16261_v55 = vpop.permute.xlu1 %4799  ;;  %v4806_v17 = vsel %vm18201_vm14, %v4796_v34, %v4798_v54 }
 0x196   : > { %13408 = vmatprep.subr.msk.bf16.mxu1 %vm277_vm1, %v4550_v5  ;;  %v4807_v24 = vsel %vm18201_vm14, %v4798_v54, %v16261_v55  ;;  %v4824_v23 = vsel %vm277_vm1, %v4806_v17, 0  ;;  %vm18203_vm14 = vcmask 531456  }
 0x198   : > { %13403 = vmatmul.mubr.msk.bf16.vlgmr.msra.gmra.mrb[4].mxu0 %vm273_vm2, %v13397_v46  ;;  %v16272_v59 = vpop.permute.xlu0 %5041 }
 0x199   : > { %4579 = vmatpush1.bf16.msra.mxu0 %v4558_v56  ;;  %4610 = vmatprep.mubr.bf16.mxu0 %v15643_v2  ;;  %v5044_v60 = vpop.permute.xlu1 %5043 }
 0x19a   : > { %13410 = vmatprep.subr.msk.bf16.mxu0 %vm277_vm1, %v4552_v58  ;;  %v5056_v25 = vsel %vm18202_vm15, %v16272_v59, %v5044_v60  ;;  %v13429_v58 = vld [vmem:[%s18184_s2 + $0x50] sm:$0xf] }
 0x19b   : > { %v5066_v39 = vsel %vm277_vm1, %v5056_v25, 0 }
 0x19c   : > { %13947 = vmatmul.mubr.msk.bf16.vlgmr.msra.gmra.mrb[4].mxu1 %vm273_vm2, %v13397_v46  ;;  %v16281_v63 = vpop.permute.xlu0 %5045 }
 0x19d   : > { %4620 = vmatpush1.bf16.msra.mxu1 %v4564_v6  ;;  %4651 = vmatprep.mubr.bf16.mxu1 %v15643_v2  ;;  %v5048_v1 = vpop.permute.xlu1 %5047  ;;  %v5057_v30 = vsel %vm18202_vm15, %v5044_v60, %v16281_v63 }
 0x19e   : > { %13950 = vmatprep.subr.bf16.mxu1 %v15107_v62  ;;  %v5058_v40 = vsel %vm18202_vm15, %v16281_v63, %v5048_v1 }
 0x19f   : > { %v5072_v43 = vsel %vm277_vm1, %v5058_v40, 0 }
 0x1a0   : > { %13407 = vmatmul.mubr.msk.bf16.vlgmr.msra.gmra.mrb[0].mxu0 %vm273_vm2, %v13405_v0  ;;  %v5050_v9 = vpop.permute.xlu0 %5049 }
 0x1a1   : > { %4661 = vmatpush1.bf16.msra.mxu0 %v4570_v4  ;;  %4692 = vmatprep.mubr.bf16.mxu0 %v15643_v2  ;;  %v5052_v11 = vpop.permute.xlu1 %5051  ;;  %v5059_v36 = vsel %vm18202_vm15, %v5048_v1, %v5050_v9 }
 0x1a2   : > { %13414 = vmatprep.subr.msk.bf16.mxu0 %vm277_vm1, %v4803_v8  ;;  %v5060_v44 = vsel %vm18202_vm15, %v5050_v9, %v5052_v11 }
 0x1a3   : > { %v5078_v21 = vsel %vm277_vm1, %v5060_v44, 0 }
 0x1a4   : > { %13409 = vmatmul.mubr.msk.bf16.vlgmr.msra.gmra.mrb[0].mxu1 %vm273_vm2, %v13405_v0  ;;  %v16302_v15 = vpop.permute.xlu0 %5053 }
 0x1a5   : > { %13951 = vmatpush3.bf16.msra.mxu1 %v4576_v12  ;;  %13952 = vmatprep.mubr.msk.bf16.mxu1 %vm15108_vm3, %v15107_v62  ;;  %v16306_v16 = vpop.permute.xlu1 %5295  ;;  %v5061_v41 = vsel %vm18202_vm15, %v5052_v11, %v16302_v15  ;;  %v5084_v48 = vsel %vm277_vm1, %v16302_v15, 0  ;;  %vm18204_vm15 = vcmask 465920  }
 0x1a6   : > { %13416 = vmatprep.subr.msk.bf16.mxu1 %vm277_vm1, %v4805_v14 }
 0x1a8   : > { %13411 = vmatmul.mubr.msk.bf16.vlgmr.msra.gmra.mrb[4].mxu0 %vm273_vm2, %v13405_v0  ;;  %v5298_v10 = vpop.permute.xlu0 %5297 }
 0x1a9   : > { %4833 = vmatpush1.bf16.msra.mxu0 %v4812_v18  ;;  %4864 = vmatprep.mubr.bf16.mxu0 %v15643_v2  ;;  %v16316_v27 = vpop.permute.xlu1 %5299  ;;  %v5310_v50 = vsel %vm18203_vm14, %v16306_v16, %v5298_v10  ;;  %v13437_v16 = vld [vmem:[%s18184_s2 + $0x54] sm:$0xf] }
 0x1aa   : > { %13418 = vmatprep.subr.msk.bf16.mxu0 %vm277_vm1, %v4807_v24  ;;  %v5311_v22 = vsel %vm18203_vm14, %v5298_v10, %v16316_v27  ;;  %v5320_v52 = vsel %vm277_vm1, %v5310_v50, 0  ;;  %v13453_v50 = vld [vmem:[%s18184_s2 + $0x5c] sm:$0xf] }
 0x1ac   : > { %13953 = vmatmul.mubr.msk.bf16.vlgmr.msra.gmra.mrb[4].mxu1 %vm273_vm2, %v13405_v0  ;;  %v5302_v20 = vpop.permute.xlu0 %5301 }
 0x1ad   : > { %4874 = vmatpush1.bf16.msra.mxu1 %v4818_v28  ;;  %4905 = vmatprep.mubr.bf16.mxu1 %v15643_v2  ;;  %v16326_v31 = vpop.permute.xlu1 %5303  ;;  %v4830_v2 = vsel %vm277_vm1, %v16261_v55, 0  ;;  %v5312_v53 = vsel %vm18203_vm14, %v16316_v27, %v5302_v20 }
 0x1ae   : > { %13956 = vmatprep.subr.bf16.mxu1 %v15107_v62  ;;  %v5313_v51 = vsel %vm18203_vm14, %v5302_v20, %v16326_v31  ;;  %v5326_v56 = vsel %vm277_vm1, %v5312_v53, 0 }
 0x1b0   : > { %13415 = vmatmul.mubr.msk.bf16.vlgmr.msra.gmra.mrb[0].mxu0 %vm273_vm2, %v13413_v29  ;;  %v5306_v32 = vpop.permute.xlu0 %5305 }
 0x1b1   : > { %4915 = vmatpush1.bf16.msra.mxu0 %v4824_v23  ;;  %4946 = vmatprep.mubr.bf16.mxu0 %v16333_v33  ;;  %v16336_v35 = vpop.permute.xlu1 %5307  ;;  %v5314_v57 = vsel %vm18203_vm14, %v16326_v31, %v5306_v32 }
 0x1b2   : > { %13422 = vmatprep.subr.msk.bf16.mxu0 %vm277_vm1, %v5057_v30  ;;  %v5315_v5 = vsel %vm18203_vm14, %v5306_v32, %v16336_v35  ;;  %v5332_v59 = vsel %vm277_vm1, %v5314_v57, 0  ;;  %v5338_v63 = vsel %vm277_vm1, %v16336_v35, 0  ;;  %vm18205_vm14 = vcmask 457728  }
 0x1b4   : > { %13417 = vmatmul.mubr.msk.bf16.vlgmr.msra.gmra.mrb[0].mxu1 %vm273_vm2, %v13413_v29  ;;  %v16345_v37 = vpop.permute.xlu0 %5549 }
 0x1b5   : > { %13957 = vmatpush3.bf16.msra.mxu1 %v4830_v2  ;;  %13958 = vmatprep.mubr.msk.bf16.mxu1 %vm15108_vm3, %v15107_v62  ;;  %v16349_v38 = vpop.permute.xlu1 %5551 }
 0x1b6   : > { %13424 = vmatprep.subr.msk.bf16.mxu1 %vm277_vm1, %v5059_v36  ;;  %v5564_v0 = vsel %vm18204_vm15, %v16345_v37, %v16349_v38  ;;  %v13445_v36 = vld [vmem:[%s18184_s2 + $0x58] sm:$0xf] }
 0x1b7   : > { %v5574_v8 = vsel %vm277_vm1, %v5564_v0, 0  ;;  %v13461_v0 = vld [vmem:[%s18184_s2 + $0x60] sm:$0xf] }
 0x1b8   : > { %13419 = vmatmul.mubr.msk.bf16.vlgmr.msra.gmra.mrb[4].mxu0 %vm273_vm2, %v13413_v29  ;;  %v16358_v42 = vpop.permute.xlu0 %5553 }
 0x1b9   : > { %5087 = vmatpush1.bf16.msra.mxu0 %v5066_v39  ;;  %5118 = vmatprep.mubr.bf16.mxu0 %v16333_v33  ;;  %v16361_v26 = vpop.permute.xlu1 %5555  ;;  %v5565_v61 = vsel %vm18204_vm15, %v16349_v38, %v16358_v42 }
 0x1ba   : > { %13426 = vmatprep.subr.msk.bf16.mxu0 %vm277_vm1, %v5061_v41  ;;  %v5566_v9 = vsel %vm18204_vm15, %v16358_v42, %v16361_v26 }
 0x1bb   : > { %v5580_v13 = vsel %vm277_vm1, %v5566_v9, 0 }
 0x1bc   : > { %13959 = vmatmul.mubr.msk.bf16.vlgmr.msra.gmra.mrb[4].mxu1 %vm273_vm2, %v13413_v29  ;;  %v5558_v47 = vpop.permute.xlu0 %5557 }
 0x1bd   : > { %5128 = vmatpush1.bf16.msra.mxu1 %v5072_v43  ;;  %5159 = vmatprep.mubr.bf16.mxu1 %v16333_v33  ;;  %v16371_v46 = vpop.permute.xlu1 %5559  ;;  %v5567_v1 = vsel %vm18204_vm15, %v16361_v26, %v5558_v47 }
 0x1be   : > { %13962 = vmatprep.subr.bf16.mxu1 %v15107_v62  ;;  %v5568_v15 = vsel %vm18204_vm15, %v5558_v47, %v16371_v46 }
 0x1bf   : > { %v5586_v18 = vsel %vm277_vm1, %v5568_v15, 0 }
 0x1c0   : > { %13423 = vmatmul.mubr.msk.bf16.vlgmr.msra.gmra.mrb[0].mxu0 %vm273_vm2, %v13421_v45  ;;  %v5562_v34 = vpop.permute.xlu0 %5561 }
 0x1c1   : > { %5169 = vmatpush1.bf16.msra.mxu0 %v5078_v21  ;;  %5200 = vmatprep.mubr.bf16.mxu0 %v16333_v33  ;;  %v16382_v49 = vpop.permute.xlu1 %5803  ;;  %v5569_v11 = vsel %vm18204_vm15, %v16371_v46, %v5562_v34  ;;  %v5592_v27 = vsel %vm277_vm1, %v5562_v34, 0  ;;  %vm18206_vm15 = vcmask 449536  }
 0x1c2   : > { %13430 = vmatprep.subr.msk.bf16.mxu0 %vm277_vm1, %v5311_v22 }
 0x1c4   : > { %13425 = vmatmul.mubr.msk.bf16.vlgmr.msra.gmra.mrb[0].mxu1 %vm273_vm2, %v13421_v45  ;;  %v5806_v54 = vpop.permute.xlu0 %5805 }
 0x1c5   : > { %13963 = vmatpush3.bf16.msra.mxu1 %v5084_v48  ;;  %13964 = vmatprep.mubr.msk.bf16.mxu1 %vm15108_vm3, %v15107_v62  ;;  %v16398_v55 = vpop.permute.xlu1 %5807  ;;  %v5818_v28 = vsel %vm18205_vm14, %v16382_v49, %v5806_v54 }
 0x1c6   : > { %13432 = vmatprep.subr.msk.bf16.mxu1 %vm277_vm1, %v5313_v51  ;;  %v5819_v24 = vsel %vm18205_vm14, %v5806_v54, %v16398_v55  ;;  %v5828_v29 = vsel %vm277_vm1, %v5818_v28, 0 }
 0x1c8   : > { %13427 = vmatmul.mubr.msk.bf16.vlgmr.msra.gmra.mrb[4].mxu0 %vm273_vm2, %v13421_v45  ;;  %v5810_v60 = vpop.permute.xlu0 %5809 }
 0x1c9   : > { %5341 = vmatpush1.bf16.msra.mxu0 %v5320_v52  ;;  %5372 = vmatprep.mubr.bf16.mxu0 %v16333_v33  ;;  %v5812_v6 = vpop.permute.xlu1 %5811  ;;  %v5820_v23 = vsel %vm18205_vm14, %v16398_v55, %v5810_v60 }
 0x1ca   : > { %13434 = vmatprep.subr.msk.bf16.mxu0 %vm277_vm1, %v5315_v5  ;;  %v5821_v17 = vsel %vm18205_vm14, %v5810_v60, %v5812_v6  ;;  %v5834_v32 = vsel %vm277_vm1, %v5820_v23, 0 }
 0x1cc   : > { %13965 = vmatmul.mubr.msk.bf16.vlgmr.msra.gmra.mrb[4].mxu1 %vm273_vm2, %v13421_v45  ;;  %v5814_v4 = vpop.permute.xlu0 %5813 }
 0x1cd   : > { %5382 = vmatpush1.bf16.msra.mxu1 %v5326_v56  ;;  %5413 = vmatprep.mubr.bf16.mxu1 %v16333_v33  ;;  %v5816_v7 = vpop.permute.xlu1 %5815  ;;  %v5822_v2 = vsel %vm18205_vm14, %v5812_v6, %v5814_v4 }
 0x1ce   : > { %13968 = vmatprep.subr.bf16.mxu1 %v15107_v62  ;;  %v5823_v30 = vsel %vm18205_vm14, %v5814_v4, %v5816_v7  ;;  %v5840_v37 = vsel %vm277_vm1, %v5822_v2, 0  ;;  %v5846_v41 = vsel %vm277_vm1, %v5816_v7, 0  ;;  %vm18207_vm14 = vcmask 384000  }
 0x1d0   : > { %13431 = vmatmul.mubr.msk.bf16.vlgmr.msra.gmra.mrb[0].mxu0 %vm273_vm2, %v13429_v58  ;;  %v6058_v14 = vpop.permute.xlu0 %6057 }
 0x1d1   : > { %5423 = vmatpush1.bf16.msra.mxu0 %v5332_v59  ;;  %5454 = vmatprep.mubr.bf16.mxu0 %v16333_v33  ;;  %v6060_v12 = vpop.permute.xlu1 %6059 }
 0x1d2   : > { %13438 = vmatprep.subr.msk.bf16.mxu0 %vm277_vm1, %v5565_v61  ;;  %v6072_v42 = vsel %vm18206_vm15, %v6058_v14, %v6060_v12 }
 0x1d3   : > { %v6082_v43 = vsel %vm277_vm1, %v6072_v42, 0  ;;  %v7037_v42 = vsub.s32 0, %v15162_v3 }
 0x1d4   : > { %13433 = vmatmul.mubr.msk.bf16.vlgmr.msra.gmra.mrb[0].mxu1 %vm273_vm2, %v13429_v58  ;;  %v6062_v10 = vpop.permute.xlu0 %6061 }
 0x1d5   : > { %13969 = vmatpush3.bf16.msra.mxu1 %v5338_v63  ;;  %13970 = vmatprep.mubr.msk.bf16.mxu1 %vm15108_vm3, %v15107_v62  ;;  %v6064_v19 = vpop.permute.xlu1 %6063  ;;  %v6073_v38 = vsel %vm18206_vm15, %v6060_v12, %v6062_v10 }
 0x1d6   : > { %13440 = vmatprep.subr.msk.bf16.mxu1 %vm277_vm1, %v5567_v1  ;;  %v6074_v46 = vsel %vm18206_vm15, %v6062_v10, %v6064_v19 }
 0x1d7   : > { %v6088_v47 = vsel %vm277_vm1, %v6074_v46, 0 }
 0x1d8   : > { %13435 = vmatmul.mubr.msk.bf16.vlgmr.msra.gmra.mrb[4].mxu0 %vm273_vm2, %v13429_v58  ;;  %v6066_v31 = vpop.permute.xlu0 %6065 }
 0x1d9   : > { %5595 = vmatpush1.bf16.msra.mxu0 %v5574_v8  ;;  %5626 = vmatprep.mubr.bf16.mxu0 %v16333_v33  ;;  %v6068_v20 = vpop.permute.xlu1 %6067  ;;  %v6075_v26 = vsel %vm18206_vm15, %v6064_v19, %v6066_v31 }
 0x1da   : > { %13442 = vmatprep.subr.msk.bf16.mxu0 %vm277_vm1, %v5569_v11  ;;  %v6076_v22 = vsel %vm18206_vm15, %v6066_v31, %v6068_v20 }
 0x1db   : > { %v6094_v51 = vsel %vm277_vm1, %v6076_v22, 0 }
 0x1dc   : > { %13971 = vmatmul.mubr.msk.bf16.vlgmr.msra.gmra.mrb[4].mxu1 %vm273_vm2, %v13429_v58  ;;  %v6070_v25 = vpop.permute.xlu0 %6069 }
 0x1dd   : > { %5636 = vmatpush1.bf16.msra.mxu1 %v5580_v13  ;;  %5667 = vmatprep.mubr.bf16.mxu1 %v16333_v33  ;;  %v6312_v35 = vpop.permute.xlu1 %6311  ;;  %v6077_v21 = vsel %vm18206_vm15, %v6068_v20, %v6070_v25  ;;  %v6100_v53 = vsel %vm277_vm1, %v6070_v25, 0  ;;  %vm18209_vm15 = vcmask 375808  }
 0x1de   : > { %13974 = vmatprep.subr.bf16.mxu1 %v15107_v62 }
 0x1e0   : > { %13439 = vmatmul.mubr.msk.bf16.vlgmr.msra.gmra.mrb[0].mxu0 %vm273_vm2, %v13437_v16  ;;  %v6314_v39 = vpop.permute.xlu0 %6313 }
 0x1e1   : > { %5677 = vmatpush1.bf16.msra.mxu0 %v5586_v18  ;;  %5708 = vmatprep.mubr.bf16.mxu0 %v16333_v33  ;;  %v6316_v40 = vpop.permute.xlu1 %6315  ;;  %v6326_v54 = vsel %vm18207_vm14, %v6312_v35, %v6314_v39 }
 0x1e2   : > { %13446 = vmatprep.subr.msk.bf16.mxu0 %vm277_vm1, %v5819_v24  ;;  %v6327_v34 = vsel %vm18207_vm14, %v6314_v39, %v6316_v40  ;;  %v6336_v56 = vsel %vm277_vm1, %v6326_v54, 0  ;;  %v13477_v39 = vld [vmem:[%s18184_s2 + $0x68] sm:$0xf] }
 0x1e4   : > { %13441 = vmatmul.mubr.msk.bf16.vlgmr.msra.gmra.mrb[0].mxu1 %vm273_vm2, %v13437_v16  ;;  %v6318_v44 = vpop.permute.xlu0 %6317 }
 0x1e5   : > { %13975 = vmatpush3.bf16.msra.mxu1 %v5592_v27  ;;  %13976 = vmatprep.mubr.msk.bf16.mxu1 %vm15108_vm3, %v15107_v62  ;;  %v6320_v45 = vpop.permute.xlu1 %6319  ;;  %v6328_v58 = vsel %vm18207_vm14, %v6316_v40, %v6318_v44  ;;  %v13469_v27 = vld [vmem:[%s18184_s2 + $0x64] sm:$0xf] }
 0x1e6   : > { %13448 = vmatprep.subr.msk.bf16.mxu1 %vm277_vm1, %v5821_v17  ;;  %v6329_v55 = vsel %vm18207_vm14, %v6318_v44, %v6320_v45  ;;  %v6342_v6 = vsel %vm277_vm1, %v6328_v58, 0 }
 0x1e8   : > { %13443 = vmatmul.mubr.msk.bf16.vlgmr.msra.gmra.mrb[4].mxu0 %vm273_vm2, %v13437_v16  ;;  %v6322_v48 = vpop.permute.xlu0 %6321 }
 0x1e9   : > { %5849 = vmatpush1.bf16.msra.mxu0 %v5828_v29  ;;  %5880 = vmatprep.mubr.bf16.mxu0 %v16333_v33  ;;  %v6324_v49 = vpop.permute.xlu1 %6323  ;;  %v6330_v61 = vsel %vm18207_vm14, %v6320_v45, %v6322_v48  ;;  %v7045_v45 = vsub.s32 2, %v15162_v3 }
 0x1ea   : > { %13450 = vmatprep.subr.msk.bf16.mxu0 %vm277_vm1, %v5823_v30  ;;  %v6331_v59 = vsel %vm18207_vm14, %v6322_v48, %v6324_v49  ;;  %v6348_v1 = vsel %vm277_vm1, %v6330_v61, 0  ;;  %v6354_v8 = vsel %vm277_vm1, %v6324_v49, 0  ;;  %vm18208_vm14 = vcmask 367616  }
 0x1ec   : > { %13977 = vmatmul.mubr.msk.bf16.vlgmr.msra.gmra.mrb[4].mxu1 %vm273_vm2, %v13437_v16  ;;  %v6566_v5 = vpop.permute.xlu0 %6565 }
 0x1ed   : > { %5890 = vmatpush1.bf16.msra.mxu1 %v5834_v32  ;;  %5921 = vmatprep.mubr.bf16.mxu1 %v16333_v33  ;;  %v6568_v52 = vpop.permute.xlu1 %6567 }
 0x1ee   : > { %13980 = vmatprep.subr.bf16.mxu1 %v15107_v62  ;;  %v6580_v11 = vsel %vm18209_vm15, %v6566_v5, %v6568_v52 }
 0x1ef   : > { %v6590_v14 = vsel %vm277_vm1, %v6580_v11, 0 }
 0x1f0   : > { %13447 = vmatmul.mubr.msk.bf16.vlgmr.msra.gmra.mrb[0].mxu0 %vm273_vm2, %v13445_v36  ;;  %v6570_v60 = vpop.permute.xlu0 %6569 }
 0x1f1   : > { %5931 = vmatpush1.bf16.msra.mxu0 %v5840_v37  ;;  %5962 = vmatprep.mubr.bf16.mxu0 %v16333_v33  ;;  %v6572_v57 = vpop.permute.xlu1 %6571  ;;  %v6581_v7 = vsel %vm18209_vm15, %v6568_v52, %v6570_v60 }
 0x1f2   : > { %13454 = vmatprep.subr.msk.bf16.mxu0 %vm277_vm1, %v6073_v38  ;;  %v6582_v15 = vsel %vm18209_vm15, %v6570_v60, %v6572_v57 }
 0x1f3   : > { %v6596_v24 = vsel %vm277_vm1, %v6582_v15, 0 }
 0x1f4   : > { %13449 = vmatmul.mubr.msk.bf16.vlgmr.msra.gmra.mrb[0].mxu1 %vm273_vm2, %v13445_v36  ;;  %v6574_v4 = vpop.permute.xlu0 %6573 }
 0x1f5   : > { %13981 = vmatpush3.bf16.msra.mxu1 %v5846_v41  ;;  %13982 = vmatprep.mubr.msk.bf16.mxu1 %vm15108_vm3, %v15107_v62  ;;  %v6576_v63 = vpop.permute.xlu1 %6575  ;;  %v6583_v12 = vsel %vm18209_vm15, %v6572_v57, %v6574_v4 }
 0x1f6   : > { %13456 = vmatprep.subr.msk.bf16.mxu1 %vm277_vm1, %v6075_v26  ;;  %v6584_v10 = vsel %vm18209_vm15, %v6574_v4, %v6576_v63  ;;  %v199_v26 = vld [vmem:[%s18183_s1] sm:$0x7f] }
 0x1f7   : > { %v6602_v28 = vsel %vm277_vm1, %v6584_v10, 0  ;;  %v16596_v44 = vrot.slane %v199_v26, %v7037_v42  ;;  %v16603_v49 = vrot.slane %v199_v26, %v7045_v45 }
 0x1f8   : > { %13451 = vmatmul.mubr.msk.bf16.vlgmr.msra.gmra.mrb[4].mxu0 %vm273_vm2, %v13445_v36  ;;  %v6578_v13 = vpop.permute.xlu0 %6577 }
 0x1f9   : > { %6103 = vmatpush1.bf16.msra.mxu0 %v6082_v43  ;;  %6134 = vmatprep.mubr.bf16.mxu0 %v16333_v33  ;;  %v6820_v9 = vpop.permute.xlu1 %6819  ;;  %v6585_v16 = vsel %vm18209_vm15, %v6576_v63, %v6578_v13  ;;  %v6608_v31 = vsel %vm277_vm1, %v6578_v13, 0  ;;  %v7041_v43 = vsub.s32 1, %v15162_v3 }
 0x1fa   : > { %13458 = vmatprep.subr.msk.bf16.mxu0 %vm277_vm1, %v6077_v21  ;;  %v7049_v21 = vsub.s32 3, %v15162_v3 }
 0x1fb   : > { %v16599_v46 = vrot.slane %v199_v26, %v7041_v43 }
 0x1fc   : > { %13983 = vmatmul.mubr.msk.bf16.vlgmr.msra.gmra.mrb[4].mxu1 %vm273_vm2, %v13445_v36  ;;  %v6822_v18 = vpop.permute.xlu0 %6821  ;;  %v16607_v52 = vrot.slane %v199_v26, %v7049_v21 }
 0x1fd   : > { %6144 = vmatpush1.bf16.msra.mxu1 %v6088_v47  ;;  %6175 = vmatprep.mubr.bf16.mxu1 %v16333_v33  ;;  %v6824_v19 = vpop.permute.xlu1 %6823  ;;  %v6834_v23 = vsel %vm18208_vm14, %v6820_v9, %v6822_v18 }
 0x1fe   : > { %13986 = vmatprep.subr.bf16.mxu1 %v15107_v62  ;;  %v6835_v29 = vsel %vm18208_vm14, %v6822_v18, %v6824_v19  ;;  %v6844_v2 = vsel %vm277_vm1, %v6834_v23, 0 }
 0x200   : > { %13455 = vmatmul.mubr.msk.bf16.vlgmr.msra.gmra.mrb[0].mxu0 %vm273_vm2, %v13453_v50  ;;  %v6826_v17 = vpop.permute.xlu0 %6825 }
 0x201   : > { %6185 = vmatpush1.bf16.msra.mxu0 %v6094_v51  ;;  %6216 = vmatprep.mubr.bf16.mxu0 %v16333_v33  ;;  %v6828_v20 = vpop.permute.xlu1 %6827  ;;  %v6836_v25 = vsel %vm18208_vm14, %v6824_v19, %v6826_v17 }
 0x202   : > { %13462 = vmatprep.subr.msk.bf16.mxu0 %vm277_vm1, %v6327_v34  ;;  %v6837_v30 = vsel %vm18208_vm14, %v6826_v17, %v6828_v20  ;;  %v6850_v37 = vsel %vm277_vm1, %v6836_v25, 0 }
 0x204   : > { %13457 = vmatmul.mubr.msk.bf16.vlgmr.msra.gmra.mrb[0].mxu1 %vm273_vm2, %v13453_v50  ;;  %v6830_v32 = vpop.permute.xlu0 %6829 }
 0x205   : > { %13987 = vmatpush3.bf16.msra.mxu1 %v6100_v53  ;;  %13988 = vmatprep.mubr.msk.bf16.mxu1 %vm15108_vm3, %v15107_v62  ;;  %v6832_v35 = vpop.permute.xlu1 %6831  ;;  %v6838_v38 = vsel %vm18208_vm14, %v6828_v20, %v6830_v32  ;;  %v7057_v53 = vsub.s32 5, %v15162_v3 }
 0x206   : > { %13464 = vmatprep.subr.msk.bf16.mxu1 %vm277_vm1, %v6329_v55  ;;  %v6839_v36 = vsel %vm18208_vm14, %v6830_v32, %v6832_v35  ;;  %v6856_v40 = vsel %vm277_vm1, %v6838_v38, 0  ;;  %v6862_v41 = vsel %vm277_vm1, %v6832_v35, 0 }
 0x207   : > { %v16615_v61 = vrot.slane %v199_v26, %v7057_v53 }
 0x208   : > { %13459 = vmatmul.mubr.msk.bf16.vlgmr.msra.gmra.mrb[4].mxu0 %vm273_vm2, %v13453_v50 }
 0x209   : > { %6357 = vmatpush1.bf16.msra.mxu0 %v6336_v56  ;;  %6388 = vmatprep.mubr.bf16.mxu0 %v16333_v33 }
 0x20a   : > { %13466 = vmatprep.subr.msk.bf16.mxu0 %vm277_vm1, %v6331_v59  ;;  %v7061_v59 = vsub.s32 6, %v15162_v3 }
 0x20c   : > { %13989 = vmatmul.mubr.msk.bf16.vlgmr.msra.gmra.mrb[4].mxu1 %vm273_vm2, %v13453_v50  ;;  %v7053_v50 = vsub.s32 4, %v15162_v3  ;;  %v16618_v9 = vrot.slane %v199_v26, %v7061_v59 }
 0x20d   : > { %6398 = vmatpush1.bf16.msra.mxu1 %v6342_v6  ;;  %6429 = vmatprep.mubr.bf16.mxu1 %v16333_v33 }
 0x20e   : > { %13992 = vmatprep.subr.bf16.mxu1 %v15107_v62  ;;  %v16611_v58 = vrot.slane %v199_v26, %v7053_v50 }
 0x210   : > { %13463 = vmatmul.mubr.msk.bf16.vlgmr.msra.gmra.mrb[0].mxu0 %vm273_vm2, %v13461_v0 }
 0x211   : > { %6439 = vmatpush1.bf16.msra.mxu0 %v6348_v1  ;;  %6470 = vmatprep.mubr.bf16.mxu0 %v16333_v33 }
 0x212   : > { %13470 = vmatprep.subr.msk.bf16.mxu0 %vm277_vm1, %v6581_v7 }
 0x214   : > { %13465 = vmatmul.mubr.msk.bf16.vlgmr.msra.gmra.mrb[0].mxu1 %vm273_vm2, %v13461_v0 }
 0x215   : > { %13993 = vmatpush3.bf16.msra.mxu1 %v6354_v8  ;;  %13994 = vmatprep.mubr.msk.bf16.mxu1 %vm15108_vm3, %v15107_v62 }
 0x216   : > { %13472 = vmatprep.subr.msk.bf16.mxu1 %vm277_vm1, %v6583_v12 }
 0x218   : > { %13467 = vmatmul.mubr.msk.bf16.vlgmr.msra.gmra.mrb[4].mxu0 %vm273_vm2, %v13461_v0 }
 0x219   : > { %6611 = vmatpush1.bf16.msra.mxu0 %v6590_v14  ;;  %6642 = vmatprep.mubr.bf16.mxu0 %v16333_v33 }
 0x21a   : > { %13474 = vmatprep.subr.msk.bf16.mxu0 %vm277_vm1, %v6585_v16 }
 0x21c   : > { %13995 = vmatmul.mubr.msk.bf16.vlgmr.msra.gmra.mrb[4].mxu1 %vm273_vm2, %v13461_v0 }
 0x21d   : > { %6652 = vmatpush1.bf16.msra.mxu1 %v6596_v24  ;;  %6683 = vmatprep.mubr.bf16.mxu1 %v16333_v33 }
 0x21e   : > { %13998 = vmatprep.subr.bf16.mxu1 %v15107_v62 }
 0x220   : > { %13471 = vmatmul.mubr.msk.bf16.vlgmr.msra.gmra.mrb[0].mxu0 %vm273_vm2, %v13469_v27 }
 0x221   : > { %6693 = vmatpush1.bf16.msra.mxu0 %v6602_v28  ;;  %6724 = vmatprep.mubr.bf16.mxu0 %v16333_v33 }
 0x222   : > { %13478 = vmatprep.subr.msk.bf16.mxu0 %vm277_vm1, %v6835_v29 }
 0x224   : > { %13473 = vmatmul.mubr.msk.bf16.vlgmr.msra.gmra.mrb[0].mxu1 %vm273_vm2, %v13469_v27 }
 0x225   : > { %13999 = vmatpush3.bf16.msra.mxu1 %v6608_v31  ;;  %14000 = vmatprep.mubr.msk.bf16.mxu1 %vm15108_vm3, %v15107_v62 }
 0x226   : > { %13480 = vmatprep.subr.msk.bf16.mxu1 %vm277_vm1, %v6837_v30 }
 0x228   : > { %13475 = vmatmul.mubr.msk.bf16.vlgmr.msra.gmra.mrb[4].mxu0 %vm273_vm2, %v13469_v27 }
 0x229   : > { %6865 = vmatpush1.bf16.msra.mxu0 %v6844_v2  ;;  %6896 = vmatprep.mubr.bf16.mxu0 %v16333_v33 }
 0x22a   : > { %13482 = vmatprep.subr.msk.bf16.mxu0 %vm277_vm1, %v6839_v36  ;;  %vm7082_vm1 = vcmask 261120  }
 0x22c   : > { %14001 = vmatmul.mubr.msk.bf16.vlgmr.msra.gmra.mrb[4].mxu1 %vm273_vm2, %v13469_v27 }
 0x22d   : > { %6906 = vmatpush1.bf16.msra.mxu1 %v6850_v37  ;;  %6937 = vmatprep.mubr.bf16.mxu1 %v16333_v33 }
 0x22e   : > { %14004 = vmatprep.subr.bf16.mxu1 %v15107_v62 }
 0x230   : > { %13479 = vmatmul.mubr.msk.bf16.vlgmr.msra.gmra.mrb[0].mxu0 %vm273_vm2, %v13477_v39 }
 0x231   : > { %6947 = vmatpush1.bf16.msra.mxu0 %v6856_v40  ;;  %6978 = vmatprep.mubr.bf16.mxu0 %v16333_v33 }
 0x234   : > { %13481 = vmatmul.mubr.msk.bf16.vlgmr.msra.gmra.mrb[0].mxu1 %vm273_vm2, %v13477_v39 }
 0x235   : > { %14005 = vmatpush3.bf16.msra.mxu1 %v6862_v41  ;;  %14006 = vmatprep.mubr.msk.bf16.mxu1 %vm15108_vm3, %v15107_v62 }
 0x238   : > { %13483 = vmatmul.mubr.msk.bf16.vlgmr.msra.gmra.mrb[4].mxu0 %vm273_vm2, %v13477_v39 }
 0x239   : > { %7316 = vmatprep.mubr.bf16.mxu0 %v16333_v33 }
 0x23c   : > { %14007 = vmatmul.mubr.msk.bf16.vlgmr.msra.gmra.mrb[4].mxu1 %vm273_vm2, %v13477_v39 }
 0x23d   : > { %7357 = vmatprep.mubr.bf16.mxu1 %v16333_v33 }
 0x303   : > { %v6898_v47 = vpop.f32.mrb[0].mxu0 }
 0x304   : > { %v7070_v22 = vmul.f32 %v16596_v44, %v6898_v47  ;;  %v6900_v48 = vpop.f32.mrb[1].mxu0 }
 0x305   : > { %v7071_v51 = vmul.f32 %v16599_v46, %v6900_v48  ;;  %v6902_v34 = vpop.f32.mrb[2].mxu0 }
 0x306   : > { %v6903_v5 = vpop.f32.mrb[3].mxu0 }
 0x307   : > { %v7077_v54 = vadd.f32 %v7071_v51, %v7070_v22  ;;  %v6939_v55 = vpop.f32.mrb[0].mxu1 }
 0x308   : > { %v7072_v56 = vmul.f32 %v16603_v49, %v6939_v55  ;;  %v6941_v57 = vpop.f32.mrb[1].mxu1 }
 0x309   : > { %v7073_v60 = vmul.f32 %v16607_v52, %v6941_v57  ;;  %v6943_v6 = vpop.f32.mrb[2].mxu1 }
 0x30a   : > { %v7078_v63 = vadd.f32 %v7077_v54, %v7072_v56  ;;  %v6944_v0 = vpop.f32.mrb[3].mxu1 }
 0x30b   : > { %v6980_v1 = vpop.f32.mrb[4].mxu0 }
 0x30c   : > { %v7079_v4 = vadd.f32 %v7078_v63, %v7073_v60  ;;  %v7074_v7 = vmul.f32 %v16611_v58, %v6980_v1  ;;  %v6982_v8 = vpop.f32.mrb[5].mxu0 }
 0x30d   : > { %v7075_v11 = vmul.f32 %v16615_v61, %v6982_v8  ;;  %v6984_v12 = vpop.f32.mrb[6].mxu0 }
 0x30e   : > { %v7080_v13 = vadd.f32 %v7079_v4, %v7074_v7  ;;  %v6985_v14 = vpop.f32.mrb[7].mxu0 }
 0x30f   : > { %v7021_v3 = vpop.f32.mrb[4].mxu1 }
 0x310   : > { %v7081_v15 = vadd.f32 %v7080_v13, %v7075_v11  ;;  %v7076_v16 = vmul.f32 %v16618_v9, %v7021_v3  ;;  %v14008_v18 = vpop.f32.mrb[5].mxu1 }
 0x311   : > { %v7024_v19 = vpop.f32.mrb[6].mxu1 }
 0x312   : > { %v7083_v24 = vsel %vm7082_vm1, %v7076_v16, 0.0  ;;  %v14009_v10 = vpop.f32.mrb[7].mxu1 }
 0x313   : > { %v7084_v27 = vadd.f32 %v7083_v24, %v7081_v15 }
 0x315   : > { %7085 = vadd.xlane.f32.xlu0 %v7084_v27 }
 0x3a2   : > { %v7086_v28 = vpop.xlane.xlu0 %7085 }
 0x3a3   : > { %v7087_v17 = vmul.f32 0.001953125, %v7086_v28 }
 0x3a5   : > { %v7088_v20 = vsub.f32 %v6898_v47, %v7087_v17  ;;  %v7089_v29 = vsub.f32 %v6900_v48, %v7087_v17  ;;  %v7090_v31 = vsub.f32 %v6939_v55, %v7087_v17  ;;  %v7091_v23 = vsub.f32 %v6941_v57, %v7087_v17 }
 0x3a6   : > { %v7092_v30 = vsub.f32 %v6980_v1, %v7087_v17  ;;  %v7094_v25 = vsub.f32 %v7021_v3, %v7087_v17  ;;  %v7093_v36 = vsub.f32 %v6982_v8, %v7087_v17 }
 0x3a7   : > { %v7095_v32 = vmul.f32 %v7088_v20, %v7088_v20  ;;  %v7096_v35 = vmul.f32 %v7089_v29, %v7089_v29  ;;  %v7097_v2 = vmul.f32 %v7090_v31, %v7090_v31  ;;  %v7098_v37 = vmul.f32 %v7091_v23, %v7091_v23 }
 0x3a8   : > { %v7099_v40 = vmul.f32 %v7092_v30, %v7092_v30  ;;  %v7101_v26 = vmul.f32 %v7094_v25, %v7094_v25  ;;  %v7100_v43 = vmul.f32 %v7093_v36, %v7093_v36  ;;  %vm7123_vm2 = vcmp.ge.f32.partialorder %v7090_v31, 0.0 }
 0x3a9   : > { %v7102_v38 = vmul.f32 %v7095_v32, %v16596_v44  ;;  %v7103_v39 = vmul.f32 %v7096_v35, %v16599_v46  ;;  %v7104_v41 = vmul.f32 %v7097_v2, %v16603_v49  ;;  %v7105_v45 = vmul.f32 %v7098_v37, %v16607_v52 }
 0x3aa   : > { %v7106_v47 = vmul.f32 %v7099_v40, %v16611_v58  ;;  %v7108_v48 = vmul.f32 %v7101_v26, %v16618_v9  ;;  %v7107_v50 = vmul.f32 %v7100_v43, %v16615_v61  ;;  %vm7124_vm14 = vcmp.ge.f32.partialorder %v7091_v23, 0.0 }
 0x3ab   : > { %v7109_v42 = vadd.f32 %v7103_v39, %v7102_v38  ;;  %vm7121_vm15 = vcmp.ge.f32.partialorder %v7088_v20, 0.0  ;;  %vm7122_vm11 = vcmp.ge.f32.partialorder %v7089_v29, 0.0  ;;  %vm7127_vm10 = vcmp.ge.f32.partialorder %v7094_v25, 0.0 }
 0x3ac   : > { %v7114_v53 = vsel %vm7082_vm1, %v7108_v48, 0.0  ;;  %vm7125_vm9 = vcmp.ge.f32.partialorder %v7092_v30, 0.0  ;;  %vm7126_vm8 = vcmp.ge.f32.partialorder %v7093_v36, 0.0 }
 0x3ad   : > { %v7110_v21 = vadd.f32 %v7109_v42, %v7104_v41 }
 0x3af   : > { %v7111_v22 = vadd.f32 %v7110_v21, %v7105_v45 }
 0x3b1   : > { %v7112_v51 = vadd.f32 %v7111_v22, %v7106_v47 }
 0x3b3   : > { %v7113_v34 = vadd.f32 %v7112_v51, %v7107_v50 }
 0x3b5   : > { %v7115_v5 = vadd.f32 %v7114_v53, %v7113_v34 }
 0x3b7   : > { %7116 = vadd.xlane.f32.xlu1 %v7115_v5 }
 0x444   : > { %v7117_v54 = vpop.xlane.xlu1 %7116 }
 0x445   : > { %v7118_v55 = vmul.f32 0.001953125, %v7117_v54 }
 0x447   : > { %v7119_v56 = vadd.f32 1e-05, %v7118_v55 }
 0x449   : > { %15082 = vrsqrt.f32 %v7119_v56 }
 0x453   : > { %v15083_v57 = vpop.eup %15082 }
 0x454   : > { %v7128_v59 = vmul.f32 0.2, %v15083_v57 }
 0x456   : > { %v7131_v60 = vsel %vm7123_vm2, %v15083_v57, %v7128_v59  ;;  %v7132_v6 = vsel %vm7124_vm14, %v15083_v57, %v7128_v59  ;;  %v7129_v63 = vsel %vm7121_vm15, %v15083_v57, %v7128_v59  ;;  %v7130_v0 = vsel %vm7122_vm11, %v15083_v57, %v7128_v59 }
 0x457   : > { %v7138_v1 = vmul.f32 %v7131_v60, %v7090_v31  ;;  %v7139_v4 = vmul.f32 %v7132_v6, %v7091_v23  ;;  %v7136_v7 = vmul.f32 %v7129_v63, %v7088_v20  ;;  %v7137_v8 = vmul.f32 %v7130_v0, %v7089_v29 }
 0x458   : > { %v7135_v11 = vsel %vm7127_vm10, %v15083_v57, %v7128_v59  ;;  %v7133_v12 = vsel %vm7125_vm9, %v15083_v57, %v7128_v59  ;;  %v7134_v13 = vsel %vm7126_vm8, %v15083_v57, %v7128_v59  ;;  %vm7201_vm8 = vcmask 1047556  }
 0x459   : > { %v7145_v14 = vmul.f32 %v7138_v1, %v16603_v49  ;;  %v7146_v3 = vmul.f32 %v7139_v4, %v16607_v52  ;;  %v7143_v15 = vmul.f32 %v7136_v7, %v16596_v44  ;;  %v7144_v16 = vmul.f32 %v7137_v8, %v16599_v46  ;;  %vm7202_vm10 = vmor %vm7201_vm8, %vm7200_vm7 }
 0x45a   : > { %v7142_v18 = vmul.f32 %v7135_v11, %v7094_v25  ;;  %v7140_v19 = vmul.f32 %v7133_v12, %v7092_v30  ;;  %v7141_v24 = vmul.f32 %v7134_v13, %v7093_v36  ;;  %vm7187_vm9 = vcmask 818176  }
 0x45b   : > { %v13737_v10 = vpack.c.bf16 %v7146_v3, %v7145_v14  ;;  %v13736_v27 = vpack.c.bf16 %v7144_v16, %v7143_v15  ;;  %vm7206_vm11 = vcmask 31748   ;;  %vm7259_vm14 = vcmask 64512  }
 0x45c   : > { %v7149_v28 = vmul.f32 %v7142_v18, %v16618_v9  ;;  %v7147_v17 = vmul.f32 %v7140_v19, %v16611_v58  ;;  %v7148_v20 = vmul.f32 %v7141_v24, %v16615_v61  ;;  %vm7207_vm12 = vmor %vm7206_vm11, %vm204_vm13  ;;  %v13489_v18 = vld [vmem:[%s18185_s3 + $0x4] sm:$0xf]  ;;  %vm18223_vm7 = vcmask 973824  }
 0x45d   : > { %7177 = vrot.lane.b32.xlu1 %v13737_v10, %s15126_s20  ;;  %7175 = vrot.lane.b32.xlu0 %v13736_v27, %s15126_s20  ;;  %vm18224_vm8 = vmmov %vm18223_vm7 }
 0x45e   : > { %v13739_v29 = vpack.c.bf16 %v7149_v28, %v7149_v28  ;;  %v13738_v31 = vpack.c.bf16 %v7148_v20, %v7147_v17  ;;  %vm18227_vm11 = vmmov %vm18223_vm7 }
 0x461   : > { %7181 = vrot.lane.b32.xlu1 %v13739_v29, %s15126_s20  ;;  %7179 = vrot.lane.b32.xlu0 %v13738_v31, %s15126_s20 }
 0x4cf   : > { %v7178_v23 = vpop.permute.xlu1 %7177  ;;  %v7176_v30 = vpop.permute.xlu0 %7175 }
 0x4d0   : > { %v7184_v32 = vrot.slane %v7178_v23, 4  ;;  %v7183_v35 = vrot.slane %v7176_v30, 4 }
 0x4d2   : > { %v7188_v2 = vsel %vm7187_vm9, %v7183_v35, %v7176_v30  ;;  %v7190_v25 = vsel %vm204_vm13, %v7183_v35, %v7184_v32 }
 0x4d3   : > { %v16643_v36 = vsel %vm7187_vm9, %v7190_v25, %v7178_v23  ;;  %7203 = vst.msk [vmem:[#allocation2 + $0x4] sm:$0xff] %vm7202_vm10, %v7188_v2  ;;  %v7182_v37 = vpop.permute.xlu1 %7181  ;;  %v7180_v38 = vpop.permute.xlu0 %7179  ;;  %vm18226_vm10 = vmmov %vm18223_vm7 }
 0x4d4   : > { %7204 = vst [vmem:[#allocation2 + $0xc] sm:$0xff] %v16643_v36  ;;  %v7186_v39 = vrot.slane %v7182_v37, 4  ;;  %v7185_v40 = vrot.slane %v7180_v38, 4  ;;  %v16729_v60 = vcombine.high %v16643_v36, %v16643_v36  ;;  %v16733_v6 = vcombine.low %v16643_v36, %v16643_v36 }
 0x4d6   : > { %v7192_v41 = vsel %vm204_vm13, %v7184_v32, %v7185_v40  ;;  %v7194_v42 = vsel %vm204_vm13, %v7185_v40, %v7186_v39  ;;  %v7209_v40 = vld [vmem:[%s18185_s3] sm:$0xf] }
 0x4d7   : > { %v7193_v26 = vsel %vm7187_vm9, %v7192_v41, %v7180_v38  ;;  %v7195_v43 = vsel %vm7187_vm9, %v7194_v42, %v7182_v37  ;;  %vm18225_vm9 = vmmov %vm18223_vm7 }
 0x4d8   : > { %7205 = vst [vmem:[#allocation2 + $0x14] sm:$0xff] %v7193_v26  ;;  %7208 = vst.msk [vmem:[#allocation2 + $0x1c] sm:$0xff] %vm7207_vm12, %v7195_v43  ;;  %v16739_v63 = vcombine.high %v7193_v26, %v7193_v26  ;;  %v16741_v0 = vcombine.low %v7193_v26, %v7193_v26 }
 0x4d9   : > { %vm18228_vm12 = vmmov %vm18223_vm7 }
 0x4da   : > { %v7210_v45 = vld [vmem:[#allocation2] sm:$0xff] }
 0x4db   : > { %v13491_v21 = vcombine.high %v7210_v45, %v7210_v45  ;;  %v13490_v47 = vcombine.low %v7210_v45, %v7210_v45  ;;  %v7211_v22 = vld [vmem:[#allocation2 + $0x8] sm:$0xff] }
 0x4dc   : > { %v16653_v48 = vcombine.high %v7211_v22, %v7211_v22  ;;  %v16655_v50 = vcombine.low %v7211_v22, %v7211_v22  ;;  %v8097_v56 = vld [vmem:[#allocation2 + $0x4] sm:$0xff] }
 0x4dd   : > { %7238 = vrot.lane.b32.xlu1 %v13491_v21, %s15098_s21  ;;  %7236 = vrot.lane.b32.xlu0 %v13490_v47, %s15098_s21  ;;  %v16719_v57 = vcombine.high %v8097_v56, %v8097_v56  ;;  %v16721_v59 = vcombine.low %v8097_v56, %v8097_v56 }
 0x4df   : > { %v11166_v51 = vld [vmem:[#allocation2 + $0x10] sm:$0xff]  ;;  %v11167_v5 = vld [vmem:[#allocation2 + $0x18] sm:$0xff] }
 0x4e0   : > { %v16661_v34 = vcombine.low %v11166_v51, %v11166_v51  ;;  %v16663_v53 = vcombine.high %v11166_v51, %v11166_v51  ;;  %v16669_v54 = vcombine.low %v11167_v5, %v11167_v5  ;;  %v16671_v55 = vcombine.high %v11167_v5, %v11167_v5  ;;  %v16747_v1 = vld [vmem:[#allocation2 + $0x1c] ss:$0 sps:$4 sm:$0xff]  }
 0x4e1   : > { %7242 = vrot.lane.b32.xlu1 %v16653_v48, %s15098_s21  ;;  %7240 = vrot.lane.b32.xlu0 %v16655_v50, %s15098_s21 }
 0x4e5   : > { %7246 = vrot.lane.b32.xlu1 %v16663_v53, %s15098_s21  ;;  %7244 = vrot.lane.b32.xlu0 %v16661_v34, %s15098_s21 }
 0x4e9   : > { %7250 = vrot.lane.b32.xlu1 %v16671_v55, %s15098_s21  ;;  %7248 = vrot.lane.b32.xlu0 %v16669_v54, %s15098_s21 }
 0x4ed   : > { %7449 = vrot.lane.b32.xlu1 %v13491_v21, %s15099_s22  ;;  %7447 = vrot.lane.b32.xlu0 %v13490_v47, %s15099_s22 }
 0x4f1   : > { %7453 = vrot.lane.b32.xlu1 %v16653_v48, %s15099_s22  ;;  %7451 = vrot.lane.b32.xlu0 %v16655_v50, %s15099_s22 }
 0x4f5   : > { %7457 = vrot.lane.b32.xlu1 %v16663_v53, %s15099_s22  ;;  %7455 = vrot.lane.b32.xlu0 %v16661_v34, %s15099_s22 }
 0x4f9   : > { %7461 = vrot.lane.b32.xlu1 %v16671_v55, %s15099_s22  ;;  %7459 = vrot.lane.b32.xlu0 %v16669_v54, %s15099_s22 }
 0x4fd   : > { %7661 = vrot.lane.b32.xlu1 %v13491_v21, %s15100_s23  ;;  %7659 = vrot.lane.b32.xlu0 %v13490_v47, %s15100_s23 }
 0x501   : > { %7665 = vrot.lane.b32.xlu1 %v16653_v48, %s15100_s23  ;;  %7663 = vrot.lane.b32.xlu0 %v16655_v50, %s15100_s23 }
 0x505   : > { %7669 = vrot.lane.b32.xlu1 %v16663_v53, %s15100_s23  ;;  %7667 = vrot.lane.b32.xlu0 %v16661_v34, %s15100_s23 }
 0x509   : > { %7673 = vrot.lane.b32.xlu1 %v16671_v55, %s15100_s23  ;;  %7671 = vrot.lane.b32.xlu0 %v16669_v54, %s15100_s23  ;;  %s18253_s23 = smov 65  }
 0x50d   : > { %7880 = vrot.lane.b32.xlu1 %v13491_v21, %s15101_s24  ;;  %7878 = vrot.lane.b32.xlu0 %v13490_v47, %s15101_s24 }
 0x511   : > { %7884 = vrot.lane.b32.xlu1 %v16653_v48, %s15101_s24  ;;  %7882 = vrot.lane.b32.xlu0 %v16655_v50, %s15101_s24 }
 0x515   : > { %7888 = vrot.lane.b32.xlu1 %v16663_v53, %s15101_s24  ;;  %7886 = vrot.lane.b32.xlu0 %v16661_v34, %s15101_s24 }
 0x519   : > { %7892 = vrot.lane.b32.xlu1 %v16671_v55, %s15101_s24  ;;  %7890 = vrot.lane.b32.xlu0 %v16669_v54, %s15101_s24 }
 0x51d   : > { %8317 = vrot.lane.b32.xlu1 %v16719_v57, %s15102_s25  ;;  %8315 = vrot.lane.b32.xlu0 %v16721_v59, %s15102_s25 }
 0x521   : > { %8321 = vrot.lane.b32.xlu1 %v16729_v60, %s15102_s25  ;;  %8319 = vrot.lane.b32.xlu0 %v16733_v6, %s15102_s25 }
 0x525   : > { %8325 = vrot.lane.b32.xlu1 %v16739_v63, %s15102_s25  ;;  %8323 = vrot.lane.b32.xlu0 %v16741_v0, %s15102_s25 }
 0x529   : > { %8531 = vrot.lane.b32.xlu1 %v16721_v59, %s15103_s26  ;;  %8327 = vrot.lane.b32.xlu0 %v16747_v1, %s15102_s25  ;;  %s18260_s25 = smov 57  }
 0x52d   : > { %8535 = vrot.lane.b32.xlu1 %v16733_v6, %s15103_s26  ;;  %8533 = vrot.lane.b32.xlu0 %v16719_v57, %s15103_s26 }
 0x531   : > { %8539 = vrot.lane.b32.xlu1 %v16741_v0, %s15103_s26  ;;  %8537 = vrot.lane.b32.xlu0 %v16729_v60, %s15103_s26 }
 0x535   : > { %8543 = vrot.lane.b32.xlu1 %v16747_v1, %s15103_s26  ;;  %8541 = vrot.lane.b32.xlu0 %v16739_v63, %s15103_s26  ;;  %s18266_s26 = smov 56  }
 0x539   : > { %8749 = vrot.lane.b32.xlu1 %v16719_v57, %s15104_s27  ;;  %8747 = vrot.lane.b32.xlu0 %v16721_v59, %s15104_s27 }
 0x53d   : > { %8753 = vrot.lane.b32.xlu1 %v16729_v60, %s15104_s27  ;;  %8751 = vrot.lane.b32.xlu0 %v16733_v6, %s15104_s27 }
 0x541   : > { %8757 = vrot.lane.b32.xlu1 %v16739_v63, %s15104_s27  ;;  %8755 = vrot.lane.b32.xlu0 %v16741_v0, %s15104_s27 }
 0x545   : > { %8963 = vrot.lane.b32.xlu1 %v16721_v59, %s15105_s28  ;;  %8759 = vrot.lane.b32.xlu0 %v16747_v1, %s15104_s27 }
 0x549   : > { %8967 = vrot.lane.b32.xlu1 %v16733_v6, %s15105_s28  ;;  %8965 = vrot.lane.b32.xlu0 %v16719_v57, %s15105_s28 }
 0x54d   : > { %8971 = vrot.lane.b32.xlu1 %v16741_v0, %s15105_s28  ;;  %8969 = vrot.lane.b32.xlu0 %v16729_v60, %s15105_s28 }
 0x54f   : > { %v7239_v4 = vpop.permute.xlu1 %7238  ;;  %v7237_v7 = vpop.permute.xlu0 %7236 }
 0x550   : > { %v7252_v8 = vsel %vm265_vm0, %v7237_v7, %v7239_v4 }
 0x551   : > { %8975 = vrot.lane.b32.xlu1 %v16747_v1, %s15105_s28  ;;  %8973 = vrot.lane.b32.xlu0 %v16739_v63, %s15105_s28  ;;  %v7264_v14 = vsel %vm204_vm13, %v7252_v8, 0 }
 0x553   : > { %v7243_v11 = vpop.permute.xlu1 %7242  ;;  %v7241_v12 = vpop.permute.xlu0 %7240 }
 0x554   : > { %v7253_v13 = vsel %vm265_vm0, %v7239_v4, %v7241_v12  ;;  %v7254_v3 = vsel %vm265_vm0, %v7241_v12, %v7243_v11 }
 0x555   : > { %9181 = vrot.lane.b32.xlu1 %v16719_v57, %s15106_s29  ;;  %9179 = vrot.lane.b32.xlu0 %v16721_v59, %s15106_s29  ;;  %v7270_v24 = vsel %vm204_vm13, %v7254_v3, 0 }
 0x556   : > { %13498 = vmatprep.subr.msk.bf16.mxu0 %vm204_vm13, %v7253_v13 }
 0x557   : > { %7285 = vmatpush1.bf16.msra.mxu0 %v7264_v14  ;;  %v7247_v15 = vpop.permute.xlu1 %7246  ;;  %v7245_v16 = vpop.permute.xlu0 %7244 }
 0x558   : > { %v7255_v19 = vsel %vm265_vm0, %v7243_v11, %v7245_v16  ;;  %v7256_v10 = vsel %vm265_vm0, %v7245_v16, %v7247_v15 }
 0x559   : > { %9185 = vrot.lane.b32.xlu1 %v16729_v60, %s15106_s29  ;;  %9183 = vrot.lane.b32.xlu0 %v16733_v6, %s15106_s29  ;;  %v7276_v31 = vsel %vm204_vm13, %v7256_v10, 0 }
 0x55a   : > { %13499 = vmatmul.mubr.msk.bf16.vlgmr.msra.gmra.mrb[8].mxu0 %vm7259_vm14, %v13489_v18  ;;  %13500 = vmatprep.subr.msk.bf16.mxu1 %vm204_vm13, %v7255_v19 }
 0x55b   : > { %7326 = vmatpush1.bf16.msra.mxu1 %v7270_v24  ;;  %v7251_v27 = vpop.permute.xlu1 %7250  ;;  %v7249_v28 = vpop.permute.xlu0 %7248  ;;  %7398 = vmatprep.mubr.bf16.mxu0 %v16333_v33 }
 0x55c   : > { %v7258_v17 = vsel %vm265_vm0, %v7249_v28, %v7251_v27  ;;  %v7257_v20 = vsel %vm265_vm0, %v7247_v15, %v7249_v28  ;;  %14010 = vmatprep.subr.bf16.mxu1 %v15107_v62  ;;  %v13512_v15 = vld [vmem:[%s18185_s3 + $0x8] sm:$0xf]  ;;  %vm18217_vm0 = vcmask 1039360  }
 0x55d   : > { %9189 = vrot.lane.b32.xlu1 %v16739_v63, %s15106_s29  ;;  %9187 = vrot.lane.b32.xlu0 %v16741_v0, %s15106_s29  ;;  %v7282_v29 = vsel %vm204_vm13, %v7258_v17, 0  ;;  %vm18221_vm15 = vmmov %vm18217_vm0 }
 0x55e   : > { %13501 = vmatmul.mubr.msk.bf16.vlgmr.msra.gmra.mrb[8].mxu1 %vm7259_vm14, %v13489_v18  ;;  %13502 = vmatprep.subr.msk.bf16.mxu0 %vm204_vm13, %v7257_v20  ;;  %vm18222_vm2 = vmmov %vm18217_vm0 }
 0x55f   : > { %7367 = vmatpush1.bf16.msra.mxu0 %v7276_v31  ;;  %14011 = vmatpush3.bf16.msra.mxu1 %v7282_v29  ;;  %v7450_v23 = vpop.permute.xlu1 %7449  ;;  %v7448_v30 = vpop.permute.xlu0 %7447 }
 0x560   : > { %14012 = vmatprep.mubr.msk.bf16.mxu1 %vm15108_vm3, %v15107_v62  ;;  %v7463_v32 = vsel %vm478_vm4, %v7448_v30, %v7450_v23 }
 0x561   : > { %9395 = vrot.lane.b32.xlu1 %v16721_v59, %s15109_s6  ;;  %9191 = vrot.lane.b32.xlu0 %v16747_v1, %s15106_s29  ;;  %v7474_v36 = vsel %vm204_vm13, %v7463_v32, 0 }
 0x562   : > { %13503 = vmatmul.mubr.msk.bf16.vlgmr.msra.gmra.mrb[12].mxu0 %vm7259_vm14, %v13489_v18 }
 0x563   : > { %v7454_v35 = vpop.permute.xlu1 %7453  ;;  %v7452_v2 = vpop.permute.xlu0 %7451  ;;  %7526 = vmatprep.mubr.bf16.mxu0 %v16333_v33 }
 0x564   : > { %v7464_v25 = vsel %vm478_vm4, %v7450_v23, %v7452_v2  ;;  %v7465_v37 = vsel %vm478_vm4, %v7452_v2, %v7454_v35  ;;  %v9830_v2 = vld [vmem:[#allocation2 + $0x1c] sm:$0xff] }
 0x565   : > { %9399 = vrot.lane.b32.xlu1 %v16733_v6, %s15109_s6  ;;  %9397 = vrot.lane.b32.xlu0 %v16719_v57, %s15109_s6  ;;  %v7480_v42 = vsel %vm204_vm13, %v7465_v37, 0 }
 0x566   : > { %14013 = vmatmul.mubr.msk.bf16.vlgmr.msra.gmra.mrb[12].mxu1 %vm7259_vm14, %v13489_v18  ;;  %13505 = vmatprep.subr.msk.bf16.mxu0 %vm204_vm13, %v7464_v25 }
 0x567   : > { %7495 = vmatpush1.bf16.msra.mxu0 %v7474_v36  ;;  %v7458_v38 = vpop.permute.xlu1 %7457  ;;  %v7456_v39 = vpop.permute.xlu0 %7455  ;;  %7567 = vmatprep.mubr.bf16.mxu1 %v16333_v33 }
 0x568   : > { %v7466_v41 = vsel %vm478_vm4, %v7454_v35, %v7456_v39  ;;  %v7467_v26 = vsel %vm478_vm4, %v7456_v39, %v7458_v38  ;;  %v16930_v39 = vcombine.low %v9830_v2, %v9830_v2 }
 0x569   : > { %9403 = vrot.lane.b32.xlu1 %v16741_v0, %s15109_s6  ;;  %9401 = vrot.lane.b32.xlu0 %v16729_v60, %s15109_s6  ;;  %v7486_v51 = vsel %vm204_vm13, %v7467_v26, 0 }
 0x56a   : > { %13506 = vmatmul.mubr.msk.bf16.vlgmr.msra.gmra.mrb[8].mxu0 %vm7259_vm14, %v7209_v40  ;;  %13507 = vmatprep.subr.msk.bf16.mxu1 %vm204_vm13, %v7466_v41 }
 0x56b   : > { %7536 = vmatpush1.bf16.msra.mxu1 %v7480_v42  ;;  %v7462_v43 = vpop.permute.xlu1 %7461  ;;  %v7460_v45 = vpop.permute.xlu0 %7459  ;;  %7608 = vmatprep.mubr.bf16.mxu0 %v16333_v33 }
 0x56c   : > { %v7469_v21 = vsel %vm478_vm4, %v7460_v45, %v7462_v43  ;;  %v7468_v47 = vsel %vm478_vm4, %v7458_v38, %v7460_v45  ;;  %14016 = vmatprep.subr.bf16.mxu1 %v15107_v62  ;;  %vm18218_vm4 = vmmov %vm18217_vm0 }
 0x56d   : > { %9407 = vrot.lane.b32.xlu1 %v16747_v1, %s15109_s6  ;;  %9405 = vrot.lane.b32.xlu0 %v16739_v63, %s15109_s6  ;;  %v7492_v22 = vsel %vm204_vm13, %v7469_v21, 0  ;;  %v16945_v21 = vcombine.high %v9830_v2, %v9830_v2 }
 0x56e   : > { %13508 = vmatmul.mubr.msk.bf16.vlgmr.msra.gmra.mrb[8].mxu1 %vm7259_vm14, %v7209_v40  ;;  %13509 = vmatprep.subr.msk.bf16.mxu0 %vm204_vm13, %v7468_v47 }
 0x56f   : > { %7577 = vmatpush1.bf16.msra.mxu0 %v7486_v51  ;;  %14017 = vmatpush3.bf16.msra.mxu1 %v7492_v22  ;;  %v7662_v5 = vpop.permute.xlu1 %7661  ;;  %v7660_v56 = vpop.permute.xlu0 %7659 }
 0x570   : > { %14018 = vmatprep.mubr.msk.bf16.mxu1 %vm15108_vm3, %v15107_v62  ;;  %v7675_v4 = vsel %vm729_vm5, %v7660_v56, %v7662_v5 }
 0x571   : > { %9613 = vrot.lane.b32.xlu1 %v16719_v57, %s15110_s9  ;;  %9611 = vrot.lane.b32.xlu0 %v16721_v59, %s15110_s9  ;;  %v7686_v12 = vsel %vm204_vm13, %v7675_v4, 0 }
 0x572   : > { %13510 = vmatmul.mubr.msk.bf16.vlgmr.msra.gmra.mrb[12].mxu0 %vm7259_vm14, %v7209_v40 }
 0x573   : > { %v7666_v7 = vpop.permute.xlu1 %7665  ;;  %v7664_v8 = vpop.permute.xlu0 %7663  ;;  %7738 = vmatprep.mubr.bf16.mxu0 %v16333_v33 }
 0x574   : > { %v7676_v11 = vsel %vm729_vm5, %v7662_v5, %v7664_v8  ;;  %v7677_v13 = vsel %vm729_vm5, %v7664_v8, %v7666_v7 }
 0x575   : > { %9617 = vrot.lane.b32.xlu1 %v16729_v60, %s15110_s9  ;;  %9615 = vrot.lane.b32.xlu0 %v16733_v6, %s15110_s9  ;;  %v7692_v18 = vsel %vm204_vm13, %v7677_v13, 0 }
 0x576   : > { %14019 = vmatmul.mubr.msk.bf16.vlgmr.msra.gmra.mrb[12].mxu1 %vm7259_vm14, %v7209_v40  ;;  %13513 = vmatprep.subr.msk.bf16.mxu0 %vm204_vm13, %v7676_v11  ;;  %v13520_v40 = vld [vmem:[%s18185_s3 + $0xc] sm:$0xf] }
 0x577   : > { %7707 = vmatpush1.bf16.msra.mxu0 %v7686_v12  ;;  %v7670_v14 = vpop.permute.xlu1 %7669  ;;  %v7668_v3 = vpop.permute.xlu0 %7667  ;;  %7779 = vmatprep.mubr.bf16.mxu1 %v16333_v33  ;;  %v8129_v12 = vsel %vm204_vm13, %v16733_v6, 0 }
 0x578   : > { %v7678_v16 = vsel %vm729_vm5, %v7666_v7, %v7668_v3  ;;  %v7679_v19 = vsel %vm729_vm5, %v7668_v3, %v7670_v14  ;;  %v8123_v7 = vsel %vm204_vm13, %v16721_v59, 0  ;;  %v13528_v3 = vld [vmem:[%s18185_s3 + $0x10] sm:$0xf] }
 0x579   : > { %9621 = vrot.lane.b32.xlu1 %v16739_v63, %s15110_s9  ;;  %9619 = vrot.lane.b32.xlu0 %v16741_v0, %s15110_s9  ;;  %v7698_v20 = vsel %vm204_vm13, %v7679_v19, 0 }
 0x57a   : > { %13514 = vmatmul.mubr.msk.bf16.vlgmr.msra.gmra.mrb[8].mxu0 %vm7259_vm14, %v13512_v15  ;;  %13515 = vmatprep.subr.msk.bf16.mxu1 %vm204_vm13, %v7678_v16 }
 0x57b   : > { %7748 = vmatpush1.bf16.msra.mxu1 %v7692_v18  ;;  %v7674_v24 = vpop.permute.xlu1 %7673  ;;  %v7672_v10 = vpop.permute.xlu0 %7671  ;;  %7820 = vmatprep.mubr.bf16.mxu0 %v16333_v33 }
 0x57c   : > { %v7681_v27 = vsel %vm729_vm5, %v7672_v10, %v7674_v24  ;;  %v7680_v28 = vsel %vm729_vm5, %v7670_v14, %v7672_v10  ;;  %14022 = vmatprep.subr.bf16.mxu1 %v15107_v62  ;;  %v8141_v24 = vsel %vm204_vm13, %v16747_v1, 0  ;;  %vm18219_vm5 = vmmov %vm18217_vm0 }
 0x57d   : > { %9851 = vrot.lane.b32.xlu1 %v16721_v59, %s15111_s12  ;;  %9623 = vrot.lane.b32.xlu0 %v16747_v1, %s15110_s9  ;;  %v7704_v17 = vsel %vm204_vm13, %v7681_v27, 0  ;;  %s18279_s9 = smov 47  }
 0x57e   : > { %13516 = vmatmul.mubr.msk.bf16.vlgmr.msra.gmra.mrb[8].mxu1 %vm7259_vm14, %v13512_v15  ;;  %13517 = vmatprep.subr.msk.bf16.mxu0 %vm204_vm13, %v7680_v28 }
 0x57f   : > { %7789 = vmatpush1.bf16.msra.mxu0 %v7698_v20  ;;  %14023 = vmatpush3.bf16.msra.mxu1 %v7704_v17  ;;  %v7881_v29 = vpop.permute.xlu1 %7880  ;;  %v7879_v31 = vpop.permute.xlu0 %7878 }
 0x580   : > { %14024 = vmatprep.mubr.msk.bf16.mxu1 %vm15108_vm3, %v15107_v62  ;;  %v7894_v23 = vsel %vm987_vm6, %v7879_v31, %v7881_v29 }
 0x581   : > { %9855 = vrot.lane.b32.xlu1 %v16733_v6, %s15111_s12  ;;  %9853 = vrot.lane.b32.xlu0 %v16719_v57, %s15111_s12  ;;  %v7905_v25 = vsel %vm204_vm13, %v7894_v23, 0 }
 0x582   : > { %13518 = vmatmul.mubr.msk.bf16.vlgmr.msra.gmra.mrb[12].mxu0 %vm7259_vm14, %v13512_v15 }
 0x583   : > { %v7885_v30 = vpop.permute.xlu1 %7884  ;;  %v7883_v32 = vpop.permute.xlu0 %7882  ;;  %7957 = vmatprep.mubr.bf16.mxu0 %v16333_v33 }
 0x584   : > { %v7895_v35 = vsel %vm987_vm6, %v7881_v29, %v7883_v32  ;;  %v7896_v36 = vsel %vm987_vm6, %v7883_v32, %v7885_v30 }
 0x585   : > { %9859 = vrot.lane.b32.xlu1 %v16741_v0, %s15111_s12  ;;  %9857 = vrot.lane.b32.xlu0 %v16729_v60, %s15111_s12  ;;  %v7911_v42 = vsel %vm204_vm13, %v7896_v36, 0 }
 0x586   : > { %14025 = vmatmul.mubr.msk.bf16.vlgmr.msra.gmra.mrb[12].mxu1 %vm7259_vm14, %v13512_v15  ;;  %13521 = vmatprep.subr.msk.bf16.mxu0 %vm204_vm13, %v7895_v35  ;;  %v8135_v15 = vsel %vm204_vm13, %v16741_v0, 0 }
 0x587   : > { %7926 = vmatpush1.bf16.msra.mxu0 %v7905_v25  ;;  %v7889_v37 = vpop.permute.xlu1 %7888  ;;  %v7887_v38 = vpop.permute.xlu0 %7886  ;;  %7998 = vmatprep.mubr.bf16.mxu1 %v16333_v33  ;;  %v13543_v25 = vld [vmem:[%s18185_s3 + $0x14] sm:$0xf] }
 0x588   : > { %v7897_v41 = vsel %vm987_vm6, %v7885_v30, %v7887_v38  ;;  %v7898_v26 = vsel %vm987_vm6, %v7887_v38, %v7889_v37 }
 0x589   : > { %9863 = vrot.lane.b32.xlu1 %v16930_v39, %s15111_s12  ;;  %9861 = vrot.lane.b32.xlu0 %v16739_v63, %s15111_s12  ;;  %v7917_v5 = vsel %vm204_vm13, %v7898_v26, 0 }
 0x58a   : > { %13522 = vmatmul.mubr.msk.bf16.vlgmr.msra.gmra.mrb[8].mxu0 %vm7259_vm14, %v13520_v40  ;;  %13523 = vmatprep.subr.msk.bf16.mxu1 %vm204_vm13, %v7897_v41 }
 0x58b   : > { %7967 = vmatpush1.bf16.msra.mxu1 %v7911_v42  ;;  %v7893_v43 = vpop.permute.xlu1 %7892  ;;  %v7891_v45 = vpop.permute.xlu0 %7890  ;;  %8039 = vmatprep.mubr.bf16.mxu0 %v16333_v33 }
 0x58c   : > { %v7900_v47 = vsel %vm987_vm6, %v7891_v45, %v7893_v43  ;;  %v7899_v22 = vsel %vm987_vm6, %v7889_v37, %v7891_v45  ;;  %14028 = vmatprep.subr.bf16.mxu1 %v15107_v62  ;;  %vm18220_vm6 = vmmov %vm18217_vm0 }
 0x58d   : > { %10070 = vrot.lane.b32.xlu1 %v16721_v59, %s15112_s17  ;;  %9865 = vrot.lane.b32.xlu0 %v16945_v21, %s15111_s12  ;;  %v7923_v51 = vsel %vm204_vm13, %v7900_v47, 0 }
 0x58e   : > { %13524 = vmatmul.mubr.msk.bf16.vlgmr.msra.gmra.mrb[8].mxu1 %vm7259_vm14, %v13520_v40  ;;  %13525 = vmatprep.subr.msk.bf16.mxu0 %vm204_vm13, %v7899_v22 }
 0x58f   : > { %8008 = vmatpush1.bf16.msra.mxu0 %v7917_v5  ;;  %14029 = vmatpush3.bf16.msra.mxu1 %v7923_v51  ;;  %v8318_v56 = vpop.permute.xlu1 %8317  ;;  %v8316_v4 = vpop.permute.xlu0 %8315 }
 0x590   : > { %13536 = vmatprep.subr.msk.bf16.mxu0 %vm204_vm13, %v16719_v57  ;;  %13538 = vmatprep.subr.msk.bf16.mxu1 %vm204_vm13, %v16729_v60  ;;  %v8329_v10 = vsel %vm18218_vm4, %v8316_v4, %v8318_v56 }
 0x591   : > { %10074 = vrot.lane.b32.xlu1 %v16733_v6, %s15112_s17  ;;  %10072 = vrot.lane.b32.xlu0 %v16719_v57, %s15112_s17  ;;  %v8339_v1 = vsel %vm204_vm13, %v8329_v10, 0 }
 0x592   : > { %13526 = vmatmul.mubr.msk.bf16.vlgmr.msra.gmra.mrb[12].mxu0 %vm7259_vm14, %v13520_v40  ;;  %14030 = vmatprep.mubr.msk.bf16.mxu1 %vm15108_vm3, %v15107_v62 }
 0x593   : > { %8144 = vmatpush1.bf16.msra.mxu0 %v8123_v7  ;;  %v8322_v8 = vpop.permute.xlu1 %8321  ;;  %v8320_v11 = vpop.permute.xlu0 %8319  ;;  %8175 = vmatprep.mubr.bf16.mxu0 %v16333_v33 }
 0x594   : > { %13540 = vmatprep.subr.msk.bf16.mxu0 %vm204_vm13, %v16739_v63  ;;  %v8330_v16 = vsel %vm18217_vm0, %v8318_v56, %v8320_v11  ;;  %v8331_v20 = vsel %vm18220_vm6, %v8320_v11, %v8322_v8  ;;  %vm18229_vm0 = vcmask 965632  }
 0x595   : > { %10078 = vrot.lane.b32.xlu1 %v16741_v0, %s15112_s17  ;;  %10076 = vrot.lane.b32.xlu0 %v16729_v60, %s15112_s17  ;;  %v8345_v30 = vsel %vm204_vm13, %v8331_v20, 0  ;;  %vm18230_vm4 = vmmov %vm18229_vm0 }
 0x596   : > { %14031 = vmatmul.mubr.msk.bf16.vlgmr.msra.gmra.mrb[12].mxu1 %vm7259_vm14, %v13520_v40  ;;  %vm18232_vm6 = vmmov %vm18229_vm0 }
 0x597   : > { %8185 = vmatpush1.bf16.msra.mxu1 %v8129_v12  ;;  %v8326_v13 = vpop.permute.xlu1 %8325  ;;  %v8324_v14 = vpop.permute.xlu0 %8323  ;;  %8216 = vmatprep.mubr.bf16.mxu1 %v16333_v33  ;;  %v13551_v12 = vld [vmem:[%s18185_s3 + $0x18] sm:$0xf] }
 0x598   : > { %14034 = vmatprep.subr.bf16.mxu1 %v15107_v62  ;;  %v8332_v27 = vsel %vm18219_vm5, %v8322_v8, %v8324_v14  ;;  %v8333_v32 = vsel %vm18222_vm2, %v8324_v14, %v8326_v13  ;;  %vm18231_vm5 = vmmov %vm18229_vm0 }
 0x599   : > { %10082 = vrot.lane.b32.xlu1 %v16930_v39, %s15112_s17  ;;  %10080 = vrot.lane.b32.xlu0 %v16739_v63, %s15112_s17  ;;  %v8351_v36 = vsel %vm204_vm13, %v8333_v32, 0  ;;  %vm18234_vm2 = vmmov %vm18229_vm0  ;;  %v13559_v32 = vld [vmem:[%s18185_s3 + $0x1c] sm:$0xf] }
 0x59a   : > { %13537 = vmatmul.mubr.msk.bf16.vlgmr.msra.gmra.mrb[8].mxu0 %vm7259_vm14, %v13528_v3 }
 0x59b   : > { %8226 = vmatpush1.bf16.msra.mxu0 %v8135_v15  ;;  %v8532_v18 = vpop.permute.xlu1 %8531  ;;  %v8328_v19 = vpop.permute.xlu0 %8327  ;;  %8257 = vmatprep.mubr.bf16.mxu0 %v16333_v33 }
 0x59c   : > { %13544 = vmatprep.subr.msk.bf16.mxu0 %vm204_vm13, %v8330_v16  ;;  %v8334_v29 = vsel %vm18221_vm15, %v8326_v13, %v8328_v19  ;;  %v8357_v41 = vsel %vm204_vm13, %v8328_v19, 0  ;;  %vm18233_vm15 = vmmov %vm18229_vm0 }
 0x59d   : > { %10289 = vrot.lane.b32.xlu1 %v16721_v59, %s15113_s30  ;;  %10084 = vrot.lane.b32.xlu0 %v16945_v21, %s15112_s17  ;;  %s15005_s17 = smul.u32 56, %s18360_s16 }
 0x59e   : > { %13539 = vmatmul.mubr.msk.bf16.vlgmr.msra.gmra.mrb[8].mxu1 %vm7259_vm14, %v13528_v3 }
 0x59f   : > { %14035 = vmatpush3.bf16.msra.mxu1 %v8141_v24  ;;  %v8536_v28 = vpop.permute.xlu1 %8535  ;;  %v8534_v17 = vpop.permute.xlu0 %8533  ;;  %14036 = vmatprep.mubr.msk.bf16.mxu1 %vm15108_vm3, %v15107_v62 }
 0x5a0   : > { %13546 = vmatprep.subr.msk.bf16.mxu1 %vm204_vm13, %v8332_v27  ;;  %v8546_v37 = vsel %vm18223_vm7, %v8534_v17, %v8536_v28  ;;  %v8545_v42 = vsel %vm18224_vm8, %v8532_v18, %v8534_v17  ;;  %vm18235_vm7 = vcmask 957440  }
 0x5a1   : > { %10293 = vrot.lane.b32.xlu1 %v16733_v6, %s15113_s30  ;;  %10291 = vrot.lane.b32.xlu0 %v16719_v57, %s15113_s30  ;;  %v8555_v47 = vsel %vm204_vm13, %v8545_v42, 0  ;;  %vm18236_vm8 = vmmov %vm18235_vm7 }
 0x5a2   : > { %13541 = vmatmul.mubr.msk.bf16.vlgmr.msra.gmra.mrb[12].mxu0 %vm7259_vm14, %v13528_v3 }
 0x5a3   : > { %8360 = vmatpush1.bf16.msra.mxu0 %v8339_v1  ;;  %v8540_v31 = vpop.permute.xlu1 %8539  ;;  %v8538_v23 = vpop.permute.xlu0 %8537  ;;  %8391 = vmatprep.mubr.bf16.mxu0 %v16333_v33 }
 0x5a4   : > { %13548 = vmatprep.subr.msk.bf16.mxu0 %vm204_vm13, %v8334_v29  ;;  %v8548_v26 = vsel %vm18225_vm9, %v8538_v23, %v8540_v31  ;;  %v8547_v22 = vsel %vm18226_vm10, %v8536_v28, %v8538_v23  ;;  %vm18237_vm9 = vmmov %vm18235_vm7 }
 0x5a5   : > { %10297 = vrot.lane.b32.xlu1 %v16741_v0, %s15113_s30  ;;  %10295 = vrot.lane.b32.xlu0 %v16729_v60, %s15113_s30  ;;  %v8561_v4 = vsel %vm204_vm13, %v8547_v22, 0  ;;  %vm18238_vm10 = vmmov %vm18235_vm7 }
 0x5a6   : > { %14037 = vmatmul.mubr.msk.bf16.vlgmr.msra.gmra.mrb[12].mxu1 %vm7259_vm14, %v13528_v3 }
 0x5a7   : > { %8401 = vmatpush1.bf16.msra.mxu1 %v8345_v30  ;;  %v8544_v35 = vpop.permute.xlu1 %8543  ;;  %v8542_v2 = vpop.permute.xlu0 %8541  ;;  %8432 = vmatprep.mubr.bf16.mxu1 %v16333_v33 }
 0x5a8   : > { %14040 = vmatprep.subr.bf16.mxu1 %v15107_v62  ;;  %v8550_v51 = vsel %vm18227_vm11, %v8542_v2, %v8544_v35  ;;  %v8549_v7 = vsel %vm18228_vm12, %v8540_v31, %v8542_v2  ;;  %v8573_v16 = vsel %vm204_vm13, %v8544_v35, 0  ;;  %vm18239_vm11 = vmmov %vm18235_vm7 }
 0x5a9   : > { %10301 = vrot.lane.b32.xlu1 %v16930_v39, %s15113_s30  ;;  %10299 = vrot.lane.b32.xlu0 %v16739_v63, %s15113_s30  ;;  %v8567_v13 = vsel %vm204_vm13, %v8549_v7, 0  ;;  %vm18240_vm12 = vmmov %vm18235_vm7 }
 0x5aa   : > { %13545 = vmatmul.mubr.msk.bf16.vlgmr.msra.gmra.mrb[8].mxu0 %vm7259_vm14, %v13543_v25 }
 0x5ab   : > { %8442 = vmatpush1.bf16.msra.mxu0 %v8351_v36  ;;  %v8750_v38 = vpop.permute.xlu1 %8749  ;;  %v8748_v40 = vpop.permute.xlu0 %8747  ;;  %8473 = vmatprep.mubr.bf16.mxu0 %v16333_v33 }
 0x5ac   : > { %13552 = vmatprep.subr.msk.bf16.mxu0 %vm204_vm13, %v8546_v37  ;;  %v8761_v18 = vsel %vm18230_vm4, %v8748_v40, %v8750_v38 }
 0x5ad   : > { %10508 = vrot.lane.b32.xlu1 %v16721_v59, %s15114_s8  ;;  %10303 = vrot.lane.b32.xlu0 %v16945_v21, %s15113_s30  ;;  %v8771_v27 = vsel %vm204_vm13, %v8761_v18, 0 }
 0x5ae   : > { %13547 = vmatmul.mubr.msk.bf16.vlgmr.msra.gmra.mrb[8].mxu1 %vm7259_vm14, %v13543_v25 }
 0x5af   : > { %14041 = vmatpush3.bf16.msra.mxu1 %v8357_v41  ;;  %v8754_v43 = vpop.permute.xlu1 %8753  ;;  %v8752_v45 = vpop.permute.xlu0 %8751  ;;  %14042 = vmatprep.mubr.msk.bf16.mxu1 %vm15108_vm3, %v15107_v62 }
 0x5b0   : > { %13554 = vmatprep.subr.msk.bf16.mxu1 %vm204_vm13, %v8548_v26  ;;  %v8762_v14 = vsel %vm18229_vm0, %v8750_v38, %v8752_v45  ;;  %v8763_v28 = vsel %vm18232_vm6, %v8752_v45, %v8754_v43  ;;  %vm18241_vm0 = vcmask 318464  }
 0x5b1   : > { %10512 = vrot.lane.b32.xlu1 %v16733_v6, %s15114_s8  ;;  %10510 = vrot.lane.b32.xlu0 %v16719_v57, %s15114_s8  ;;  %v8777_v29 = vsel %vm204_vm13, %v8763_v28, 0  ;;  %vm18242_vm4 = vmmov %vm18241_vm0 }
 0x5b2   : > { %13549 = vmatmul.mubr.msk.bf16.vlgmr.msra.gmra.mrb[12].mxu0 %vm7259_vm14, %v13543_v25  ;;  %vm18244_vm6 = vmmov %vm18241_vm0 }
 0x5b3   : > { %8576 = vmatpush1.bf16.msra.mxu0 %v8555_v47  ;;  %v8758_v5 = vpop.permute.xlu1 %8757  ;;  %v8756_v56 = vpop.permute.xlu0 %8755  ;;  %8607 = vmatprep.mubr.bf16.mxu0 %v16333_v33 }
 0x5b4   : > { %13556 = vmatprep.subr.msk.bf16.mxu0 %vm204_vm13, %v8550_v51  ;;  %v8764_v19 = vsel %vm18231_vm5, %v8754_v43, %v8756_v56  ;;  %v8765_v31 = vsel %vm18234_vm2, %v8756_v56, %v8758_v5  ;;  %vm18243_vm5 = vmmov %vm18241_vm0 }
 0x5b5   : > { %10516 = vrot.lane.b32.xlu1 %v16741_v0, %s15114_s8  ;;  %10514 = vrot.lane.b32.xlu0 %v16729_v60, %s15114_s8  ;;  %v8783_v35 = vsel %vm204_vm13, %v8765_v31, 0  ;;  %vm18246_vm2 = vmmov %vm18241_vm0 }
 0x5b6   : > { %14043 = vmatmul.mubr.msk.bf16.vlgmr.msra.gmra.mrb[12].mxu1 %vm7259_vm14, %v13543_v25 }
 0x5b7   : > { %8617 = vmatpush1.bf16.msra.mxu1 %v8561_v4  ;;  %v17068_v8 = vpop.permute.xlu1 %8963  ;;  %v8760_v11 = vpop.permute.xlu0 %8759  ;;  %8648 = vmatprep.mubr.bf16.mxu1 %v16333_v33 }
 0x5b8   : > { %14046 = vmatprep.subr.bf16.mxu1 %v15107_v62  ;;  %v8766_v17 = vsel %vm18233_vm15, %v8758_v5, %v8760_v11  ;;  %v8789_v37 = vsel %vm204_vm13, %v8760_v11, 0  ;;  %v13567_v5 = vld [vmem:[%s18185_s3 + $0x20] sm:$0xf]  ;;  %vm18245_vm15 = vmmov %vm18241_vm0 }
 0x5b9   : > { %10520 = vrot.lane.b32.xlu1 %v16930_v39, %s15114_s8  ;;  %10518 = vrot.lane.b32.xlu0 %v16739_v63, %s15114_s8 }
 0x5ba   : > { %13553 = vmatmul.mubr.msk.bf16.vlgmr.msra.gmra.mrb[8].mxu0 %vm7259_vm14, %v13551_v12 }
 0x5bb   : > { %8658 = vmatpush1.bf16.msra.mxu0 %v8567_v13  ;;  %v17082_v3 = vpop.permute.xlu1 %8967  ;;  %v8966_v15 = vpop.permute.xlu0 %8965  ;;  %8689 = vmatprep.mubr.bf16.mxu0 %v16333_v33 }
 0x5bc   : > { %13560 = vmatprep.subr.msk.bf16.mxu0 %vm204_vm13, %v8762_v14  ;;  %v8978_v2 = vsel %vm18235_vm7, %v8966_v15, %v17082_v3  ;;  %v8977_v38 = vsel %vm18236_vm8, %v17068_v8, %v8966_v15  ;;  %vm18247_vm7 = vcmask 310272  }
 0x5bd   : > { %10727 = vrot.lane.b32.xlu1 %v16721_v59, %s15115_s13  ;;  %10522 = vrot.lane.b32.xlu0 %v16945_v21, %s15114_s8  ;;  %vm18248_vm8 = vmmov %vm18247_vm7  ;;  %s197_s8 = scalar_lea.vmem %s18186_s4, %s15005_s17 }
 0x5be   : > { %13555 = vmatmul.mubr.msk.bf16.vlgmr.msra.gmra.mrb[8].mxu1 %vm7259_vm14, %v13551_v12 }
 0x5bf   : > { %14047 = vmatpush3.bf16.msra.mxu1 %v8573_v16  ;;  %v17094_v24 = vpop.permute.xlu1 %8971  ;;  %v8970_v10 = vpop.permute.xlu0 %8969  ;;  %14048 = vmatprep.mubr.msk.bf16.mxu1 %vm15108_vm3, %v15107_v62 }
 0x5c0   : > { %13562 = vmatprep.subr.msk.bf16.mxu1 %vm204_vm13, %v8764_v19  ;;  %v8980_v40 = vsel %vm18237_vm9, %v8970_v10, %v17094_v24  ;;  %v8979_v26 = vsel %vm18238_vm10, %v17082_v3, %v8970_v10  ;;  %v13575_v10 = vld [vmem:[%s18185_s3 + $0x24] sm:$0xf]  ;;  %vm18249_vm9 = vmmov %vm18247_vm7 }
 0x5c1   : > { %10731 = vrot.lane.b32.xlu1 %v16733_v6, %s15115_s13  ;;  %10729 = vrot.lane.b32.xlu0 %v16719_v57, %s15115_s13  ;;  %vm18250_vm10 = vmmov %vm18247_vm7 }
 0x5c2   : > { %13557 = vmatmul.mubr.msk.bf16.vlgmr.msra.gmra.mrb[12].mxu0 %vm7259_vm14, %v13551_v12 }
 0x5c3   : > { %8792 = vmatpush1.bf16.msra.mxu0 %v8771_v27  ;;  %v17107_v1 = vpop.permute.xlu1 %8975  ;;  %v8974_v20 = vpop.permute.xlu0 %8973  ;;  %8823 = vmatprep.mubr.bf16.mxu0 %v16333_v33 }
 0x5c4   : > { %13564 = vmatprep.subr.msk.bf16.mxu0 %vm204_vm13, %v8766_v17  ;;  %v8982_v43 = vsel %vm18239_vm11, %v8974_v20, %v17107_v1  ;;  %vm18251_vm11 = vmmov %vm18247_vm7 }
 0x5c5   : > { %10735 = vrot.lane.b32.xlu1 %v16741_v0, %s15115_s13  ;;  %10733 = vrot.lane.b32.xlu0 %v16729_v60, %s15115_s13 }
 0x5c6   : > { %14049 = vmatmul.mubr.msk.bf16.vlgmr.msra.gmra.mrb[12].mxu1 %vm7259_vm14, %v13551_v12 }
 0x5c7   : > { %8833 = vmatpush1.bf16.msra.mxu1 %v8777_v29  ;;  %v17118_v23 = vpop.permute.xlu1 %9181  ;;  %v9180_v30 = vpop.permute.xlu0 %9179  ;;  %8864 = vmatprep.mubr.bf16.mxu1 %v16333_v33 }
 0x5c8   : > { %14052 = vmatprep.subr.bf16.mxu1 %v15107_v62 }
 0x5c9   : > { %10739 = vrot.lane.b32.xlu1 %v16930_v39, %s15115_s13  ;;  %10737 = vrot.lane.b32.xlu0 %v16739_v63, %s15115_s13 }
 0x5ca   : > { %13561 = vmatmul.mubr.msk.bf16.vlgmr.msra.gmra.mrb[8].mxu0 %vm7259_vm14, %v13559_v32 }
 0x5cb   : > { %8874 = vmatpush1.bf16.msra.mxu0 %v8783_v35  ;;  %v17133_v25 = vpop.permute.xlu1 %9185  ;;  %v9184_v36 = vpop.permute.xlu0 %9183  ;;  %8905 = vmatprep.mubr.bf16.mxu0 %v16333_v33 }
 0x5cc   : > { %13568 = vmatprep.subr.msk.bf16.mxu0 %vm204_vm13, %v8978_v2  ;;  %v9195_v12 = vsel %vm18244_vm6, %v9184_v36, %v17133_v25 }
 0x5cd   : > { %10946 = vrot.lane.b32.xlu1 %v16721_v59, %s15116_s19  ;;  %10741 = vrot.lane.b32.xlu0 %v16945_v21, %s15115_s13  ;;  %v8987_v59 = vsel %vm204_vm13, %v8977_v38, 0  ;;  %v9209_v15 = vsel %vm204_vm13, %v9195_v12, 0 }
 0x5ce   : > { %13563 = vmatmul.mubr.msk.bf16.vlgmr.msra.gmra.mrb[8].mxu1 %vm7259_vm14, %v13559_v32 }
 0x5cf   : > { %14053 = vmatpush3.bf16.msra.mxu1 %v8789_v37  ;;  %v17147_v41 = vpop.permute.xlu1 %9189  ;;  %v9188_v42 = vpop.permute.xlu0 %9187  ;;  %14054 = vmatprep.mubr.msk.bf16.mxu1 %vm15108_vm3, %v15107_v62 }
 0x5d0   : > { %13570 = vmatprep.subr.msk.bf16.mxu1 %vm204_vm13, %v8980_v40  ;;  %v9196_v7 = vsel %vm18243_vm5, %v17133_v25, %v9188_v42  ;;  %v9197_v16 = vsel %vm18246_vm2, %v9188_v42, %v17147_v41  ;;  %v13583_v42 = vld [vmem:[%s18185_s3 + $0x28] sm:$0xf] }
 0x5d1   : > { %10950 = vrot.lane.b32.xlu1 %v16733_v6, %s15116_s19  ;;  %10948 = vrot.lane.b32.xlu0 %v16719_v57, %s15116_s19  ;;  %v8993_v57 = vsel %vm204_vm13, %v8979_v26, 0  ;;  %v8981_v6 = vsel %vm18240_vm12, %v17094_v24, %v8974_v20  ;;  %v17246_v24 = vld [vmem:[#allocation2 + $0x20] ss:$0 sps:$4 sm:$0xff]   ;;  %v9215_v27 = vsel %vm204_vm13, %v9197_v16, 0  ;;  %vm18252_vm12 = vmmov %vm18247_vm7 }
 0x5d2   : > { %13565 = vmatmul.mubr.msk.bf16.vlgmr.msra.gmra.mrb[12].mxu0 %vm7259_vm14, %v13559_v32 }
 0x5d3   : > { %9008 = vmatpush1.bf16.msra.mxu0 %v8987_v59  ;;  %v17162_v45 = vpop.permute.xlu1 %9395  ;;  %v17164_v47 = vpop.permute.xlu0 %9191  ;;  %9039 = vmatprep.mubr.bf16.mxu0 %v16333_v33 }
 0x5d4   : > { %13572 = vmatprep.subr.msk.bf16.mxu0 %vm204_vm13, %v8982_v43  ;;  %v9198_v13 = vsel %vm18245_vm15, %v17147_v41, %v17164_v47  ;;  %v9221_v20 = vsel %vm204_vm13, %v17164_v47, 0 }
 0x5d5   : > { %10954 = vrot.lane.b32.xlu1 %v16741_v0, %s15116_s19  ;;  %10952 = vrot.lane.b32.xlu0 %v16729_v60, %s15116_s19  ;;  %v8999_v60 = vsel %vm204_vm13, %v8981_v6, 0  ;;  %v9194_v0 = vsel %vm18241_vm0, %v17118_v23, %v9184_v36  ;;  %vm18254_vm0 = vcmask 302080  }
 0x5d6   : > { %14055 = vmatmul.mubr.msk.bf16.vlgmr.msra.gmra.mrb[12].mxu1 %vm7259_vm14, %v13559_v32  ;;  %vm18256_vm5 = vmmov %vm18254_vm0 }
 0x5d7   : > { %9049 = vmatpush1.bf16.msra.mxu1 %v8993_v57  ;;  %v17176_v22 = vpop.permute.xlu1 %9399  ;;  %v17178_v51 = vpop.permute.xlu0 %9397  ;;  %9080 = vmatprep.mubr.bf16.mxu1 %v16333_v33  ;;  %vm18257_vm6 = vmmov %vm18254_vm0 }
 0x5d8   : > { %14058 = vmatprep.subr.bf16.mxu1 %v15107_v62  ;;  %v9410_v28 = vsel %vm18247_vm7, %v17178_v51, %v17176_v22  ;;  %v9409_v29 = vsel %vm18248_vm8, %v17162_v45, %v17178_v51  ;;  %vm18258_vm15 = vmmov %vm18254_vm0  ;;  %vm18261_vm7 = vcmask 236544  }
 0x5d9   : > { %10958 = vrot.lane.b32.xlu1 %v16930_v39, %s15116_s19  ;;  %10956 = vrot.lane.b32.xlu0 %v16739_v63, %s15116_s19  ;;  %v9005_v63 = vsel %vm204_vm13, %v17107_v1, 0  ;;  %v9193_v39 = vsel %vm18242_vm4, %v9180_v30, %v17118_v23  ;;  %v9419_v32 = vsel %vm204_vm13, %v9409_v29, 0  ;;  %vm18255_vm4 = vmmov %vm18254_vm0 }
 0x5da   : > { %13569 = vmatmul.mubr.msk.bf16.vlgmr.msra.gmra.mrb[8].mxu0 %vm7259_vm14, %v13567_v5  ;;  %vm18259_vm2 = vmmov %vm18254_vm0 }
 0x5db   : > { %9090 = vmatpush1.bf16.msra.mxu0 %v8999_v60  ;;  %v17193_v56 = vpop.permute.xlu1 %9403  ;;  %v17195_v4 = vpop.permute.xlu0 %9401  ;;  %9121 = vmatprep.mubr.bf16.mxu0 %v16333_v33  ;;  %vm18262_vm8 = vmmov %vm18261_vm7 }
 0x5dc   : > { %13576 = vmatprep.subr.msk.bf16.mxu0 %vm204_vm13, %v9194_v0  ;;  %v9412_v31 = vsel %vm18249_vm9, %v17195_v4, %v17193_v56  ;;  %v9411_v35 = vsel %vm18250_vm10, %v17176_v22, %v17195_v4  ;;  %vm18263_vm9 = vmmov %vm18261_vm7 }
 0x5dd   : > { %11187 = vrot.lane.b32.xlu1 %v16655_v50, %s15117_s10  ;;  %10960 = vrot.lane.b32.xlu0 %v16945_v21, %s15116_s19  ;;  %v9203_v21 = vsel %vm204_vm13, %v9193_v39, 0  ;;  %v9425_v37 = vsel %vm204_vm13, %v9411_v35, 0  ;;  %vm18264_vm10 = vmmov %vm18261_vm7 }
 0x5de   : > { %13571 = vmatmul.mubr.msk.bf16.vlgmr.msra.gmra.mrb[8].mxu1 %vm7259_vm14, %v13567_v5 }
 0x5df   : > { %14059 = vmatpush3.bf16.msra.mxu1 %v9005_v63  ;;  %v17210_v8 = vpop.permute.xlu1 %9407  ;;  %v17212_v11 = vpop.permute.xlu0 %9405  ;;  %14060 = vmatprep.mubr.msk.bf16.mxu1 %vm15108_vm3, %v15107_v62 }
 0x5e0   : > { %13578 = vmatprep.subr.msk.bf16.mxu1 %vm204_vm13, %v9196_v7  ;;  %v9414_v2 = vsel %vm18251_vm11, %v17212_v11, %v17210_v8  ;;  %v9413_v38 = vsel %vm18252_vm12, %v17193_v56, %v17212_v11  ;;  %v9437_v47 = vsel %vm204_vm13, %v17210_v8, 0  ;;  %v13591_v11 = vld [vmem:[%s18185_s3 + $0x2c] sm:$0xf]  ;;  %vm18265_vm11 = vmmov %vm18261_vm7 }
 0x5e1   : > { %11191 = vrot.lane.b32.xlu1 %v16661_v34, %s15117_s10  ;;  %11189 = vrot.lane.b32.xlu0 %v16653_v48, %s15117_s10  ;;  %v9431_v59 = vsel %vm204_vm13, %v9413_v38, 0  ;;  %vm18267_vm12 = vmmov %vm18261_vm7 }
 0x5e2   : > { %13573 = vmatmul.mubr.msk.bf16.vlgmr.msra.gmra.mrb[12].mxu0 %vm7259_vm14, %v13567_v5 }
 0x5e3   : > { %9224 = vmatpush1.bf16.msra.mxu0 %v9203_v21  ;;  %v17228_v14 = vpop.permute.xlu1 %9613  ;;  %v17230_v3 = vpop.permute.xlu0 %9611  ;;  %9255 = vmatprep.mubr.bf16.mxu0 %v16333_v33 }
 0x5e4   : > { %13580 = vmatprep.subr.msk.bf16.mxu0 %vm204_vm13, %v9198_v13  ;;  %v9625_v57 = vsel %vm18255_vm4, %v17230_v3, %v17228_v14  ;;  %vm18269_vm4 = vcmask 228352  }
 0x5e5   : > { %11195 = vrot.lane.b32.xlu1 %v16669_v54, %s15117_s10  ;;  %11193 = vrot.lane.b32.xlu0 %v16663_v53, %s15117_s10 }
 0x5e6   : > { %14061 = vmatmul.mubr.msk.bf16.vlgmr.msra.gmra.mrb[12].mxu1 %vm7259_vm14, %v13567_v5  ;;  %v9635_v5 = vsel %vm204_vm13, %v9625_v57, 0 }
 0x5e7   : > { %9265 = vmatpush1.bf16.msra.mxu1 %v9209_v15  ;;  %v17242_v18 = vpop.permute.xlu1 %9617  ;;  %v17244_v19 = vpop.permute.xlu0 %9615  ;;  %9296 = vmatprep.mubr.bf16.mxu1 %v16333_v33 }
 0x5e8   : > { %14064 = vmatprep.subr.bf16.mxu1 %v15107_v62  ;;  %v9626_v26 = vsel %vm18254_vm0, %v17228_v14, %v17244_v19  ;;  %v9627_v60 = vsel %vm18257_vm6, %v17244_v19, %v17242_v18  ;;  %vm18268_vm0 = vmmov %vm18261_vm7 }
 0x5e9   : > { %11199 = vrot.lane.b32.xlu1 %v17246_v24, %s15117_s10  ;;  %11197 = vrot.lane.b32.xlu0 %v16671_v55, %s15117_s10  ;;  %v9641_v63 = vsel %vm204_vm13, %v9627_v60, 0  ;;  %vm18271_vm6 = vmmov %vm18269_vm4 }
 0x5ea   : > { %13577 = vmatmul.mubr.msk.bf16.vlgmr.msra.gmra.mrb[8].mxu0 %vm7259_vm14, %v13575_v10 }
 0x5eb   : > { %9306 = vmatpush1.bf16.msra.mxu0 %v9215_v27  ;;  %v17262_v17 = vpop.permute.xlu1 %9621  ;;  %v17264_v1 = vpop.permute.xlu0 %9619  ;;  %9337 = vmatprep.mubr.bf16.mxu0 %v16333_v33 }
 0x5ec   : > { %13584 = vmatprep.subr.msk.bf16.mxu0 %vm204_vm13, %v9410_v28  ;;  %v9628_v6 = vsel %vm18256_vm5, %v17242_v18, %v17264_v1  ;;  %v9629_v39 = vsel %vm18259_vm2, %v17264_v1, %v17262_v17  ;;  %vm18270_vm5 = vmmov %vm18269_vm4 }
 0x5ed   : > { %11405 = vrot.lane.b32.xlu1 %v16653_v48, %s15118_s18  ;;  %11403 = vrot.lane.b32.xlu0 %v16655_v50, %s15118_s18  ;;  %v9647_v21 = vsel %vm204_vm13, %v9629_v39, 0  ;;  %vm18273_vm2 = vmmov %vm18269_vm4 }
 0x5ee   : > { %13579 = vmatmul.mubr.msk.bf16.vlgmr.msra.gmra.mrb[8].mxu1 %vm7259_vm14, %v13575_v10 }
 0x5ef   : > { %14065 = vmatpush3.bf16.msra.mxu1 %v9221_v20  ;;  %v17281_v23 = vpop.permute.xlu1 %9851  ;;  %v17283_v30 = vpop.permute.xlu0 %9623  ;;  %14066 = vmatprep.mubr.msk.bf16.mxu1 %vm15108_vm3, %v15107_v62 }
 0x5f0   : > { %13586 = vmatprep.subr.msk.bf16.mxu1 %vm204_vm13, %v9412_v31  ;;  %v9630_v0 = vsel %vm18258_vm15, %v17262_v17, %v17283_v30  ;;  %v9653_v3 = vsel %vm204_vm13, %v17283_v30, 0  ;;  %v13599_v30 = vld [vmem:[%s18185_s3 + $0x30] sm:$0xf]  ;;  %vm18272_vm15 = vmmov %vm18269_vm4 }
 0x5f1   : > { %11409 = vrot.lane.b32.xlu1 %v16663_v53, %s15118_s18  ;;  %11407 = vrot.lane.b32.xlu0 %v16661_v34, %s15118_s18 }
 0x5f2   : > { %13581 = vmatmul.mubr.msk.bf16.vlgmr.msra.gmra.mrb[12].mxu0 %vm7259_vm14, %v13575_v10 }
 0x5f3   : > { %9440 = vmatpush1.bf16.msra.mxu0 %v9419_v32  ;;  %v17300_v25 = vpop.permute.xlu1 %9855  ;;  %v17302_v36 = vpop.permute.xlu0 %9853  ;;  %9471 = vmatprep.mubr.bf16.mxu0 %v16333_v33 }
 0x5f4   : > { %13588 = vmatprep.subr.msk.bf16.mxu0 %vm204_vm13, %v9414_v2  ;;  %v9868_v12 = vsel %vm18261_vm7, %v17302_v36, %v17300_v25  ;;  %v9867_v15 = vsel %vm18262_vm8, %v17281_v23, %v17302_v36  ;;  %vm18274_vm7 = vmmov %vm18273_vm2 }
 0x5f5   : > { %11413 = vrot.lane.b32.xlu1 %v16671_v55, %s15118_s18  ;;  %11411 = vrot.lane.b32.xlu0 %v16669_v54, %s15118_s18  ;;  %vm18275_vm8 = vmmov %vm18273_vm2 }
 0x5f6   : > { %14067 = vmatmul.mubr.msk.bf16.vlgmr.msra.gmra.mrb[12].mxu1 %vm7259_vm14, %v13575_v10  ;;  %v9878_v10 = vsel %vm204_vm13, %v9867_v15, 0 }
 0x5f7   : > { %9481 = vmatpush1.bf16.msra.mxu1 %v9425_v37  ;;  %v17315_v40 = vpop.permute.xlu1 %9859  ;;  %v17317_v41 = vpop.permute.xlu0 %9857  ;;  %9512 = vmatprep.mubr.bf16.mxu1 %v16333_v33 }
 0x5f8   : > { %14070 = vmatprep.subr.bf16.mxu1 %v15107_v62  ;;  %v9870_v16 = vsel %vm18263_vm9, %v17317_v41, %v17315_v40  ;;  %v9869_v27 = vsel %vm18264_vm10, %v17300_v25, %v17317_v41  ;;  %vm18276_vm9 = vcmask 220160  }
 0x5f9   : > { %11619 = vrot.lane.b32.xlu1 %v16655_v50, %s18253_s23  ;;  %11415 = vrot.lane.b32.xlu0 %v17246_v24, %s15118_s18  ;;  %v9884_v20 = vsel %vm204_vm13, %v9869_v27, 0  ;;  %vm18277_vm10 = vmmov %vm18276_vm9  ;;  %v13623_v27 = vld [vmem:[%s18185_s3 + $0x38] sm:$0xf] }
 0x5fa   : > { %13585 = vmatmul.mubr.msk.bf16.vlgmr.msra.gmra.mrb[8].mxu0 %vm7259_vm14, %v13583_v42 }
 0x5fb   : > { %9522 = vmatpush1.bf16.msra.mxu0 %v9431_v59  ;;  %v17333_v43 = vpop.permute.xlu1 %9863  ;;  %v17335_v45 = vpop.permute.xlu0 %9861  ;;  %9553 = vmatprep.mubr.bf16.mxu0 %v16333_v33 }
 0x5fc   : > { %13592 = vmatprep.subr.msk.bf16.mxu0 %vm204_vm13, %v9626_v26  ;;  %v9872_v28 = vsel %vm18265_vm11, %v17335_v45, %v17333_v43  ;;  %v9871_v29 = vsel %vm18267_vm12, %v17315_v40, %v17335_v45  ;;  %vm18278_vm11 = vmmov %vm18276_vm9 }
 0x5fd   : > { %11623 = vrot.lane.b32.xlu1 %v16661_v34, %s18253_s23  ;;  %11621 = vrot.lane.b32.xlu0 %v16653_v48, %s18253_s23  ;;  %v9890_v32 = vsel %vm204_vm13, %v9871_v29, 0  ;;  %vm18280_vm12 = vmmov %vm18276_vm9 }
 0x5fe   : > { %13587 = vmatmul.mubr.msk.bf16.vlgmr.msra.gmra.mrb[8].mxu1 %vm7259_vm14, %v13583_v42 }
 0x5ff   : > { %14071 = vmatpush3.bf16.msra.mxu1 %v9437_v47  ;;  %v17352_v22 = vpop.permute.xlu1 %10070  ;;  %v17354_v51 = vpop.permute.xlu0 %9865  ;;  %14072 = vmatprep.mubr.msk.bf16.mxu1 %vm15108_vm3, %v15107_v62 }
 0x600   : > { %13594 = vmatprep.subr.msk.bf16.mxu1 %vm204_vm13, %v9628_v6  ;;  %v9873_v35 = vsel %vm18268_vm0, %v17333_v43, %v17354_v51  ;;  %vm18281_vm0 = vmmov %vm18276_vm9 }
 0x601   : > { %11627 = vrot.lane.b32.xlu1 %v16669_v54, %s18253_s23  ;;  %11625 = vrot.lane.b32.xlu0 %v16663_v53, %s18253_s23  ;;  %v9896_v37 = vsel %vm204_vm13, %v9873_v35, 0 }
 0x602   : > { %13589 = vmatmul.mubr.msk.bf16.vlgmr.msra.gmra.mrb[12].mxu0 %vm7259_vm14, %v13583_v42 }
 0x603   : > { %9656 = vmatpush1.bf16.msra.mxu0 %v9635_v5  ;;  %v17371_v56 = vpop.permute.xlu1 %10074  ;;  %v17373_v4 = vpop.permute.xlu0 %10072  ;;  %9687 = vmatprep.mubr.bf16.mxu0 %v16333_v33  ;;  %v13615_v5 = vld [vmem:[%s18185_s3 + $0x34] sm:$0xf] }
 0x604   : > { %13596 = vmatprep.subr.msk.bf16.mxu0 %vm204_vm13, %v9630_v0  ;;  %v10087_v2 = vsel %vm18269_vm4, %v17373_v4, %v17371_v56  ;;  %v10086_v38 = vsel %vm18270_vm5, %v17352_v22, %v17373_v4  ;;  %vm18282_vm4 = vmmov %vm18281_vm0 }
 0x605   : > { %11631 = vrot.lane.b32.xlu1 %v17246_v24, %s18253_s23  ;;  %11629 = vrot.lane.b32.xlu0 %v16671_v55, %s18253_s23  ;;  %v10097_v59 = vsel %vm204_vm13, %v10086_v38, 0  ;;  %vm18283_vm5 = vmmov %vm18281_vm0 }
 0x606   : > { %14073 = vmatmul.mubr.msk.bf16.vlgmr.msra.gmra.mrb[12].mxu1 %vm7259_vm14, %v13583_v42 }
 0x607   : > { %9697 = vmatpush1.bf16.msra.mxu1 %v9641_v63  ;;  %v17386_v7 = vpop.permute.xlu1 %10078  ;;  %v17388_v8 = vpop.permute.xlu0 %10076  ;;  %9728 = vmatprep.mubr.bf16.mxu1 %v16333_v33 }
 0x608   : > { %14076 = vmatprep.subr.bf16.mxu1 %v15107_v62  ;;  %v10089_v40 = vsel %vm18271_vm6, %v17388_v8, %v17386_v7  ;;  %v10088_v26 = vsel %vm18272_vm15, %v17371_v56, %v17388_v8  ;;  %vm18284_vm6 = vcmask 154624  }
 0x609   : > { %11837 = vrot.lane.b32.xlu1 %v16653_v48, %s18260_s25  ;;  %11835 = vrot.lane.b32.xlu0 %v16655_v50, %s18260_s25  ;;  %v10103_v57 = vsel %vm204_vm13, %v10088_v26, 0  ;;  %vm18285_vm15 = vmmov %vm18284_vm6  ;;  %v13631_v26 = vld [vmem:[%s18185_s3 + $0x3c] sm:$0xf] }
 0x60a   : > { %13593 = vmatmul.mubr.msk.bf16.vlgmr.msra.gmra.mrb[8].mxu0 %vm7259_vm14, %v13591_v11 }
 0x60b   : > { %9738 = vmatpush1.bf16.msra.mxu0 %v9647_v21  ;;  %v17404_v13 = vpop.permute.xlu1 %10082  ;;  %v17406_v14 = vpop.permute.xlu0 %10080  ;;  %9769 = vmatprep.mubr.bf16.mxu0 %v16333_v33 }
 0x60c   : > { %13608 = vmatprep.subr.msk.bf16.mxu0 %vm204_vm13, %v9868_v12  ;;  %v10091_v43 = vsel %vm18273_vm2, %v17406_v14, %v17404_v13  ;;  %v10090_v6 = vsel %vm18274_vm7, %v17386_v7, %v17406_v14  ;;  %vm18286_vm2 = vmmov %vm18284_vm6 }
 0x60d   : > { %11841 = vrot.lane.b32.xlu1 %v16663_v53, %s18260_s25  ;;  %11839 = vrot.lane.b32.xlu0 %v16661_v34, %s18260_s25  ;;  %v10109_v60 = vsel %vm204_vm13, %v10090_v6, 0  ;;  %vm18287_vm7 = vmmov %vm18286_vm2 }
 0x60e   : > { %13595 = vmatmul.mubr.msk.bf16.vlgmr.msra.gmra.mrb[8].mxu1 %vm7259_vm14, %v13591_v11 }
 0x60f   : > { %14077 = vmatpush3.bf16.msra.mxu1 %v9653_v3  ;;  %v17423_v18 = vpop.permute.xlu1 %10289  ;;  %v17425_v19 = vpop.permute.xlu0 %10084  ;;  %14078 = vmatprep.mubr.msk.bf16.mxu1 %vm15108_vm3, %v15107_v62 }
 0x610   : > { %13610 = vmatprep.subr.msk.bf16.mxu1 %vm204_vm13, %v9870_v16  ;;  %v10092_v0 = vsel %vm18275_vm8, %v17404_v13, %v17425_v19  ;;  %vm18288_vm8 = vmmov %vm18286_vm2 }
 0x611   : > { %11845 = vrot.lane.b32.xlu1 %v16671_v55, %s18260_s25  ;;  %11843 = vrot.lane.b32.xlu0 %v16669_v54, %s18260_s25  ;;  %v10115_v39 = vsel %vm204_vm13, %v10092_v0, 0 }
 0x612   : > { %13597 = vmatmul.mubr.msk.bf16.vlgmr.msra.gmra.mrb[12].mxu0 %vm7259_vm14, %v13591_v11 }
 0x613   : > { %9899 = vmatpush1.bf16.msra.mxu0 %v9878_v10  ;;  %v17442_v17 = vpop.permute.xlu1 %10293  ;;  %v17444_v1 = vpop.permute.xlu0 %10291  ;;  %9930 = vmatprep.mubr.bf16.mxu0 %v16333_v33 }
 0x614   : > { %13612 = vmatprep.subr.msk.bf16.mxu0 %vm204_vm13, %v9872_v28  ;;  %v10306_v56 = vsel %vm18276_vm9, %v17444_v1, %v17442_v17  ;;  %v10305_v7 = vsel %vm18277_vm10, %v17423_v18, %v17444_v1  ;;  %vm18289_vm9 = vmmov %vm18286_vm2 }
 0x615   : > { %12051 = vrot.lane.b32.xlu1 %v16655_v50, %s18266_s26  ;;  %11847 = vrot.lane.b32.xlu0 %v17246_v24, %s18260_s25  ;;  %v10316_v12 = vsel %vm204_vm13, %v10305_v7, 0  ;;  %vm18290_vm10 = vmmov %vm18286_vm2 }
 0x616   : > { %14079 = vmatmul.mubr.msk.bf16.vlgmr.msra.gmra.mrb[12].mxu1 %vm7259_vm14, %v13591_v11 }
 0x617   : > { %9940 = vmatpush1.bf16.msra.mxu1 %v9884_v20  ;;  %v17457_v31 = vpop.permute.xlu1 %10297  ;;  %v17459_v23 = vpop.permute.xlu0 %10295  ;;  %9971 = vmatprep.mubr.bf16.mxu1 %v16333_v33 }
 0x618   : > { %14082 = vmatprep.subr.bf16.mxu1 %v15107_v62  ;;  %v10308_v8 = vsel %vm18278_vm11, %v17459_v23, %v17457_v31  ;;  %v10307_v13 = vsel %vm18280_vm12, %v17442_v17, %v17459_v23  ;;  %vm18291_vm11 = vcmask 146432  }
 0x619   : > { %12055 = vrot.lane.b32.xlu1 %v16661_v34, %s18266_s26  ;;  %12053 = vrot.lane.b32.xlu0 %v16653_v48, %s18266_s26  ;;  %v10322_v16 = vsel %vm204_vm13, %v10307_v13, 0  ;;  %vm18292_vm12 = vmmov %vm18291_vm11 }
 0x61a   : > { %13609 = vmatmul.mubr.msk.bf16.vlgmr.msra.gmra.mrb[8].mxu0 %vm7259_vm14, %v13599_v30 }
 0x61b   : > { %9981 = vmatpush1.bf16.msra.mxu0 %v9890_v32  ;;  %v17478_v25 = vpop.permute.xlu1 %10301  ;;  %v17480_v36 = vpop.permute.xlu0 %10299  ;;  %10012 = vmatprep.mubr.bf16.mxu0 %v16333_v33 }
 0x61c   : > { %13616 = vmatprep.subr.msk.bf16.mxu0 %vm204_vm13, %v10087_v2  ;;  %v10310_v14 = vsel %vm18281_vm0, %v17480_v36, %v17478_v25  ;;  %v10309_v18 = vsel %vm18282_vm4, %v17457_v31, %v17480_v36  ;;  %vm18293_vm0 = vmmov %vm18291_vm11 }
 0x61d   : > { %12059 = vrot.lane.b32.xlu1 %v16669_v54, %s18266_s26  ;;  %12057 = vrot.lane.b32.xlu0 %v16663_v53, %s18266_s26  ;;  %v10328_v28 = vsel %vm204_vm13, %v10309_v18, 0  ;;  %vm18294_vm4 = vmmov %vm18293_vm0 }
 0x61e   : > { %13611 = vmatmul.mubr.msk.bf16.vlgmr.msra.gmra.mrb[8].mxu1 %vm7259_vm14, %v13599_v30 }
 0x61f   : > { %14083 = vmatpush3.bf16.msra.mxu1 %v9896_v37  ;;  %v17496_v41 = vpop.permute.xlu1 %10508  ;;  %v17498_v42 = vpop.permute.xlu0 %10303  ;;  %14084 = vmatprep.mubr.msk.bf16.mxu1 %vm15108_vm3, %v15107_v62 }
 0x620   : > { %13618 = vmatprep.subr.msk.bf16.mxu1 %vm204_vm13, %v10089_v40  ;;  %v10311_v17 = vsel %vm18283_vm5, %v17478_v25, %v17498_v42  ;;  %vm18295_vm5 = vmmov %vm18293_vm0 }
 0x621   : > { %12063 = vrot.lane.b32.xlu1 %v17246_v24, %s18266_s26  ;;  %12061 = vrot.lane.b32.xlu0 %v16671_v55, %s18266_s26  ;;  %v10334_v31 = vsel %vm204_vm13, %v10311_v17, 0 }
 0x622   : > { %13613 = vmatmul.mubr.msk.bf16.vlgmr.msra.gmra.mrb[12].mxu0 %vm7259_vm14, %v13599_v30 }
 0x623   : > { %10118 = vmatpush1.bf16.msra.mxu0 %v10097_v59  ;;  %v17515_v45 = vpop.permute.xlu1 %10512  ;;  %v17517_v47 = vpop.permute.xlu0 %10510  ;;  %10149 = vmatprep.mubr.bf16.mxu0 %v16333_v33 }
 0x624   : > { %13620 = vmatprep.subr.msk.bf16.mxu0 %vm204_vm13, %v10091_v43  ;;  %v10525_v1 = vsel %vm18284_vm6, %v17517_v47, %v17515_v45  ;;  %v10524_v23 = vsel %vm18285_vm15, %v17496_v41, %v17517_v47  ;;  %vm18296_vm6 = vmmov %vm18293_vm0 }
 0x625   : > { %12269 = vrot.lane.b32.xlu1 %v16653_v48, %s15122_s11  ;;  %12267 = vrot.lane.b32.xlu0 %v16655_v50, %s15122_s11  ;;  %v10535_v2 = vsel %vm204_vm13, %v10524_v23, 0  ;;  %vm18297_vm15 = vmmov %vm18293_vm0 }
 0x626   : > { %14085 = vmatmul.mubr.msk.bf16.vlgmr.msra.gmra.mrb[12].mxu1 %vm7259_vm14, %v13599_v30 }
 0x627   : > { %10159 = vmatpush1.bf16.msra.mxu1 %v10103_v57  ;;  %v17530_v22 = vpop.permute.xlu1 %10516  ;;  %v17532_v51 = vpop.permute.xlu0 %10514  ;;  %10190 = vmatprep.mubr.bf16.mxu1 %v16333_v33 }
 0x628   : > { %14088 = vmatprep.subr.bf16.mxu1 %v15107_v62  ;;  %v10527_v30 = vsel %vm18286_vm2, %v17532_v51, %v17530_v22  ;;  %v10526_v25 = vsel %vm18287_vm7, %v17515_v45, %v17532_v51  ;;  %vm18298_vm2 = vcmask 138240  }
 0x629   : > { %12273 = vrot.lane.b32.xlu1 %v16663_v53, %s15122_s11  ;;  %12271 = vrot.lane.b32.xlu0 %v16661_v34, %s15122_s11  ;;  %v10541_v40 = vsel %vm204_vm13, %v10526_v25, 0  ;;  %vm18299_vm7 = vmmov %vm18298_vm2 }
 0x62a   : > { %13617 = vmatmul.mubr.msk.bf16.vlgmr.msra.gmra.mrb[8].mxu0 %vm7259_vm14, %v13615_v5 }
 0x62b   : > { %10200 = vmatpush1.bf16.msra.mxu0 %v10109_v60  ;;  %v17551_v4 = vpop.permute.xlu1 %10520  ;;  %v17553_v63 = vpop.permute.xlu0 %10518  ;;  %10231 = vmatprep.mubr.bf16.mxu0 %v16333_v33 }
 0x62c   : > { %13624 = vmatprep.subr.msk.bf16.mxu0 %vm204_vm13, %v10306_v56  ;;  %v10529_v36 = vsel %vm18288_vm8, %v17553_v63, %v17551_v4  ;;  %v10528_v41 = vsel %vm18289_vm9, %v17530_v22, %v17553_v63  ;;  %vm18300_vm8 = vmmov %vm18298_vm2 }
 0x62d   : > { %12277 = vrot.lane.b32.xlu1 %v16671_v55, %s15122_s11  ;;  %12275 = vrot.lane.b32.xlu0 %v16669_v54, %s15122_s11  ;;  %v10547_v43 = vsel %vm204_vm13, %v10528_v41, 0  ;;  %vm18301_vm9 = vmmov %vm18298_vm2 }
 0x62e   : > { %13619 = vmatmul.mubr.msk.bf16.vlgmr.msra.gmra.mrb[8].mxu1 %vm7259_vm14, %v13615_v5 }
 0x62f   : > { %14089 = vmatpush3.bf16.msra.mxu1 %v10115_v39  ;;  %v17569_v11 = vpop.permute.xlu1 %10727  ;;  %v17571_v21 = vpop.permute.xlu0 %10522  ;;  %14090 = vmatprep.mubr.msk.bf16.mxu1 %vm15108_vm3, %v15107_v62 }
 0x630   : > { %13626 = vmatprep.subr.msk.bf16.mxu1 %vm204_vm13, %v10308_v8  ;;  %v10530_v45 = vsel %vm18290_vm10, %v17551_v4, %v17571_v21  ;;  %vm18302_vm10 = vmmov %vm18298_vm2 }
 0x631   : > { %12483 = vrot.lane.b32.xlu1 %v16655_v50, %s18279_s9  ;;  %12279 = vrot.lane.b32.xlu0 %v17246_v24, %s15122_s11  ;;  %v10553_v22 = vsel %vm204_vm13, %v10530_v45, 0 }
 0x632   : > { %13621 = vmatmul.mubr.msk.bf16.vlgmr.msra.gmra.mrb[12].mxu0 %vm7259_vm14, %v13615_v5 }
 0x633   : > { %10337 = vmatpush1.bf16.msra.mxu0 %v10316_v12  ;;  %v17588_v3 = vpop.permute.xlu1 %10731  ;;  %v17590_v15 = vpop.permute.xlu0 %10729  ;;  %10368 = vmatprep.mubr.bf16.mxu0 %v16333_v33 }
 0x634   : > { %13628 = vmatprep.subr.msk.bf16.mxu0 %vm204_vm13, %v10310_v14  ;;  %v10744_v47 = vsel %vm18291_vm11, %v17590_v15, %v17588_v3  ;;  %v10743_v51 = vsel %vm18292_vm12, %v17569_v11, %v17590_v15  ;;  %vm18303_vm11 = vmmov %vm18298_vm2 }
 0x635   : > { %12487 = vrot.lane.b32.xlu1 %v16661_v34, %s18279_s9  ;;  %12485 = vrot.lane.b32.xlu0 %v16653_v48, %s18279_s9  ;;  %vm18304_vm12 = vmmov %vm18298_vm2 }
 0x636   : > { %14091 = vmatmul.mubr.msk.bf16.vlgmr.msra.gmra.mrb[12].mxu1 %vm7259_vm14, %v13615_v5 }
 0x637   : > { %10378 = vmatpush1.bf16.msra.mxu1 %v10322_v16  ;;  %v17603_v19 = vpop.permute.xlu1 %10735  ;;  %v17605_v10 = vpop.permute.xlu0 %10733  ;;  %10409 = vmatprep.mubr.bf16.mxu1 %v16333_v33 }
 0x638   : > { %14094 = vmatprep.subr.bf16.mxu1 %v15107_v62  ;;  %v10746_v5 = vsel %vm18293_vm0, %v17605_v10, %v17603_v19  ;;  %v10745_v56 = vsel %vm18294_vm4, %v17588_v3, %v17605_v10  ;;  %vm18305_vm0 = vcmask 547840  }
 0x639   : > { %12491 = vrot.lane.b32.xlu1 %v16669_v54, %s18279_s9  ;;  %12489 = vrot.lane.b32.xlu0 %v16663_v53, %s18279_s9  ;;  %vm18306_vm4 = vmmov %vm18305_vm0 }
 0x63a   : > { %13625 = vmatmul.mubr.msk.bf16.vlgmr.msra.gmra.mrb[8].mxu0 %vm7259_vm14, %v13623_v27 }
 0x63b   : > { %10419 = vmatpush1.bf16.msra.mxu0 %v10328_v28  ;;  %v17624_v20 = vpop.permute.xlu1 %10739  ;;  %v17626_v29 = vpop.permute.xlu0 %10737  ;;  %10450 = vmatprep.mubr.bf16.mxu0 %v16333_v33 }
 0x63c   : > { %13632 = vmatprep.subr.msk.bf16.mxu0 %vm204_vm13, %v10525_v1  ;;  %v10748_v4 = vsel %vm18295_vm5, %v17626_v29, %v17624_v20  ;;  %vm18307_vm5 = vmmov %vm18305_vm0 }
 0x63d   : > { %12495 = vrot.lane.b32.xlu1 %v17246_v24, %s18279_s9  ;;  %12493 = vrot.lane.b32.xlu0 %v16671_v55, %s18279_s9 }
 0x63e   : > { %13627 = vmatmul.mubr.msk.bf16.vlgmr.msra.gmra.mrb[8].mxu1 %vm7259_vm14, %v13623_v27 }
 0x63f   : > { %14095 = vmatpush3.bf16.msra.mxu1 %v10334_v31  ;;  %v17642_v32 = vpop.permute.xlu1 %10946  ;;  %v17644_v35 = vpop.permute.xlu0 %10741  ;;  %14096 = vmatprep.mubr.msk.bf16.mxu1 %vm15108_vm3, %v15107_v62 }
 0x640   : > { %13634 = vmatprep.subr.msk.bf16.mxu1 %vm204_vm13, %v10527_v30  ;;  %v10749_v11 = vsel %vm18297_vm15, %v17624_v20, %v17644_v35  ;;  %vm18309_vm15 = vmmov %vm18305_vm0 }
 0x641   : > { %12701 = vrot.lane.b32.xlu1 %v16653_v48, %s15124_s14  ;;  %12699 = vrot.lane.b32.xlu0 %v16655_v50, %s15124_s14 }
 0x642   : > { %13629 = vmatmul.mubr.msk.bf16.vlgmr.msra.gmra.mrb[12].mxu0 %vm7259_vm14, %v13623_v27 }
 0x643   : > { %10556 = vmatpush1.bf16.msra.mxu0 %v10535_v2  ;;  %v17661_v37 = vpop.permute.xlu1 %10950  ;;  %v17663_v38 = vpop.permute.xlu0 %10948  ;;  %10587 = vmatprep.mubr.bf16.mxu0 %v16333_v33 }
 0x644   : > { %13636 = vmatprep.subr.msk.bf16.mxu0 %vm204_vm13, %v10529_v36  ;;  %v10963_v21 = vsel %vm18298_vm2, %v17663_v38, %v17661_v37  ;;  %vm18310_vm2 = vmmov %vm18305_vm0 }
 0x645   : > { %12705 = vrot.lane.b32.xlu1 %v16663_v53, %s15124_s14  ;;  %12703 = vrot.lane.b32.xlu0 %v16661_v34, %s15124_s14 }
 0x646   : > { %14097 = vmatmul.mubr.msk.bf16.vlgmr.msra.gmra.mrb[12].mxu1 %vm7259_vm14, %v13623_v27 }
 0x647   : > { %10597 = vmatpush1.bf16.msra.mxu1 %v10541_v40  ;;  %v17676_v42 = vpop.permute.xlu1 %10954  ;;  %v17678_v59 = vpop.permute.xlu0 %10952  ;;  %10628 = vmatprep.mubr.bf16.mxu1 %v16333_v33 }
 0x648   : > { %14100 = vmatprep.subr.bf16.mxu1 %v15107_v62  ;;  %v10965_v14 = vsel %vm18300_vm8, %v17678_v59, %v17676_v42  ;;  %v10964_v18 = vsel %vm18301_vm9, %v17661_v37, %v17678_v59 }
 0x649   : > { %12709 = vrot.lane.b32.xlu1 %v16671_v55, %s15124_s14  ;;  %12707 = vrot.lane.b32.xlu0 %v16669_v54, %s15124_s14  ;;  %v10979_v28 = vsel %vm204_vm13, %v10964_v18, 0 }
 0x64a   : > { %13633 = vmatmul.mubr.msk.bf16.vlgmr.msra.gmra.mrb[8].mxu0 %vm7259_vm14, %v13631_v26 }
 0x64b   : > { %10638 = vmatpush1.bf16.msra.mxu0 %v10547_v43  ;;  %v17697_v57 = vpop.permute.xlu1 %10958  ;;  %v17699_v6 = vpop.permute.xlu0 %10956  ;;  %10669 = vmatprep.mubr.bf16.mxu0 %v16333_v33 }
 0x64c   : > { %13640 = vmatprep.subr.msk.bf16.mxu0 %vm204_vm13, %v10744_v47  ;;  %v10966_v17 = vsel %vm18303_vm11, %v17676_v42, %v17699_v6 }
 0x64d   : > { %12915 = vrot.lane.b32.xlu1 %v16655_v50, %s15125_s7  ;;  %12711 = vrot.lane.b32.xlu0 %v17246_v24, %s15124_s14  ;;  %v10754_v50 = vsel %vm204_vm13, %v10743_v51, 0  ;;  %v10985_v31 = vsel %vm204_vm13, %v10966_v17, 0 }
 0x64e   : > { %13635 = vmatmul.mubr.msk.bf16.vlgmr.msra.gmra.mrb[8].mxu1 %vm7259_vm14, %v13631_v26 }
 0x64f   : > { %14101 = vmatpush3.bf16.msra.mxu1 %v10553_v22  ;;  %v17715_v60 = vpop.permute.xlu1 %11187  ;;  %v17717_v0 = vpop.permute.xlu0 %10960  ;;  %14102 = vmatprep.mubr.msk.bf16.mxu1 %vm15108_vm3, %v15107_v62 }
 0x650   : > { %13642 = vmatprep.subr.msk.bf16.mxu1 %vm204_vm13, %v10746_v5  ;;  %v10968_v23 = vsel %vm18304_vm12, %v17697_v57, %v17717_v0 }
 0x651   : > { %12919 = vrot.lane.b32.xlu1 %v16661_v34, %s15125_s7  ;;  %12917 = vrot.lane.b32.xlu0 %v16653_v48, %s15125_s7  ;;  %v10760_v48 = vsel %vm204_vm13, %v10745_v56, 0  ;;  %v10747_v34 = vsel %vm18296_vm6, %v17603_v19, %v17626_v29  ;;  %v10967_v19 = vsel %vm18302_vm10, %v17699_v6, %v17697_v57  ;;  %v13647_v29 = vld [vmem:[%s18185_s3 + $0x44] sm:$0xf]  ;;  %v10991_v2 = vsel %vm204_vm13, %v10968_v23, 0  ;;  %vm18308_vm6 = vmmov %vm18305_vm0  ;;  %v13655_v6 = vld [vmem:[%s18185_s3 + $0x48] sm:$0xf] }
 0x652   : > { %13637 = vmatmul.mubr.msk.bf16.vlgmr.msra.gmra.mrb[12].mxu0 %vm7259_vm14, %v13631_v26 }
 0x653   : > { %10775 = vmatpush1.bf16.msra.mxu0 %v10754_v50  ;;  %v17734_v63 = vpop.permute.xlu1 %11191  ;;  %v17736_v39 = vpop.permute.xlu0 %11189  ;;  %10806 = vmatprep.mubr.bf16.mxu0 %v16333_v33 }
 0x654   : > { %13644 = vmatprep.subr.msk.bf16.mxu0 %vm204_vm13, %v10748_v4  ;;  %v11202_v30 = vsel %vm18305_vm0, %v17736_v39, %v17734_v63  ;;  %v11201_v25 = vsel %vm18306_vm4, %v17715_v60, %v17736_v39  ;;  %vm18317_vm0 = vcmask 531456  }
 0x655   : > { %12923 = vrot.lane.b32.xlu1 %v16669_v54, %s15125_s7  ;;  %12921 = vrot.lane.b32.xlu0 %v16663_v53, %s15125_s7  ;;  %v13639_v54 = vld [vmem:[%s18185_s3 + $0x40] sm:$0xf]  ;;  %v10766_v53 = vsel %vm204_vm13, %v10747_v34, 0  ;;  %v11211_v40 = vsel %vm204_vm13, %v11201_v25, 0  ;;  %vm18318_vm4 = vmmov %vm18317_vm0 }
 0x656   : > { %14103 = vmatmul.mubr.msk.bf16.vlgmr.msra.gmra.mrb[12].mxu1 %vm7259_vm14, %v13631_v26 }
 0x657   : > { %10816 = vmatpush1.bf16.msra.mxu1 %v10760_v48  ;;  %v17749_v7 = vpop.permute.xlu1 %11195  ;;  %v17751_v8 = vpop.permute.xlu0 %11193  ;;  %10847 = vmatprep.mubr.bf16.mxu1 %v16333_v33 }
 0x658   : > { %14106 = vmatprep.subr.bf16.mxu1 %v15107_v62  ;;  %v11204_v36 = vsel %vm18307_vm5, %v17751_v8, %v17749_v7  ;;  %v11203_v41 = vsel %vm18308_vm6, %v17734_v63, %v17751_v8  ;;  %vm18319_vm5 = vmmov %vm18317_vm0 }
 0x659   : > { %12927 = vrot.lane.b32.xlu1 %v17246_v24, %s15125_s7  ;;  %12925 = vrot.lane.b32.xlu0 %v16671_v55, %s15125_s7  ;;  %v10772_v55 = vsel %vm204_vm13, %v10749_v11, 0  ;;  %v10962_v24 = vsel %vm18299_vm7, %v17642_v32, %v17663_v38  ;;  %v11217_v43 = vsel %vm204_vm13, %v11203_v41, 0  ;;  %vm18311_vm7 = vcmask 539648   ;;  %v13670_v11 = vld [vmem:[%s18185_s3 + $0x4c] sm:$0xf]  ;;  %vm18320_vm6 = vmmov %vm18317_vm0 }
 0x65a   : > { %13641 = vmatmul.mubr.msk.bf16.vlgmr.msra.gmra.mrb[8].mxu0 %vm7259_vm14, %v13639_v54  ;;  %v10973_v16 = vsel %vm204_vm13, %v10962_v24, 0  ;;  %vm18312_vm8 = vmmov %vm18311_vm7 }
 0x65b   : > { %10857 = vmatpush1.bf16.msra.mxu0 %v10766_v53  ;;  %v17770_v12 = vpop.permute.xlu1 %11199  ;;  %v11198_v13 = vpop.permute.xlu0 %11197  ;;  %10888 = vmatprep.mubr.bf16.mxu0 %v16333_v33  ;;  %vm18313_vm9 = vmmov %vm18311_vm7 }
 0x65c   : > { %13648 = vmatprep.subr.msk.bf16.mxu0 %vm204_vm13, %v10963_v21  ;;  %v11206_v42 = vsel %vm18309_vm15, %v11198_v13, %v17770_v12  ;;  %v11205_v45 = vsel %vm18310_vm2, %v17749_v7, %v11198_v13  ;;  %v11229_v0 = vsel %vm204_vm13, %v17770_v12, 0  ;;  %vm18314_vm10 = vmmov %vm18311_vm7 }
 0x65d   : > { %v11223_v22 = vsel %vm204_vm13, %v11205_v45, 0  ;;  %vm18315_vm11 = vmmov %vm18311_vm7 }
 0x65e   : > { %13643 = vmatmul.mubr.msk.bf16.vlgmr.msra.gmra.mrb[8].mxu1 %vm7259_vm14, %v13639_v54  ;;  %vm18316_vm12 = vmmov %vm18311_vm7 }
 0x65f   : > { %14107 = vmatpush3.bf16.msra.mxu1 %v10772_v55  ;;  %v17782_v3 = vpop.permute.xlu1 %11405  ;;  %v17784_v15 = vpop.permute.xlu0 %11403  ;;  %14108 = vmatprep.mubr.msk.bf16.mxu1 %vm15108_vm3, %v15107_v62  ;;  %vm18321_vm15 = vmmov %vm18317_vm0 }
 0x660   : > { %13650 = vmatprep.subr.msk.bf16.mxu1 %vm204_vm13, %v10965_v14  ;;  %v11417_v50 = vsel %vm18312_vm8, %v17784_v15, %v17782_v3  ;;  %vm18322_vm2 = vmmov %vm18317_vm0 }
 0x661   : > { %v11427_v39 = vsel %vm204_vm13, %v11417_v50, 0 }
 0x662   : > { %13645 = vmatmul.mubr.msk.bf16.vlgmr.msra.gmra.mrb[12].mxu0 %vm7259_vm14, %v13639_v54 }
 0x663   : > { %10994 = vmatpush1.bf16.msra.mxu0 %v10973_v16  ;;  %v17797_v10 = vpop.permute.xlu1 %11409  ;;  %v17799_v27 = vpop.permute.xlu0 %11407  ;;  %11025 = vmatprep.mubr.bf16.mxu0 %v16333_v33 }
 0x664   : > { %13652 = vmatprep.subr.msk.bf16.mxu0 %vm204_vm13, %v10967_v19  ;;  %v11418_v51 = vsel %vm18311_vm7, %v17782_v3, %v17799_v27  ;;  %v11419_v48 = vsel %vm18314_vm10, %v17799_v27, %v17797_v10  ;;  %vm18323_vm7 = vcmask 465920  }
 0x665   : > { %vm18324_vm8 = vmmov %vm18323_vm7 }
 0x666   : > { %14109 = vmatmul.mubr.msk.bf16.vlgmr.msra.gmra.mrb[12].mxu1 %vm7259_vm14, %v13639_v54  ;;  %v11433_v54 = vsel %vm204_vm13, %v11419_v48, 0  ;;  %vm18326_vm10 = vmmov %vm18323_vm7  ;;  %v13694_v48 = vld [vmem:[%s18185_s3 + $0x58] sm:$0xf] }
 0x667   : > { %11035 = vmatpush1.bf16.msra.mxu1 %v10979_v28  ;;  %v17808_v1 = vpop.permute.xlu1 %11413  ;;  %v17810_v20 = vpop.permute.xlu0 %11411  ;;  %11066 = vmatprep.mubr.bf16.mxu1 %v16333_v33 }
 0x668   : > { %14112 = vmatprep.subr.bf16.mxu1 %v15107_v62  ;;  %v11420_v56 = vsel %vm18313_vm9, %v17797_v10, %v17810_v20  ;;  %v11421_v53 = vsel %vm18316_vm12, %v17810_v20, %v17808_v1  ;;  %v13678_v20 = vld [vmem:[%s18185_s3 + $0x50] sm:$0xf]  ;;  %vm18325_vm9 = vmmov %vm18323_vm7 }
 0x669   : > { %v11439_v21 = vsel %vm204_vm13, %v11421_v53, 0  ;;  %vm18328_vm12 = vmmov %vm18323_vm7 }
 0x66a   : > { %13649 = vmatmul.mubr.msk.bf16.vlgmr.msra.gmra.mrb[8].mxu0 %vm7259_vm14, %v13647_v29 }
 0x66b   : > { %11076 = vmatpush1.bf16.msra.mxu0 %v10985_v31  ;;  %v17825_v32 = vpop.permute.xlu1 %11619  ;;  %v17827_v35 = vpop.permute.xlu0 %11415  ;;  %11107 = vmatprep.mubr.bf16.mxu0 %v16333_v33 }
 0x66c   : > { %13663 = vmatprep.subr.msk.bf16.mxu0 %vm204_vm13, %v11202_v30  ;;  %v11422_v34 = vsel %vm18315_vm11, %v17808_v1, %v17827_v35  ;;  %v11445_v24 = vsel %vm204_vm13, %v17827_v35, 0  ;;  %vm18327_vm11 = vmmov %vm18323_vm7 }
 0x66e   : > { %13651 = vmatmul.mubr.msk.bf16.vlgmr.msra.gmra.mrb[8].mxu1 %vm7259_vm14, %v13647_v29 }
 0x66f   : > { %14113 = vmatpush3.bf16.msra.mxu1 %v10991_v2  ;;  %v17839_v37 = vpop.permute.xlu1 %11623  ;;  %v17841_v38 = vpop.permute.xlu0 %11621  ;;  %14114 = vmatprep.mubr.msk.bf16.mxu1 %vm15108_vm3, %v15107_v62 }
 0x670   : > { %13665 = vmatprep.subr.msk.bf16.mxu1 %vm204_vm13, %v11204_v36  ;;  %v11634_v55 = vsel %vm18317_vm0, %v17841_v38, %v17839_v37  ;;  %v11633_v14 = vsel %vm18318_vm4, %v17825_v32, %v17841_v38  ;;  %vm18329_vm0 = vcmask 457728  }
 0x671   : > { %v11643_v18 = vsel %vm204_vm13, %v11633_v14, 0  ;;  %vm18330_vm4 = vmmov %vm18329_vm0 }
 0x672   : > { %13653 = vmatmul.mubr.msk.bf16.vlgmr.msra.gmra.mrb[12].mxu0 %vm7259_vm14, %v13647_v29 }
 0x673   : > { %11232 = vmatpush1.bf16.msra.mxu0 %v11211_v40  ;;  %v17853_v59 = vpop.permute.xlu1 %11627  ;;  %v17855_v26 = vpop.permute.xlu0 %11625  ;;  %11263 = vmatprep.mubr.bf16.mxu0 %v16333_v33 }
 0x674   : > { %13667 = vmatprep.subr.msk.bf16.mxu0 %vm204_vm13, %v11206_v42  ;;  %v11636_v3 = vsel %vm18319_vm5, %v17855_v26, %v17853_v59  ;;  %v11635_v19 = vsel %vm18320_vm6, %v17839_v37, %v17855_v26  ;;  %vm18331_vm5 = vmmov %vm18329_vm0 }
 0x675   : > { %v11649_v27 = vsel %vm204_vm13, %v11635_v19, 0  ;;  %vm18332_vm6 = vmmov %vm18329_vm0  ;;  %v13702_v19 = vld [vmem:[%s18185_s3 + $0x5c] sm:$0xf] }
 0x676   : > { %14115 = vmatmul.mubr.msk.bf16.vlgmr.msra.gmra.mrb[12].mxu1 %vm7259_vm14, %v13647_v29 }
 0x677   : > { %11273 = vmatpush1.bf16.msra.mxu1 %v11217_v43  ;;  %v17863_v47 = vpop.permute.xlu1 %11631  ;;  %v17865_v57 = vpop.permute.xlu0 %11629  ;;  %11304 = vmatprep.mubr.bf16.mxu1 %v16333_v33 }
 0x678   : > { %14118 = vmatprep.subr.bf16.mxu1 %v15107_v62  ;;  %v11638_v10 = vsel %vm18321_vm15, %v17865_v57, %v17863_v47  ;;  %v11637_v1 = vsel %vm18322_vm2, %v17853_v59, %v17865_v57  ;;  %v11661_v32 = vsel %vm204_vm13, %v17863_v47, 0  ;;  %v13686_v59 = vld [vmem:[%s18185_s3 + $0x54] sm:$0xf]  ;;  %vm18333_vm15 = vmmov %vm18329_vm0 }
 0x679   : > { %v11655_v29 = vsel %vm204_vm13, %v11637_v1, 0  ;;  %vm18334_vm2 = vmmov %vm18329_vm0 }
 0x67a   : > { %13664 = vmatmul.mubr.msk.bf16.vlgmr.msra.gmra.mrb[8].mxu0 %vm7259_vm14, %v13655_v6 }
 0x67b   : > { %11314 = vmatpush1.bf16.msra.mxu0 %v11223_v22  ;;  %v17877_v5 = vpop.permute.xlu1 %11837  ;;  %v17879_v60 = vpop.permute.xlu0 %11835  ;;  %11345 = vmatprep.mubr.bf16.mxu0 %v16333_v33 }
 0x67c   : > { %13671 = vmatprep.subr.msk.bf16.mxu0 %vm204_vm13, %v11418_v51  ;;  %v11849_v35 = vsel %vm18324_vm8, %v17879_v60, %v17877_v5 }
 0x67d   : > { %v11859_v25 = vsel %vm204_vm13, %v11849_v35, 0 }
 0x67e   : > { %13666 = vmatmul.mubr.msk.bf16.vlgmr.msra.gmra.mrb[8].mxu1 %vm7259_vm14, %v13655_v6 }
 0x67f   : > { %14119 = vmatpush3.bf16.msra.mxu1 %v11229_v0  ;;  %v17892_v4 = vpop.permute.xlu1 %11841  ;;  %v17894_v63 = vpop.permute.xlu0 %11839  ;;  %14120 = vmatprep.mubr.msk.bf16.mxu1 %vm15108_vm3, %v15107_v62 }
 0x680   : > { %13673 = vmatprep.subr.msk.bf16.mxu1 %vm204_vm13, %v11420_v56  ;;  %v11850_v31 = vsel %vm18323_vm7, %v17877_v5, %v17894_v63  ;;  %v11851_v38 = vsel %vm18326_vm10, %v17894_v63, %v17892_v4  ;;  %vm18335_vm7 = vcmask 449536  }
 0x681   : > { %v11865_v41 = vsel %vm204_vm13, %v11851_v38, 0  ;;  %vm18336_vm8 = vmmov %vm18335_vm7 }
 0x682   : > { %13668 = vmatmul.mubr.msk.bf16.vlgmr.msra.gmra.mrb[12].mxu0 %vm7259_vm14, %v13655_v6  ;;  %vm18338_vm10 = vmmov %vm18335_vm7 }
 0x683   : > { %11448 = vmatpush1.bf16.msra.mxu0 %v11427_v39  ;;  %11479 = vmatprep.mubr.bf16.mxu0 %v16333_v33  ;;  %v17909_v7 = vpop.permute.xlu1 %11845  ;;  %v17911_v8 = vpop.permute.xlu0 %11843 }
 0x684   : > { %13675 = vmatprep.subr.msk.bf16.mxu0 %vm204_vm13, %v11422_v34  ;;  %v11852_v2 = vsel %vm18325_vm9, %v17892_v4, %v17911_v8  ;;  %v11853_v42 = vsel %vm18328_vm12, %v17911_v8, %v17909_v7  ;;  %vm18337_vm9 = vmmov %vm18335_vm7 }
 0x685   : > { %v11871_v45 = vsel %vm204_vm13, %v11853_v42, 0  ;;  %vm18340_vm12 = vmmov %vm18335_vm7 }
 0x686   : > { %14121 = vmatmul.mubr.msk.bf16.vlgmr.msra.gmra.mrb[12].mxu1 %vm7259_vm14, %v13655_v6 }
 0x687   : > { %11489 = vmatpush1.bf16.msra.mxu1 %v11433_v54  ;;  %11520 = vmatprep.mubr.bf16.mxu1 %v16333_v33  ;;  %v17924_v12 = vpop.permute.xlu1 %12051  ;;  %v17926_v13 = vpop.permute.xlu0 %11847 }
 0x688   : > { %14124 = vmatprep.subr.bf16.mxu1 %v15107_v62  ;;  %v11854_v40 = vsel %vm18327_vm11, %v17909_v7, %v17926_v13  ;;  %v11877_v57 = vsel %vm204_vm13, %v17926_v13, 0  ;;  %vm18339_vm11 = vmmov %vm18335_vm7 }
 0x68a   : > { %13672 = vmatmul.mubr.msk.bf16.vlgmr.msra.gmra.mrb[8].mxu0 %vm7259_vm14, %v13670_v11 }
 0x68b   : > { %11530 = vmatpush1.bf16.msra.mxu0 %v11439_v21  ;;  %11561 = vmatprep.mubr.bf16.mxu0 %v16333_v33  ;;  %v17945_v15 = vpop.permute.xlu1 %12055  ;;  %v12054_v16 = vpop.permute.xlu0 %12053 }
 0x68c   : > { %13679 = vmatprep.subr.msk.bf16.mxu0 %vm204_vm13, %v11634_v55  ;;  %v12066_v47 = vsel %vm18329_vm0, %v12054_v16, %v17945_v15  ;;  %v12065_v51 = vsel %vm18330_vm4, %v17924_v12, %v12054_v16  ;;  %vm18341_vm0 = vcmask 384000  }
 0x68d   : > { %v12075_v60 = vsel %vm204_vm13, %v12065_v51, 0  ;;  %vm18342_vm4 = vmmov %vm18341_vm0 }
 0x68e   : > { %13674 = vmatmul.mubr.msk.bf16.vlgmr.msra.gmra.mrb[8].mxu1 %vm7259_vm14, %v13670_v11 }
 0x68f   : > { %14125 = vmatpush3.bf16.msra.mxu1 %v11445_v24  ;;  %14126 = vmatprep.mubr.msk.bf16.mxu1 %vm15108_vm3, %v15107_v62  ;;  %v17959_v28 = vpop.permute.xlu1 %12059  ;;  %v12058_v17 = vpop.permute.xlu0 %12057 }
 0x690   : > { %13681 = vmatprep.subr.msk.bf16.mxu1 %vm204_vm13, %v11636_v3  ;;  %v12068_v5 = vsel %vm18331_vm5, %v12058_v17, %v17959_v28  ;;  %v12067_v0 = vsel %vm18332_vm6, %v17945_v15, %v12058_v17  ;;  %vm18343_vm5 = vmmov %vm18341_vm0 }
 0x691   : > { %v12081_v63 = vsel %vm204_vm13, %v12067_v0, 0  ;;  %vm18344_vm6 = vmmov %vm18341_vm0  ;;  %v13718_v0 = vld [vmem:[%s18185_s3 + $0x64] sm:$0xf] }
 0x692   : > { %13676 = vmatmul.mubr.msk.bf16.vlgmr.msra.gmra.mrb[12].mxu0 %vm7259_vm14, %v13670_v11 }
 0x693   : > { %11664 = vmatpush1.bf16.msra.mxu0 %v11643_v18  ;;  %11695 = vmatprep.mubr.bf16.mxu0 %v16333_v33  ;;  %v17976_v23 = vpop.permute.xlu1 %12063  ;;  %v12062_v30 = vpop.permute.xlu0 %12061 }
 0x694   : > { %13683 = vmatprep.subr.msk.bf16.mxu0 %vm204_vm13, %v11638_v10  ;;  %v12070_v50 = vsel %vm18333_vm15, %v12062_v30, %v17976_v23  ;;  %v12069_v39 = vsel %vm18334_vm2, %v17959_v28, %v12062_v30  ;;  %v12093_v53 = vsel %vm204_vm13, %v17976_v23, 0  ;;  %vm18345_vm15 = vmmov %vm18341_vm0 }
 0x695   : > { %v12087_v34 = vsel %vm204_vm13, %v12069_v39, 0  ;;  %vm18346_vm2 = vmmov %vm18341_vm0 }
 0x696   : > { %14127 = vmatmul.mubr.msk.bf16.vlgmr.msra.gmra.mrb[12].mxu1 %vm7259_vm14, %v13670_v11 }
 0x697   : > { %11705 = vmatpush1.bf16.msra.mxu1 %v11649_v27  ;;  %11736 = vmatprep.mubr.bf16.mxu1 %v16333_v33  ;;  %v12270_v36 = vpop.permute.xlu1 %12269  ;;  %v12268_v37 = vpop.permute.xlu0 %12267 }
 0x698   : > { %14130 = vmatprep.subr.bf16.mxu1 %v15107_v62  ;;  %v12281_v11 = vsel %vm18336_vm8, %v12268_v37, %v12270_v36 }
 0x699   : > { %v12291_v55 = vsel %vm204_vm13, %v12281_v11, 0 }
 0x69a   : > { %13680 = vmatmul.mubr.msk.bf16.vlgmr.msra.gmra.mrb[8].mxu0 %vm7259_vm14, %v13678_v20 }
 0x69b   : > { %11746 = vmatpush1.bf16.msra.mxu0 %v11655_v29  ;;  %11777 = vmatprep.mubr.bf16.mxu0 %v16333_v33  ;;  %v12274_v26 = vpop.permute.xlu1 %12273  ;;  %v12272_v43 = vpop.permute.xlu0 %12271 }
 0x69c   : > { %13687 = vmatprep.subr.msk.bf16.mxu0 %vm204_vm13, %v11850_v31  ;;  %v12282_v54 = vsel %vm18335_vm7, %v12270_v36, %v12272_v43  ;;  %v12283_v24 = vsel %vm18338_vm10, %v12272_v43, %v12274_v26  ;;  %v13710_v36 = vld [vmem:[%s18185_s3 + $0x60] sm:$0xf]  ;;  %vm18347_vm7 = vcmask 375808  }
 0x69d   : > { %v12297_v3 = vsel %vm204_vm13, %v12283_v24, 0  ;;  %vm18348_vm8 = vmmov %vm18347_vm7 }
 0x69e   : > { %13682 = vmatmul.mubr.msk.bf16.vlgmr.msra.gmra.mrb[8].mxu1 %vm7259_vm14, %v13678_v20  ;;  %vm18350_vm10 = vmmov %vm18347_vm7 }
 0x69f   : > { %14131 = vmatpush3.bf16.msra.mxu1 %v11661_v32  ;;  %14132 = vmatprep.mubr.msk.bf16.mxu1 %vm15108_vm3, %v15107_v62  ;;  %v12278_v6 = vpop.permute.xlu1 %12277  ;;  %v12276_v22 = vpop.permute.xlu0 %12275 }
 0x6a0   : > { %13689 = vmatprep.subr.msk.bf16.mxu1 %vm204_vm13, %v11852_v2  ;;  %v12284_v21 = vsel %vm18337_vm9, %v12274_v26, %v12276_v22  ;;  %v12285_v18 = vsel %vm18340_vm12, %v12276_v22, %v12278_v6  ;;  %vm18349_vm9 = vmmov %vm18347_vm7 }
 0x6a1   : > { %v12303_v10 = vsel %vm204_vm13, %v12285_v18, 0  ;;  %vm18352_vm12 = vmmov %vm18347_vm7 }
 0x6a2   : > { %13684 = vmatmul.mubr.msk.bf16.vlgmr.msra.gmra.mrb[12].mxu0 %vm7259_vm14, %v13678_v20 }
 0x6a3   : > { %11880 = vmatpush1.bf16.msra.mxu0 %v11859_v25  ;;  %11911 = vmatprep.mubr.bf16.mxu0 %v16333_v33  ;;  %v12484_v56 = vpop.permute.xlu1 %12483  ;;  %v12280_v4 = vpop.permute.xlu0 %12279 }
 0x6a4   : > { %13691 = vmatprep.subr.msk.bf16.mxu0 %vm204_vm13, %v11854_v40  ;;  %v12286_v14 = vsel %vm18339_vm11, %v12278_v6, %v12280_v4  ;;  %v12309_v1 = vsel %vm204_vm13, %v12280_v4, 0  ;;  %vm18351_vm11 = vmmov %vm18347_vm7 }
 0x6a6   : > { %14133 = vmatmul.mubr.msk.bf16.vlgmr.msra.gmra.mrb[12].mxu1 %vm7259_vm14, %v13678_v20 }
 0x6a7   : > { %11921 = vmatpush1.bf16.msra.mxu1 %v11865_v41  ;;  %11952 = vmatprep.mubr.bf16.mxu1 %v16333_v33  ;;  %v12488_v7 = vpop.permute.xlu1 %12487  ;;  %v12486_v8 = vpop.permute.xlu0 %12485 }
 0x6a8   : > { %14136 = vmatprep.subr.bf16.mxu1 %v15107_v62  ;;  %v12498_v27 = vsel %vm18341_vm0, %v12486_v8, %v12488_v7  ;;  %v12497_v20 = vsel %vm18342_vm4, %v12484_v56, %v12486_v8  ;;  %vm18353_vm0 = vcmask 367616  }
 0x6a9   : > { %v12507_v31 = vsel %vm204_vm13, %v12497_v20, 0  ;;  %vm18354_vm4 = vmmov %vm18353_vm0 }
 0x6aa   : > { %13688 = vmatmul.mubr.msk.bf16.vlgmr.msra.gmra.mrb[8].mxu0 %vm7259_vm14, %v13686_v59 }
 0x6ab   : > { %11962 = vmatpush1.bf16.msra.mxu0 %v11871_v45  ;;  %11993 = vmatprep.mubr.bf16.mxu0 %v16333_v33  ;;  %v12492_v12 = vpop.permute.xlu1 %12491  ;;  %v12490_v13 = vpop.permute.xlu0 %12489 }
 0x6ac   : > { %13695 = vmatprep.subr.msk.bf16.mxu0 %vm204_vm13, %v12066_v47  ;;  %v12500_v29 = vsel %vm18343_vm5, %v12490_v13, %v12492_v12  ;;  %v12499_v32 = vsel %vm18344_vm6, %v12488_v7, %v12490_v13  ;;  %vm18355_vm5 = vmmov %vm18353_vm0  ;;  %v13726_v13 = vld [vmem:[%s18185_s3 + $0x68] sm:$0xf] }
 0x6ad   : > { %v12513_v2 = vsel %vm204_vm13, %v12499_v32, 0  ;;  %vm18356_vm6 = vmmov %vm18353_vm0 }
 0x6ae   : > { %13690 = vmatmul.mubr.msk.bf16.vlgmr.msra.gmra.mrb[8].mxu1 %vm7259_vm14, %v13686_v59 }
 0x6af   : > { %14137 = vmatpush3.bf16.msra.mxu1 %v11877_v57  ;;  %14138 = vmatprep.mubr.msk.bf16.mxu1 %vm15108_vm3, %v15107_v62  ;;  %v12496_v15 = vpop.permute.xlu1 %12495  ;;  %v12494_v16 = vpop.permute.xlu0 %12493 }
 0x6b0   : > { %13697 = vmatprep.subr.msk.bf16.mxu1 %vm204_vm13, %v12068_v5  ;;  %v12502_v35 = vsel %vm18345_vm15, %v12494_v16, %v12496_v15  ;;  %v12501_v25 = vsel %vm18346_vm2, %v12492_v12, %v12494_v16  ;;  %v12525_v42 = vsel %vm204_vm13, %v12496_v15, 0  ;;  %vm18357_vm15 = vmmov %vm18353_vm0 }
 0x6b1   : > { %v12519_v40 = vsel %vm204_vm13, %v12501_v25, 0  ;;  %vm18358_vm2 = vmmov %vm18353_vm0 }
 0x6b2   : > { %13692 = vmatmul.mubr.msk.bf16.vlgmr.msra.gmra.mrb[12].mxu0 %vm7259_vm14, %v13686_v59 }
 0x6b3   : > { %12096 = vmatpush1.bf16.msra.mxu0 %v12075_v60  ;;  %12127 = vmatprep.mubr.bf16.mxu0 %v16333_v33  ;;  %v12702_v28 = vpop.permute.xlu1 %12701  ;;  %v12700_v17 = vpop.permute.xlu0 %12699 }
 0x6b4   : > { %13699 = vmatprep.subr.msk.bf16.mxu0 %vm204_vm13, %v12070_v50  ;;  %v12713_v43 = vsel %vm18348_vm8, %v12700_v17, %v12702_v28 }
 0x6b5   : > { %v12723_v47 = vsel %vm204_vm13, %v12713_v43, 0 }
 0x6b6   : > { %14139 = vmatmul.mubr.msk.bf16.vlgmr.msra.gmra.mrb[12].mxu1 %vm7259_vm14, %v13686_v59 }
 0x6b7   : > { %12137 = vmatpush1.bf16.msra.mxu1 %v12081_v63  ;;  %12168 = vmatprep.mubr.bf16.mxu1 %v16333_v33  ;;  %v12706_v23 = vpop.permute.xlu1 %12705  ;;  %v12704_v30 = vpop.permute.xlu0 %12703 }
 0x6b8   : > { %14142 = vmatprep.subr.bf16.mxu1 %v15107_v62  ;;  %v12714_v41 = vsel %vm18347_vm7, %v12702_v28, %v12704_v30  ;;  %v12715_v57 = vsel %vm18350_vm10, %v12704_v30, %v12706_v23 }
 0x6b9   : > { %v12729_v5 = vsel %vm204_vm13, %v12715_v57, 0 }
 0x6ba   : > { %13696 = vmatmul.mubr.msk.bf16.vlgmr.msra.gmra.mrb[8].mxu0 %vm7259_vm14, %v13694_v48 }
 0x6bb   : > { %12178 = vmatpush1.bf16.msra.mxu0 %v12087_v34  ;;  %12209 = vmatprep.mubr.bf16.mxu0 %v16333_v33  ;;  %v12710_v37 = vpop.permute.xlu1 %12709  ;;  %v12708_v38 = vpop.permute.xlu0 %12707 }
 0x6bc   : > { %13703 = vmatprep.subr.msk.bf16.mxu0 %vm204_vm13, %v12282_v54  ;;  %v12716_v45 = vsel %vm18349_vm9, %v12706_v23, %v12708_v38  ;;  %v12717_v60 = vsel %vm18352_vm12, %v12708_v38, %v12710_v37 }
 0x6bd   : > { %v12735_v50 = vsel %vm204_vm13, %v12717_v60, 0 }
 0x6be   : > { %13698 = vmatmul.mubr.msk.bf16.vlgmr.msra.gmra.mrb[8].mxu1 %vm7259_vm14, %v13694_v48 }
 0x6bf   : > { %14143 = vmatpush3.bf16.msra.mxu1 %v12093_v53  ;;  %14144 = vmatprep.mubr.msk.bf16.mxu1 %vm15108_vm3, %v15107_v62  ;;  %v12916_v59 = vpop.permute.xlu1 %12915  ;;  %v12712_v26 = vpop.permute.xlu0 %12711 }
 0x6c0   : > { %13705 = vmatprep.subr.msk.bf16.mxu1 %vm204_vm13, %v12284_v21  ;;  %v12718_v6 = vsel %vm18351_vm11, %v12710_v37, %v12712_v26  ;;  %v12741_v39 = vsel %vm204_vm13, %v12712_v26, 0 }
 0x6c2   : > { %13700 = vmatmul.mubr.msk.bf16.vlgmr.msra.gmra.mrb[12].mxu0 %vm7259_vm14, %v13694_v48 }
 0x6c3   : > { %12312 = vmatpush1.bf16.msra.mxu0 %v12291_v55  ;;  %12343 = vmatprep.mubr.bf16.mxu0 %v16333_v33  ;;  %v12920_v22 = vpop.permute.xlu1 %12919  ;;  %v12918_v51 = vpop.permute.xlu0 %12917 }
 0x6c4   : > { %13707 = vmatprep.subr.msk.bf16.mxu0 %vm204_vm13, %v12286_v14  ;;  %v12930_v63 = vsel %vm18353_vm0, %v12918_v51, %v12920_v22 }
 0x6c6   : > { %14145 = vmatmul.mubr.msk.bf16.vlgmr.msra.gmra.mrb[12].mxu1 %vm7259_vm14, %v13694_v48  ;;  %v12929_v48 = vsel %vm18354_vm4, %v12916_v59, %v12918_v51 }
 0x6c7   : > { %12353 = vmatpush1.bf16.msra.mxu1 %v12297_v3  ;;  %12384 = vmatprep.mubr.bf16.mxu1 %v16333_v33  ;;  %v12924_v56 = vpop.permute.xlu1 %12923  ;;  %v12922_v4 = vpop.permute.xlu0 %12921  ;;  %v12939_v54 = vsel %vm204_vm13, %v12929_v48, 0 }
 0x6c8   : > { %14148 = vmatprep.subr.bf16.mxu1 %v15107_v62  ;;  %v12932_v34 = vsel %vm18355_vm5, %v12922_v4, %v12924_v56  ;;  %v12931_v53 = vsel %vm18356_vm6, %v12920_v22, %v12922_v4 }
 0x6c9   : > { %v12945_v21 = vsel %vm204_vm13, %v12931_v53, 0 }
 0x6ca   : > { %13704 = vmatmul.mubr.msk.bf16.vlgmr.msra.gmra.mrb[8].mxu0 %vm7259_vm14, %v13702_v19 }
 0x6cb   : > { %12394 = vmatpush1.bf16.msra.mxu0 %v12303_v10  ;;  %12425 = vmatprep.mubr.bf16.mxu0 %v16333_v33  ;;  %v12928_v7 = vpop.permute.xlu1 %12927  ;;  %v12926_v8 = vpop.permute.xlu0 %12925 }
 0x6cc   : > { %13711 = vmatprep.subr.msk.bf16.mxu0 %vm204_vm13, %v12498_v27  ;;  %v12934_v11 = vsel %vm18357_vm15, %v12926_v8, %v12928_v7  ;;  %v12933_v12 = vsel %vm18358_vm2, %v12924_v56, %v12926_v8  ;;  %v12957_v24 = vsel %vm204_vm13, %v12928_v7, 0 }
 0x6cd   : > { %v12951_v55 = vsel %vm204_vm13, %v12933_v12, 0 }
 0x6ce   : > { %13706 = vmatmul.mubr.msk.bf16.vlgmr.msra.gmra.mrb[8].mxu1 %vm7259_vm14, %v13702_v19 }
 0x6cf   : > { %14149 = vmatpush3.bf16.msra.mxu1 %v12309_v1  ;;  %14150 = vmatprep.mubr.msk.bf16.mxu1 %vm15108_vm3, %v15107_v62 }
 0x6d0   : > { %13713 = vmatprep.subr.msk.bf16.mxu1 %vm204_vm13, %v12500_v29 }
 0x6d2   : > { %13708 = vmatmul.mubr.msk.bf16.vlgmr.msra.gmra.mrb[12].mxu0 %vm7259_vm14, %v13702_v19 }
 0x6d3   : > { %12528 = vmatpush1.bf16.msra.mxu0 %v12507_v31  ;;  %12559 = vmatprep.mubr.bf16.mxu0 %v16333_v33 }
 0x6d4   : > { %13715 = vmatprep.subr.msk.bf16.mxu0 %vm204_vm13, %v12502_v35 }
 0x6d6   : > { %14151 = vmatmul.mubr.msk.bf16.vlgmr.msra.gmra.mrb[12].mxu1 %vm7259_vm14, %v13702_v19 }
 0x6d7   : > { %12569 = vmatpush1.bf16.msra.mxu1 %v12513_v2  ;;  %12600 = vmatprep.mubr.bf16.mxu1 %v16333_v33 }
 0x6d8   : > { %14154 = vmatprep.subr.bf16.mxu1 %v15107_v62 }
 0x6da   : > { %13712 = vmatmul.mubr.msk.bf16.vlgmr.msra.gmra.mrb[8].mxu0 %vm7259_vm14, %v13710_v36 }
 0x6db   : > { %12610 = vmatpush1.bf16.msra.mxu0 %v12519_v40  ;;  %12641 = vmatprep.mubr.bf16.mxu0 %v16333_v33 }
 0x6dc   : > { %13719 = vmatprep.subr.msk.bf16.mxu0 %vm204_vm13, %v12714_v41 }
 0x6de   : > { %13714 = vmatmul.mubr.msk.bf16.vlgmr.msra.gmra.mrb[8].mxu1 %vm7259_vm14, %v13710_v36 }
 0x6df   : > { %14155 = vmatpush3.bf16.msra.mxu1 %v12525_v42  ;;  %14156 = vmatprep.mubr.msk.bf16.mxu1 %vm15108_vm3, %v15107_v62 }
 0x6e0   : > { %13721 = vmatprep.subr.msk.bf16.mxu1 %vm204_vm13, %v12716_v45 }
 0x6e2   : > { %13716 = vmatmul.mubr.msk.bf16.vlgmr.msra.gmra.mrb[12].mxu0 %vm7259_vm14, %v13710_v36 }
 0x6e3   : > { %12744 = vmatpush1.bf16.msra.mxu0 %v12723_v47  ;;  %12775 = vmatprep.mubr.bf16.mxu0 %v16333_v33 }
 0x6e4   : > { %13723 = vmatprep.subr.msk.bf16.mxu0 %vm204_vm13, %v12718_v6 }
 0x6e6   : > { %14157 = vmatmul.mubr.msk.bf16.vlgmr.msra.gmra.mrb[12].mxu1 %vm7259_vm14, %v13710_v36 }
 0x6e7   : > { %12785 = vmatpush1.bf16.msra.mxu1 %v12729_v5  ;;  %12816 = vmatprep.mubr.bf16.mxu1 %v16333_v33 }
 0x6e8   : > { %14160 = vmatprep.subr.bf16.mxu1 %v15107_v62 }
 0x6ea   : > { %13720 = vmatmul.mubr.msk.bf16.vlgmr.msra.gmra.mrb[8].mxu0 %vm7259_vm14, %v13718_v0 }
 0x6eb   : > { %12826 = vmatpush1.bf16.msra.mxu0 %v12735_v50  ;;  %12857 = vmatprep.mubr.bf16.mxu0 %v16333_v33 }
 0x6ec   : > { %13727 = vmatprep.subr.msk.bf16.mxu0 %vm204_vm13, %v12930_v63 }
 0x6ee   : > { %13722 = vmatmul.mubr.msk.bf16.vlgmr.msra.gmra.mrb[8].mxu1 %vm7259_vm14, %v13718_v0 }
 0x6ef   : > { %14161 = vmatpush3.bf16.msra.mxu1 %v12741_v39  ;;  %14162 = vmatprep.mubr.msk.bf16.mxu1 %vm15108_vm3, %v15107_v62 }
 0x6f0   : > { %13729 = vmatprep.subr.msk.bf16.mxu1 %vm204_vm13, %v12932_v34 }
 0x6f2   : > { %13724 = vmatmul.mubr.msk.bf16.vlgmr.msra.gmra.mrb[12].mxu0 %vm7259_vm14, %v13718_v0 }
 0x6f3   : > { %12960 = vmatpush1.bf16.msra.mxu0 %v12939_v54  ;;  %12991 = vmatprep.mubr.bf16.mxu0 %v16333_v33 }
 0x6f4   : > { %13731 = vmatprep.subr.msk.bf16.mxu0 %vm204_vm13, %v12934_v11 }
 0x6f6   : > { %14163 = vmatmul.mubr.msk.bf16.vlgmr.msra.gmra.mrb[12].mxu1 %vm7259_vm14, %v13718_v0 }
 0x6f7   : > { %13001 = vmatpush1.bf16.msra.mxu1 %v12945_v21  ;;  %13032 = vmatprep.mubr.bf16.mxu1 %v16333_v33 }
 0x6f8   : > { %14166 = vmatprep.subr.bf16.mxu1 %v15107_v62 }
 0x6fa   : > { %13728 = vmatmul.mubr.msk.bf16.vlgmr.msra.gmra.mrb[8].mxu0 %vm7259_vm14, %v13726_v13 }
 0x6fb   : > { %13042 = vmatpush1.bf16.msra.mxu0 %v12951_v55  ;;  %13073 = vmatprep.mubr.bf16.mxu0 %v16333_v33 }
 0x6fe   : > { %13730 = vmatmul.mubr.msk.bf16.vlgmr.msra.gmra.mrb[8].mxu1 %vm7259_vm14, %v13726_v13 }
 0x6ff   : > { %14167 = vmatpush3.bf16.msra.mxu1 %v12957_v24  ;;  %14168 = vmatprep.mubr.msk.bf16.mxu1 %vm15108_vm3, %v15107_v62 }
 0x702   : > { %13732 = vmatmul.mubr.msk.bf16.vlgmr.msra.gmra.mrb[12].mxu0 %vm7259_vm14, %v13726_v13 }
 0x706   : > { %14169 = vmatmul.mubr.msk.bf16.vlgmr.msra.gmra.mrb[12].mxu1 %vm7259_vm14, %v13726_v13 }
 0x7cd   : > { %v12993_v14 = vpop.f32.mrb[8].mxu0 }
 0x7ce   : > { %v13129_v3 = vmul.f32 %v12993_v14, %v16596_v44  ;;  %v12995_v15 = vpop.f32.mrb[9].mxu0 }
 0x7cf   : > { %v13130_v16 = vmul.f32 %v12995_v15, %v16599_v46  ;;  %v12997_v18 = vpop.f32.mrb[10].mxu0 }
 0x7d0   : > { %v12998_v33 = vpop.f32.mrb[11].mxu0 }
 0x7d1   : > { %v13136_v19 = vadd.f32 %v13130_v16, %v13129_v3  ;;  %v13034_v10 = vpop.f32.mrb[8].mxu1 }
 0x7d2   : > { %v13131_v27 = vmul.f32 %v13034_v10, %v16603_v49  ;;  %v13036_v28 = vpop.f32.mrb[9].mxu1 }
 0x7d3   : > { %v13132_v17 = vmul.f32 %v13036_v28, %v16607_v52  ;;  %v13038_v62 = vpop.f32.mrb[10].mxu1 }
 0x7d4   : > { %v13137_v1 = vadd.f32 %v13136_v19, %v13131_v27  ;;  %v13039_v20 = vpop.f32.mrb[11].mxu1 }
 0x7d5   : > { %v13075_v29 = vpop.f32.mrb[12].mxu0 }
 0x7d6   : > { %v13138_v31 = vadd.f32 %v13137_v1, %v13132_v17  ;;  %v13133_v23 = vmul.f32 %v13075_v29, %v16611_v58  ;;  %v13077_v30 = vpop.f32.mrb[13].mxu0 }
 0x7d7   : > { %v13134_v32 = vmul.f32 %v13077_v30, %v16615_v61  ;;  %v13079_v35 = vpop.f32.mrb[14].mxu0 }
 0x7d8   : > { %v13139_v2 = vadd.f32 %v13138_v31, %v13133_v23  ;;  %v13080_v25 = vpop.f32.mrb[15].mxu0 }
 0x7d9   : > { %v13116_v36 = vpop.f32.mrb[12].mxu1 }
 0x7da   : > { %v13140_v37 = vadd.f32 %v13139_v2, %v13134_v32  ;;  %v13135_v38 = vmul.f32 %v13116_v36, %v16618_v9  ;;  %v14170_v40 = vpop.f32.mrb[13].mxu1 }
 0x7db   : > { %v13119_v41 = vpop.f32.mrb[14].mxu1 }
 0x7dc   : > { %v13141_v42 = vsel %vm7082_vm1, %v13135_v38, 0.0  ;;  %v14171_v59 = vpop.f32.mrb[15].mxu1 }
 0x7dd   : > { %v13142_v26 = vadd.f32 %v13141_v42, %v13140_v37 }
 0x7df   : > { %13143 = vadd.xlane.f32.xlu0 %v13142_v26 }
 0x86c   : > { %v13144_v43 = vpop.xlane.xlu0 %13143 }
 0x86d   : > { %v13145_v45 = vmul.f32 0.001953125, %v13144_v43 }
 0x86f   : > { %v13146_v47 = vsub.f32 %v12993_v14, %v13145_v45  ;;  %v13147_v57 = vsub.f32 %v12995_v15, %v13145_v45  ;;  %v13148_v6 = vsub.f32 %v13034_v10, %v13145_v45  ;;  %v13149_v22 = vsub.f32 %v13036_v28, %v13145_v45 }
 0x870   : > { %v13150_v51 = vsub.f32 %v13075_v29, %v13145_v45  ;;  %v13152_v50 = vsub.f32 %v13116_v36, %v13145_v45  ;;  %v13151_v56 = vsub.f32 %v13077_v30, %v13145_v45 }
 0x871   : > { %v13153_v5 = vmul.f32 %v13146_v47, %v13146_v47  ;;  %v13154_v60 = vmul.f32 %v13147_v57, %v13147_v57  ;;  %v13155_v0 = vmul.f32 %v13148_v6, %v13148_v6  ;;  %v13156_v4 = vmul.f32 %v13149_v22, %v13149_v22 }
 0x872   : > { %v13157_v48 = vmul.f32 %v13150_v51, %v13150_v51  ;;  %v13159_v8 = vmul.f32 %v13152_v50, %v13152_v50  ;;  %v13158_v54 = vmul.f32 %v13151_v56, %v13151_v56  ;;  %vm13179_vm3 = vcmp.ge.f32.partialorder %v13146_v47, 0.0 }
 0x873   : > { %v13160_v63 = vmul.f32 %v13153_v5, %v16596_v44  ;;  %v13161_v39 = vmul.f32 %v13154_v60, %v16599_v46  ;;  %v13162_v34 = vmul.f32 %v13155_v0, %v16603_v49  ;;  %v13163_v53 = vmul.f32 %v13156_v4, %v16607_v52 }
 0x874   : > { %v13164_v21 = vmul.f32 %v13157_v48, %v16611_v58  ;;  %v13166_v13 = vmul.f32 %v13159_v8, %v16618_v9  ;;  %v13165_v55 = vmul.f32 %v13158_v54, %v16615_v61  ;;  %vm13180_vm13 = vcmp.ge.f32.partialorder %v13147_v57, 0.0 }
 0x875   : > { %v13167_v7 = vadd.f32 %v13161_v39, %v13160_v63  ;;  %vm13181_vm14 = vcmp.ge.f32.partialorder %v13148_v6, 0.0  ;;  %vm13182_vm7 = vcmp.ge.f32.partialorder %v13149_v22, 0.0  ;;  %vm13183_vm8 = vcmp.ge.f32.partialorder %v13150_v51, 0.0 }
 0x876   : > { %v13172_v46 = vsel %vm7082_vm1, %v13166_v13, 0.0  ;;  %vm13184_vm9 = vcmp.ge.f32.partialorder %v13151_v56, 0.0  ;;  %vm13185_vm10 = vcmp.ge.f32.partialorder %v13152_v50, 0.0 }
 0x877   : > { %v13168_v11 = vadd.f32 %v13167_v7, %v13162_v34 }
 0x879   : > { %v13169_v12 = vadd.f32 %v13168_v11, %v13163_v53 }
 0x87b   : > { %v13170_v44 = vadd.f32 %v13169_v12, %v13164_v21 }
 0x87d   : > { %v13171_v24 = vadd.f32 %v13170_v44, %v13165_v55 }
 0x87f   : > { %v13173_v14 = vadd.f32 %v13172_v46, %v13171_v24 }
 0x881   : > { %13174 = vadd.xlane.f32.xlu1 %v13173_v14 }
 0x90e   : > { %v13175_v49 = vpop.xlane.xlu1 %13174 }
 0x90f   : > { %v13176_v3 = vmul.f32 0.001953125, %v13175_v49 }
 0x911   : > { %v13177_v15 = vadd.f32 1e-05, %v13176_v3 }
 0x913   : > { %15084 = vrsqrt.f32 %v13177_v15 }
 0x91d   : > { %v15085_v52 = vpop.eup %15084 }
 0x91e   : > { %v13186_v58 = vmul.f32 0.2, %v15085_v52 }
 0x920   : > { %v13187_v61 = vsel %vm13179_vm3, %v15085_v52, %v13186_v58  ;;  %v13188_v9 = vsel %vm13180_vm13, %v15085_v52, %v13186_v58  ;;  %v13189_v16 = vsel %vm13181_vm14, %v15085_v52, %v13186_v58  ;;  %v13190_v18 = vsel %vm13182_vm7, %v15085_v52, %v13186_v58 }
 0x921   : > { %v13191_v33 = vsel %vm13183_vm8, %v15085_v52, %v13186_v58  ;;  %v13192_v19 = vsel %vm13184_vm9, %v15085_v52, %v13186_v58  ;;  %v13193_v10 = vsel %vm13185_vm10, %v15085_v52, %v13186_v58  ;;  %v13194_v27 = vmul.f32 %v13187_v61, %v13146_v47 }
 0x922   : > { %v13195_v28 = vmul.f32 %v13188_v9, %v13147_v57  ;;  %v13196_v17 = vmul.f32 %v13189_v16, %v13148_v6  ;;  %v13197_v62 = vmul.f32 %v13190_v18, %v13149_v22  ;;  %v13198_v1 = vmul.f32 %v13191_v33, %v13150_v51 }
 0x923   : > { %v13199_v20 = vmul.f32 %v13192_v19, %v13151_v56  ;;  %v13200_v29 = vmul.f32 %v13193_v10, %v13152_v50  ;;  %13201 = vst [vmem:[%s197_s8] sm:$0xff] %v13194_v27 }
 0x924   : > { %13202 = vst [vmem:[%s197_s8 + $0x8] sm:$0xff] %v13195_v28  ;;  %13203 = vst [vmem:[%s197_s8 + $0x10] sm:$0xff] %v13196_v17 }
 0x925   : > { %13204 = vst [vmem:[%s197_s8 + $0x18] sm:$0xff] %v13197_v62  ;;  %13205 = vst [vmem:[%s197_s8 + $0x20] sm:$0xff] %v13198_v1 }
 0x926   : > { %13206 = vst [vmem:[%s197_s8 + $0x28] sm:$0xff] %v13199_v20  ;;  %13207 = vst.msk [vmem:[%s197_s8 + $0x30] sm:$0xff] %vm7082_vm1, %v13200_v29 }
 0x927 PF: > { %s14_s15 = sadd.s32 1, %s15094_s15  }
 0x928   : > { %p11_p4 = scmp.ge.s32.totalorder %s14_s15, 4  }
 0x92a   :  { %13 = sbr.rel (!%p11_p4) target bundleno = 1 (0x1), region = 118 }

</bundles_post_ra>
